<compile_context>
chip_gen: v6e
topology: v6e:2x2x1
jax: 0.10.0
libtpu: 0.0.40
codegen_flags: <defaults>
</compile_context>

<pallas_src>
import jax
import jax.numpy as jnp
from jax.experimental import pallas as pl
from jax.experimental.pallas import tpu as pltpu


# ---------------------------------------------------------------------------
# Fused kernel: conv (position-batched matmul) + ReLU + FC (contraction over
# position x channel) + ReLU + merged policy/value heads.  No scratch, no loops.
# ---------------------------------------------------------------------------
def _fused_forward_kernel(cols_ref, cw_ref, cb_ref, fw_ref, fb_ref, hw_ref, hb_ref,
                          o_ref):
    # Conv as a position-batched matmul: (P, B, K) x (P, K, Cout) -> (P, B, Cout).
    # bf16 operands on the MXU, f32 accumulation; bias + ReLU stay f32 on the VPU
    # (important on v5e: no bf16 VPU path).
    h1 = jax.lax.dot_general(
        cols_ref[...], cw_ref[...],
        dimension_numbers=(((2,), (1,)), ((0,), (0,))),
        preferred_element_type=jnp.float32)
    h1 = jnp.maximum(h1 + cb_ref[...], 0.0)                  # (P, B, Cout) f32

    # FC: out[b, h] = sum_{p, c} relu_conv[p, b, c] * fc_w[p, c, h].
    # Implemented as a position-batched matmul followed by a reduce over P
    # (the reduce is ~P-1 vreg adds on the VPU; no stores, no relayout).
    h2 = jax.lax.dot_general(
        h1.astype(jnp.bfloat16), fw_ref[...],
        dimension_numbers=(((2,), (1,)), ((0,), (0,))),
        preferred_element_type=jnp.float32)                  # (P, B, hidden_pad)
    h2 = jnp.maximum(jnp.sum(h2, axis=0) + fb_ref[...], 0.0)  # (B, hidden_pad) f32

    # Merged policy/value heads, lane-dense 128-wide output -> unmasked stores.
    out = jnp.dot(h2.astype(jnp.bfloat16), hw_ref[...],
                  preferred_element_type=jnp.float32)
    o_ref[...] = out + hb_ref[...]


# ---------------------------------------------------------------------------
# Glue: im2col producing (position, batch, K) patches, K ordered (kh, kw, c_in)
# ---------------------------------------------------------------------------
def im2col_position_major(x_nchw, kh, kw, stride, pad):
    B, C, H, W = x_nchw.shape
    x = jnp.transpose(x_nchw, (2, 3, 0, 1))                      # (H, W, B, C)
    xp = jnp.pad(x, ((pad, pad), (pad, pad), (0, 0), (0, 0)))
    Ho = (H + 2 * pad - kh) // stride + 1
    Wo = (W + 2 * pad - kw) // stride + 1
    taps = []
    for i in range(kh):
        for j in range(kw):
            taps.append(xp[i:i + Ho * stride:stride, j:j + Wo * stride:stride])  # (Ho,Wo,B,C)
    patches = jnp.concatenate(taps, axis=-1)                     # (Ho, Wo, B, kh*kw*C)
    return patches.reshape(Ho * Wo, B, kh * kw * C), Ho, Wo      # position p = ho*Wo + wo


# ---------------------------------------------------------------------------
# Frozen model forward (single gridless pallas_call)
# ---------------------------------------------------------------------------
def frozen_model_forward(kparams, x_nchw, n_actions=17):
    # "FrozenModelCPU": params are constants, no gradients flow.
    x = jax.lax.stop_gradient(x_nchw)
    kparams = jax.tree_util.tree_map(jax.lax.stop_gradient, kparams)

    B = x.shape[0]
    b_pad = ((B + 7) // 8) * 8                                   # f32 sublane multiple
    x = x.astype(jnp.bfloat16)                                   # halve wrapper HBM traffic
    if b_pad != B:
        x = jnp.pad(x, ((0, b_pad - B), (0, 0), (0, 0), (0, 0)))

    cols, Ho, Wo = im2col_position_major(x, 3, 3, 2, 1)          # (P, b_pad, K) bf16

    P, _, K = cols.shape
    c_out = kparams["conv_w"].shape[-1]
    hidden_pad = kparams["fc_w"].shape[-1]
    n_pad = kparams["head_w"].shape[-1]

    args = (cols, kparams["conv_w"], kparams["conv_b"], kparams["fc_w"],
            kparams["fc_b"], kparams["head_w"], kparams["head_b"])

    flops = 2 * (P * b_pad * K * c_out
                 + P * b_pad * c_out * hidden_pad
                 + b_pad * hidden_pad * n_pad)
    bytes_accessed = sum(int(a.size) * a.dtype.itemsize for a in args) \
        + b_pad * n_pad * 4

    out = pl.pallas_call(
        _fused_forward_kernel,
        out_shape=jax.ShapeDtypeStruct((b_pad, n_pad), jnp.float32),
        in_specs=[pl.BlockSpec(memory_space=pltpu.MemorySpace.VMEM) for _ in args],
        out_specs=pl.BlockSpec(memory_space=pltpu.MemorySpace.VMEM),
        cost_estimate=pl.CostEstimate(flops=flops, transcendentals=0,
                                      bytes_accessed=bytes_accessed),
    )(*args)

    logits = out[:B, :n_actions]
    value = out[:B, n_actions:n_actions + 1]
    return logits, value


# ---------------------------------------------------------------------------
# Deterministic synthetic parameters (PyTorch convention) + frozen packing
# ---------------------------------------------------------------------------
def init_params(c_in=4, c_out=16, hw_out=8, hidden=32, n_actions=17):
    keys = jax.random.split(jax.random.PRNGKey(0), 8)
    flat = c_out * hw_out * hw_out
    return {
        "conv_w": jax.random.normal(keys[0], (c_out, c_in, 3, 3), jnp.float32) * 0.1,
        "conv_b": jax.random.normal(keys[1], (c_out,), jnp.float32) * 0.1,
        # rows indexed in PyTorch NCHW flatten order (c_out, ho, wo)
        "fc_w": jax.random.normal(keys[2], (flat, hidden), jnp.float32) * 0.02,
        "fc_b": jax.random.normal(keys[3], (hidden,), jnp.float32) * 0.1,
        "pi_w": jax.random.normal(keys[4], (hidden, n_actions), jnp.float32) * 0.1,
        "pi_b": jax.random.normal(keys[5], (n_actions,), jnp.float32) * 0.1,
        "vf_w": jax.random.normal(keys[6], (hidden, 1), jnp.float32) * 0.1,
        "vf_b": jax.random.normal(keys[7], (1,), jnp.float32) * 0.1,
    }


def pack_kernel_params(pt, hw_out=8, hidden_pad=128, n_pad=128):
    """One-time packing of the frozen weights into kernel-friendly constants:
    bf16 matmul operands, im2col K-order conv weight replicated per position
    (so the conv is a batched matmul with zero in-kernel relayouts), flatten
    permutation folded into fc_w, hidden padded to 128 lanes, heads merged and
    lane-padded."""
    c_out, c_in, kh, kw = pt["conv_w"].shape
    hidden = pt["fc_w"].shape[1]
    n_actions = pt["pi_w"].shape[1]
    n_pos = hw_out * hw_out
    bf = jnp.bfloat16

    # Conv weight in im2col K-order (kh, kw, c_in), replicated per output position.
    # ~73 KB of replicated frozen bf16 constant: free VMEM-wise on every generation.
    conv_w = pt["conv_w"].transpose(2, 3, 1, 0).reshape(kh * kw * c_in, c_out)
    conv_w = jnp.broadcast_to(conv_w[None], (n_pos, kh * kw * c_in, c_out))

    # Fold PyTorch's (c, h, w) flatten order into fc_w, reshaped to
    # (position, channel, hidden) for the batched contraction; pad hidden -> 128.
    fc_w = pt["fc_w"].reshape(c_out, n_pos, hidden).transpose(1, 0, 2)
    fc_w = jnp.pad(fc_w, ((0, 0), (0, 0), (0, hidden_pad - hidden)))
    fc_b = jnp.pad(pt["fc_b"], (0, hidden_pad - hidden)).reshape(1, hidden_pad)

    # Merge policy + value heads; pad both dims to 128 (zeros sliced off later).
    head_w = jnp.zeros((hidden_pad, n_pad), jnp.float32)
    head_w = head_w.at[:hidden, :n_actions].set(pt["pi_w"])
    head_w = head_w.at[:hidden, n_actions:n_actions + 1].set(pt["vf_w"])
    head_b = jnp.zeros((n_pad,), jnp.float32)
    head_b = head_b.at[:n_actions].set(pt["pi_b"])
    head_b = head_b.at[n_actions:n_actions + 1].set(pt["vf_b"])

    return {
        "conv_w": conv_w.astype(bf),
        "conv_b": pt["conv_b"].reshape(1, 1, c_out).astype(jnp.float32),
        "fc_w": fc_w.astype(bf),
        "fc_b": fc_b.astype(jnp.float32),
        "head_w": head_w.astype(bf),
        "head_b": head_b.reshape(1, n_pad).astype(jnp.float32),
    }


# ---------------------------------------------------------------------------
# Plain-JAX f32 reference of the frozen model (for a numerical sanity check)
# ---------------------------------------------------------------------------
def reference_forward(pt, x_nchw):
    y = jax.lax.conv_general_dilated(
        x_nchw, pt["conv_w"], window_strides=(2, 2), padding=((1, 1), (1, 1)),
        dimension_numbers=("NCHW", "OIHW", "NCHW"))
    y = jnp.maximum(y + pt["conv_b"].reshape(1, -1, 1, 1), 0.0)
    h = y.reshape(y.shape[0], -1)                                # PyTorch x.view(B,-1)
    h = jnp.maximum(h @ pt["fc_w"] + pt["fc_b"], 0.0)
    logits = h @ pt["pi_w"] + pt["pi_b"]
    value = h @ pt["vf_w"] + pt["vf_b"]
    return logits, value


if __name__ == "__main__":
    B, C, H, W = 2, 4, 16, 16
    x = jax.random.normal(jax.random.PRNGKey(0), (B, C, H, W), jnp.float32)

    pt_params = init_params(c_in=C)
    kparams = pack_kernel_params(pt_params)          # frozen, pre-processed constants

    logits, value = jax.jit(frozen_model_forward)(kparams, x)
    jax.block_until_ready((logits, value))

    assert logits.shape == (B, 17) and value.shape == (B, 1)
    assert jnp.all(jnp.isfinite(logits)) and jnp.all(jnp.isfinite(value))

    # Numerical check vs. the f32 reference (bf16 matmul operands -> loose tol).
    ref_logits, ref_value = reference_forward(pt_params, x)
    assert jnp.allclose(logits, ref_logits, atol=5e-2, rtol=5e-2)
    assert jnp.allclose(value, ref_value, atol=5e-2, rtol=5e-2)

    print("KERNEL_OK")
</pallas_src>

<mosaic_0001>
module attributes {stable_mosaic.version = 11 : i64} {
  func.func @_fused_forward_kernel(%arg0: memref<64x8x36xbf16, #tpu.memory_space<vmem>>, %arg1: memref<64x36x16xbf16, #tpu.memory_space<vmem>>, %arg2: memref<1x1x16xf32, #tpu.memory_space<vmem>>, %arg3: memref<64x16x128xbf16, #tpu.memory_space<vmem>>, %arg4: memref<1x128xf32, #tpu.memory_space<vmem>>, %arg5: memref<128x128xbf16, #tpu.memory_space<vmem>>, %arg6: memref<1x128xf32, #tpu.memory_space<vmem>>, %arg7: memref<8x128xf32, #tpu.memory_space<vmem>>) attributes {dimension_semantics = [], scalar_prefetch = 0 : i64, scratch_operands = 0 : i64, tpu.core_type = #tpu.core_type<tc>} {
    %c0 = arith.constant 0 : index
    %c0_0 = arith.constant 0 : index
    %c0_1 = arith.constant 0 : index
    %0 = vector.load %arg0[%c0, %c0_0, %c0_1] : memref<64x8x36xbf16, #tpu.memory_space<vmem>>, vector<64x8x36xbf16>
    %c0_2 = arith.constant 0 : index
    %c0_3 = arith.constant 0 : index
    %c0_4 = arith.constant 0 : index
    %1 = vector.load %arg1[%c0_2, %c0_3, %c0_4] : memref<64x36x16xbf16, #tpu.memory_space<vmem>>, vector<64x36x16xbf16>
    %cst = arith.constant dense<0.000000e+00> : vector<64x8x16xf32>
    %2 = tpu.matmul %0, %1, %cst {dimension_numbers = #tpu.dot_dimension_numbers<[2], [1], [1], [2], [0, 0, 0, 1, 1, 2], [0], [0]>} : vector<64x8x36xbf16>, vector<64x36x16xbf16>, vector<64x8x16xf32> -> vector<64x8x16xf32>
    %c0_5 = arith.constant 0 : index
    %c0_6 = arith.constant 0 : index
    %c0_7 = arith.constant 0 : index
    %3 = vector.load %arg2[%c0_5, %c0_6, %c0_7] : memref<1x1x16xf32, #tpu.memory_space<vmem>>, vector<1x1x16xf32>
    %4 = vector.broadcast %3 : vector<1x1x16xf32> to vector<64x8x16xf32>
    %5 = arith.addf %2, %4 : vector<64x8x16xf32>
    %cst_8 = arith.constant 0.000000e+00 : f32
    %6 = vector.broadcast %cst_8 : f32 to vector<64x8x16xf32>
    %7 = arith.maximumf %5, %6 : vector<64x8x16xf32>
    %8 = arith.truncf %7 : vector<64x8x16xf32> to vector<64x8x16xbf16>
    %c0_9 = arith.constant 0 : index
    %c0_10 = arith.constant 0 : index
    %c0_11 = arith.constant 0 : index
    %9 = vector.load %arg3[%c0_9, %c0_10, %c0_11] : memref<64x16x128xbf16, #tpu.memory_space<vmem>>, vector<64x16x128xbf16>
    %cst_12 = arith.constant dense<0.000000e+00> : vector<64x8x128xf32>
    %10 = tpu.matmul %8, %9, %cst_12 {dimension_numbers = #tpu.dot_dimension_numbers<[2], [1], [1], [2], [0, 0, 0, 1, 1, 2], [0], [0]>} : vector<64x8x16xbf16>, vector<64x16x128xbf16>, vector<64x8x128xf32> -> vector<64x8x128xf32>
    %cst_13 = arith.constant dense<0.000000e+00> : vector<8x128xf32>
    %11 = vector.multi_reduction <add>, %10, %cst_13 [0] : vector<64x8x128xf32> to vector<8x128xf32>
    %c0_14 = arith.constant 0 : index
    %c0_15 = arith.constant 0 : index
    %12 = vector.load %arg4[%c0_14, %c0_15] : memref<1x128xf32, #tpu.memory_space<vmem>>, vector<1x128xf32>
    %13 = vector.broadcast %12 : vector<1x128xf32> to vector<8x128xf32>
    %14 = arith.addf %11, %13 : vector<8x128xf32>
    %cst_16 = arith.constant 0.000000e+00 : f32
    %15 = vector.broadcast %cst_16 : f32 to vector<8x128xf32>
    %16 = arith.maximumf %14, %15 : vector<8x128xf32>
    %17 = arith.truncf %16 : vector<8x128xf32> to vector<8x128xbf16>
    %c0_17 = arith.constant 0 : index
    %c0_18 = arith.constant 0 : index
    %18 = vector.load %arg5[%c0_17, %c0_18] : memref<128x128xbf16, #tpu.memory_space<vmem>>, vector<128x128xbf16>
    %cst_19 = arith.constant dense<0.000000e+00> : vector<8x128xf32>
    %19 = tpu.matmul %17, %18, %cst_19 {dimension_numbers = #tpu.dot_dimension_numbers<[1], [0], [0], [1], [0, 0, 1, 1], [], []>} : vector<8x128xbf16>, vector<128x128xbf16>, vector<8x128xf32> -> vector<8x128xf32>
    %c0_20 = arith.constant 0 : index
    %c0_21 = arith.constant 0 : index
    %20 = vector.load %arg6[%c0_20, %c0_21] : memref<1x128xf32, #tpu.memory_space<vmem>>, vector<1x128xf32>
    %21 = vector.broadcast %20 : vector<1x128xf32> to vector<8x128xf32>
    %22 = arith.addf %19, %21 : vector<8x128xf32>
    %c0_22 = arith.constant 0 : index
    %c0_23 = arith.constant 0 : index
    %23 = vector.load %arg7[%c0_22, %c0_23] : memref<8x128xf32, #tpu.memory_space<vmem>>, vector<8x128xf32>
    tpu.vector_store %arg7[%c0_22, %c0_23], %22 {strides = array<i32>} : memref<8x128xf32, #tpu.memory_space<vmem>>, vector<8x128xf32>,
    return
  }
}

</mosaic_0001>

<bundles_post_ra>
// kernel: frozen_model_forward.1
= control target key start
LH: loop header
LB: loop body
LE: loop exit
PB: predicated region body
PF: predicated region fallthrough
CT: control target
= control target key end

     0   :  { %vm437_vm0 = vcmask 1041408   ;;  %v10005_v0 = vmov 0.0   ;;  %vm10006_vm1 = vmmov 0   ;;  %vm433_vm2 = vcmask 293888   ;;  %s12023_s1 = inlined_call_operand.vmem [shape: bf16[64,36,16], index: 1, kind: input, shape index: {}]   ;;  %s12024_s0 = inlined_call_operand.vmem [shape: bf16[64,8,36], index: 0, kind: input, shape index: {}]   ;;  %s12025_s3 = inlined_call_operand.vmem [shape: bf16[64,16,128], index: 3, kind: input, shape index: {}]   ;;  %s12026_s2 = inlined_call_operand.vmem [shape: f32[1,1,16], index: 2, kind: input, shape index: {}]   ;;  %s12027_s5 = inlined_call_operand.vmem [shape: bf16[128,128], index: 5, kind: input, shape index: {}]   ;;  %s12028_s4 = inlined_call_operand.vmem [shape: f32[1,128], index: 4, kind: input, shape index: {}]   ;;  %s12029_s6 = inlined_call_operand.vmem [shape: f32[1,128], index: 6, kind: input, shape index: {}]   ;;  %s12030_s7 = inlined_call_operand.vmem [shape: f32[8,128], index: 7, kind: output, shape index: {}]  }
   0x1   :  { %8694 = vmatprep.subr.bf16.mxu1 %v10005_v0  ;;  %8714 = vmatprep.subr.bf16.mxu0 %v10005_v0  ;;  %v9740_v1 = vld [vmem:[%s12023_s1 + $0x10] ss:$0 sps:$4 sm:$0x33]   ;;  %v9741_v2 = vld [vmem:[%s12023_s1 + $0x38] ss:$0 sps:$4 sm:$0x33]  }
   0x2   :  { %8700 = vmatprep.mubr.msk.bf16.mxu1 %vm10006_vm1, %v10005_v0  ;;  %8720 = vmatprep.mubr.msk.bf16.mxu0 %vm10006_vm1, %v10005_v0  ;;  %v439_v3 = vsel %vm437_vm0, %v9740_v1, 0  ;;  %v9742_v4 = vld [vmem:[%s12023_s1 + $0x8] sm:$0xff]   ;;  %v561_v5 = vsel %vm437_vm0, %v9741_v2, 0  ;;  %v9743_v6 = vld [vmem:[%s12023_s1 + $0x30] sm:$0xff]   ;;  %v9744_v8 = vld [vmem:[%s12023_s1] sm:$0xff]   ;;  %vm4586_vm3 = vcmask 130048  }
   0x3   :  { %8695 = vmatpush3.bf16.msra.mxu1 %v439_v3  ;;  %8715 = vmatpush3.bf16.msra.mxu0 %v561_v5  ;;  %v9746_v7 = vld [vmem:[%s12023_s1 + $0x24] ss:$0 sps:$4 sm:$0x33]   ;;  %v9747_v9 = vld [vmem:[%s12023_s1 + $0x60] ss:$0 sps:$4 sm:$0x33]  }
   0x4   :  { %8696 = vmatprep.subr.bf16.mxu1 %v10005_v0  ;;  %8716 = vmatprep.subr.bf16.mxu0 %v10005_v0  ;;  %v9745_v10 = vld [vmem:[%s12023_s1 + $0x28] sm:$0xff]   ;;  %v27_v11 = vld [vmem:[%s12024_s0] sm:$0xf]  ;;  %v500_v12 = vsel %vm437_vm0, %v9746_v7, 0  ;;  %v683_v14 = vsel %vm437_vm0, %v9747_v9, 0  ;;  %v9749_v16 = vld [vmem:[%s12023_s1 + $0x58] sm:$0xff]  }
   0x5   :  { %v29_v13 = vld [vmem:[%s12024_s0 + $0x8] sm:$0xf]  ;;  %v9748_v15 = vld [vmem:[%s12023_s1 + $0x1c] sm:$0xff]   ;;  %v9752_v17 = vld [vmem:[%s12023_s1 + $0x4c] ss:$0 sps:$4 sm:$0x33]  }
   0x6   :  { %v9750_v18 = vld [vmem:[%s12023_s1 + $0x14] sm:$0xff]   ;;  %v9753_v19 = vld [vmem:[%s12023_s1 + $0x88] ss:$0 sps:$4 sm:$0x33]   ;;  %v28_v21 = vld [vmem:[%s12024_s0 + $0x4] sm:$0xf] }
   0x7   :  { %8697 = vmatpush3.bf16.msra.mxu1 %v9742_v4  ;;  %8717 = vmatpush3.bf16.msra.mxu0 %v9743_v6  ;;  %v9751_v20 = vld [vmem:[%s12023_s1 + $0x50] sm:$0xff]   ;;  %v622_v22 = vsel %vm437_vm0, %v9752_v17, 0  ;;  %v805_v24 = vsel %vm437_vm0, %v9753_v19, 0  ;;  %v9754_v25 = vld [vmem:[%s12023_s1 + $0x44] sm:$0xff]   ;;  %v9756_v28 = vld [vmem:[%s12023_s1 + $0x3c] sm:$0xff]  }
   0x8   :  { %8698 = vmatprep.subr.bf16.mxu1 %v10005_v0  ;;  %8718 = vmatprep.subr.bf16.mxu0 %v10005_v0  ;;  %v31_v23 = vld [vmem:[%s12024_s0 + $0x10] sm:$0xf]  ;;  %v9755_v26 = vld [vmem:[%s12023_s1 + $0x80] sm:$0xff]   ;;  %v9758_v27 = vld [vmem:[%s12023_s1 + $0x74] ss:$0 sps:$4 sm:$0x33]  }
   0x9   :  { %v9759_v29 = vld [vmem:[%s12023_s1 + $0xb0] ss:$0 sps:$4 sm:$0x33]   ;;  %v9757_v30 = vld [vmem:[%s12023_s1 + $0x78] sm:$0xff]   ;;  %v30_v31 = vld [vmem:[%s12024_s0 + $0xc] sm:$0xf] }
   0xa   :  { %v744_v32 = vsel %vm437_vm0, %v9758_v27, 0  ;;  %v33_v33 = vld [vmem:[%s12024_s0 + $0x18] sm:$0xf]  ;;  %v927_v34 = vsel %vm437_vm0, %v9759_v29, 0  ;;  %v9760_v35 = vld [vmem:[%s12023_s1 + $0x6c] sm:$0xff]   ;;  %v9762_v38 = vld [vmem:[%s12023_s1 + $0x64] sm:$0xff]  }
   0xb   :  { %8699 = vmatpush3.bf16.msra.mxu1 %v9744_v8  ;;  %8719 = vmatpush3.bf16.msra.mxu0 %v9745_v10  ;;  %v9761_v36 = vld [vmem:[%s12023_s1 + $0xa8] sm:$0xff]   ;;  %v9764_v37 = vld [vmem:[%s12023_s1 + $0x9c] ss:$0 sps:$4 sm:$0x33]   ;;  %v9763_v40 = vld [vmem:[%s12023_s1 + $0xa0] sm:$0xff]  }
   0xc   :  { %8704 = vmatprep.subr.bf16.mxu1 %v10005_v0  ;;  %8734 = vmatprep.subr.bf16.mxu0 %v10005_v0  ;;  %v9765_v39 = vld [vmem:[%s12023_s1 + $0xd8] ss:$0 sps:$4 sm:$0x33]   ;;  %v32_v41 = vld [vmem:[%s12024_s0 + $0x14] sm:$0xf]  ;;  %v866_v42 = vsel %vm437_vm0, %v9764_v37, 0 }
   0xd   :  { %v35_v43 = vld [vmem:[%s12024_s0 + $0x20] sm:$0xf]  ;;  %v1049_v44 = vsel %vm437_vm0, %v9765_v39, 0  ;;  %v9766_v45 = vld [vmem:[%s12023_s1 + $0x94] sm:$0xff]   ;;  %v9768_v48 = vld [vmem:[%s12023_s1 + $0x8c] sm:$0xff]  }
   0xe   :  { %8701 = vmatmul.mubr.msk.bf16.vlgmr.msra.gmra.mxu1 %vm433_vm2, %v27_v11  ;;  %8721 = vmatmul.mubr.msk.bf16.vlgmr.msra.gmra.mxu0 %vm433_vm2, %v29_v13  ;;  %v9767_v46 = vld [vmem:[%s12023_s1 + $0xd0] sm:$0xff]   ;;  %v9770_v47 = vld [vmem:[%s12023_s1 + $0xc4] ss:$0 sps:$4 sm:$0x33]   ;;  %v9769_v50 = vld [vmem:[%s12023_s1 + $0xc8] sm:$0xff]  }
   0xf   :  { %8705 = vmatpush3.bf16.msra.mxu1 %v500_v12  ;;  %8735 = vmatpush3.bf16.msra.mxu0 %v683_v14  ;;  %v9771_v49 = vld [vmem:[%s12023_s1 + $0x100] ss:$0 sps:$4 sm:$0x33]   ;;  %v34_v51 = vld [vmem:[%s12024_s0 + $0x1c] sm:$0xf]  ;;  %v988_v52 = vsel %vm437_vm0, %v9770_v47, 0 }
  0x10   :  { %8706 = vmatprep.subr.bf16.mxu1 %v10005_v0  ;;  %8736 = vmatprep.subr.bf16.mxu0 %v10005_v0  ;;  %v37_v53 = vld [vmem:[%s12024_s0 + $0x28] sm:$0xf]  ;;  %v1171_v54 = vsel %vm437_vm0, %v9771_v49, 0  ;;  %v9772_v55 = vld [vmem:[%s12023_s1 + $0xbc] sm:$0xff]   ;;  %v9774_v58 = vld [vmem:[%s12023_s1 + $0xb4] sm:$0xff]  }
  0x11   :  { %8710 = vmatprep.mubr.msk.bf16.mxu1 %vm10006_vm1, %v10005_v0  ;;  %8740 = vmatprep.mubr.msk.bf16.mxu0 %vm10006_vm1, %v10005_v0  ;;  %v9773_v56 = vld [vmem:[%s12023_s1 + $0xf8] sm:$0xff]   ;;  %v9776_v57 = vld [vmem:[%s12023_s1 + $0xec] ss:$0 sps:$4 sm:$0x33]   ;;  %v9775_v60 = vld [vmem:[%s12023_s1 + $0xf0] sm:$0xff]  }
  0x12   :  { %v9777_v59 = vld [vmem:[%s12023_s1 + $0x128] ss:$0 sps:$4 sm:$0x33]   ;;  %v36_v61 = vld [vmem:[%s12024_s0 + $0x24] sm:$0xf]  ;;  %v1110_v62 = vsel %vm437_vm0, %v9776_v57, 0 }
  0x13   :  { %8707 = vmatpush3.bf16.msra.mxu1 %v9748_v15  ;;  %8737 = vmatpush3.bf16.msra.mxu0 %v9749_v16  ;;  %v39_v63 = vld [vmem:[%s12024_s0 + $0x30] sm:$0xf]  ;;  %v1293_v1 = vsel %vm437_vm0, %v9777_v59, 0  ;;  %v9778_v2 = vld [vmem:[%s12023_s1 + $0xe4] sm:$0xff]   ;;  %v9780_v5 = vld [vmem:[%s12023_s1 + $0xdc] sm:$0xff]  }
  0x14   :  { %8708 = vmatprep.subr.bf16.mxu1 %v10005_v0  ;;  %8738 = vmatprep.subr.bf16.mxu0 %v10005_v0  ;;  %v9779_v3 = vld [vmem:[%s12023_s1 + $0x120] sm:$0xff]   ;;  %v9782_v4 = vld [vmem:[%s12023_s1 + $0x114] ss:$0 sps:$4 sm:$0x33]   ;;  %v9781_v7 = vld [vmem:[%s12023_s1 + $0x118] sm:$0xff]  }
  0x15   :  { %v9783_v6 = vld [vmem:[%s12023_s1 + $0x150] ss:$0 sps:$4 sm:$0x33]   ;;  %v38_v8 = vld [vmem:[%s12024_s0 + $0x2c] sm:$0xf]  ;;  %v1232_v9 = vsel %vm437_vm0, %v9782_v4, 0 }
  0x16   :  { %v41_v10 = vld [vmem:[%s12024_s0 + $0x38] sm:$0xf]  ;;  %v1415_v11 = vsel %vm437_vm0, %v9783_v6, 0  ;;  %v9784_v12 = vld [vmem:[%s12023_s1 + $0x10c] sm:$0xff]   ;;  %v9786_v15 = vld [vmem:[%s12023_s1 + $0x104] sm:$0xff]  }
  0x17   :  { %8709 = vmatpush3.bf16.msra.mxu1 %v9750_v18  ;;  %8739 = vmatpush3.bf16.msra.mxu0 %v9751_v20  ;;  %v9785_v13 = vld [vmem:[%s12023_s1 + $0x148] sm:$0xff]   ;;  %v9788_v14 = vld [vmem:[%s12023_s1 + $0x13c] ss:$0 sps:$4 sm:$0x33]   ;;  %v9787_v17 = vld [vmem:[%s12023_s1 + $0x140] sm:$0xff]  }
  0x18   :  { %8724 = vmatprep.subr.bf16.mxu1 %v10005_v0  ;;  %8754 = vmatprep.subr.bf16.mxu0 %v10005_v0  ;;  %v9789_v16 = vld [vmem:[%s12023_s1 + $0x178] ss:$0 sps:$4 sm:$0x33]   ;;  %v40_v18 = vld [vmem:[%s12024_s0 + $0x34] sm:$0xf]  ;;  %v1354_v19 = vsel %vm437_vm0, %v9788_v14, 0 }
  0x19   :  { %v43_v20 = vld [vmem:[%s12024_s0 + $0x40] sm:$0xf]  ;;  %v9801_v37 = vld [vmem:[%s12023_s1 + $0x1c8] ss:$0 sps:$4 sm:$0x33]  }
  0x1a   :  { %8711 = vmatmul.mubr.msk.bf16.vlgmr.msra.gmra.mxu1 %vm433_vm2, %v28_v21  ;;  %8741 = vmatmul.mubr.msk.bf16.vlgmr.msra.gmra.mxu0 %vm433_vm2, %v31_v23  ;;  %v1537_v21 = vsel %vm437_vm0, %v9789_v16, 0  ;;  %v9791_v23 = vld [vmem:[%s12023_s1 + $0x170] sm:$0xff]   ;;  %v9795_v27 = vld [vmem:[%s12023_s1 + $0x1a0] ss:$0 sps:$4 sm:$0x33]  }
  0x1b   :  { %8725 = vmatpush3.bf16.msra.mxu1 %v622_v22  ;;  %8755 = vmatpush3.bf16.msra.mxu0 %v805_v24  ;;  %v9790_v22 = vld [vmem:[%s12023_s1 + $0x134] sm:$0xff]   ;;  %v9794_v24 = vld [vmem:[%s12023_s1 + $0x164] ss:$0 sps:$4 sm:$0x33]  }
  0x1c   :  { %8726 = vmatprep.subr.bf16.mxu1 %v10005_v0  ;;  %8756 = vmatprep.subr.bf16.mxu0 %v10005_v0  ;;  %v1476_v29 = vsel %vm437_vm0, %v9794_v24, 0  ;;  %v9807_v47 = vld [vmem:[%s12023_s1 + $0x1f0] ss:$0 sps:$4 sm:$0x33]  }
  0x1d   :  { %8730 = vmatprep.mubr.msk.bf16.mxu1 %vm10006_vm1, %v10005_v0  ;;  %8760 = vmatprep.mubr.msk.bf16.mxu0 %vm10006_vm1, %v10005_v0  ;;  %v9813_v57 = vld [vmem:[%s12023_s1 + $0x218] ss:$0 sps:$4 sm:$0x33]   ;;  %v9819_v4 = vld [vmem:[%s12023_s1 + $0x240] ss:$0 sps:$4 sm:$0x33]  }
  0x1e   :  { %v9825_v14 = vld [vmem:[%s12023_s1 + $0x268] ss:$0 sps:$4 sm:$0x33]   ;;  %v9831_v24 = vld [vmem:[%s12023_s1 + $0x290] ss:$0 sps:$4 sm:$0x33]  }
  0x1f   :  { %8727 = vmatpush3.bf16.msra.mxu1 %v9754_v25  ;;  %8757 = vmatpush3.bf16.msra.mxu0 %v9755_v26  ;;  %v9792_v25 = vld [vmem:[%s12023_s1 + $0x12c] sm:$0xff]  }
  0x20   :  { %8728 = vmatprep.subr.bf16.mxu1 %v10005_v0  ;;  %8758 = vmatprep.subr.bf16.mxu0 %v10005_v0  ;;  %v9793_v26 = vld [vmem:[%s12023_s1 + $0x168] sm:$0xff]  }
  0x23   :  { %8729 = vmatpush3.bf16.msra.mxu1 %v9756_v28  ;;  %8759 = vmatpush3.bf16.msra.mxu0 %v9757_v30  ;;  %v42_v28 = vld [vmem:[%s12024_s0 + $0x3c] sm:$0xf]  ;;  %v45_v30 = vld [vmem:[%s12024_s0 + $0x48] sm:$0xf] }
  0x24   :  { %8744 = vmatprep.subr.bf16.mxu1 %v10005_v0  ;;  %8774 = vmatprep.subr.bf16.mxu0 %v10005_v0 }
  0x26   :  { %8731 = vmatmul.mubr.msk.bf16.vlgmr.msra.gmra.mxu1 %vm433_vm2, %v30_v31  ;;  %8761 = vmatmul.mubr.msk.bf16.vlgmr.msra.gmra.mxu0 %vm433_vm2, %v33_v33  ;;  %v1659_v31 = vsel %vm437_vm0, %v9795_v27, 0  ;;  %v9797_v33 = vld [vmem:[%s12023_s1 + $0x198] sm:$0xff]  }
  0x27   :  { %8745 = vmatpush3.bf16.msra.mxu1 %v744_v32  ;;  %8775 = vmatpush3.bf16.msra.mxu0 %v927_v34  ;;  %v9796_v32 = vld [vmem:[%s12023_s1 + $0x15c] sm:$0xff]   ;;  %v9798_v34 = vld [vmem:[%s12023_s1 + $0x154] sm:$0xff]  }
  0x28   :  { %8746 = vmatprep.subr.bf16.mxu1 %v10005_v0  ;;  %8776 = vmatprep.subr.bf16.mxu0 %v10005_v0  ;;  %v57_v27 = vld [vmem:[%s12024_s0 + $0x78] sm:$0xf] }
  0x29   :  { %8750 = vmatprep.mubr.msk.bf16.mxu1 %vm10006_vm1, %v10005_v0  ;;  %8780 = vmatprep.mubr.msk.bf16.mxu0 %vm10006_vm1, %v10005_v0 }
  0x2b   :  { %8747 = vmatpush3.bf16.msra.mxu1 %v9760_v35  ;;  %8777 = vmatpush3.bf16.msra.mxu0 %v9761_v36  ;;  %v9800_v35 = vld [vmem:[%s12023_s1 + $0x18c] ss:$0 sps:$4 sm:$0x33]   ;;  %v9799_v36 = vld [vmem:[%s12023_s1 + $0x190] sm:$0xff]  }
  0x2c   :  { %8748 = vmatprep.subr.bf16.mxu1 %v10005_v0  ;;  %8778 = vmatprep.subr.bf16.mxu0 %v10005_v0  ;;  %v1598_v39 = vsel %vm437_vm0, %v9800_v35, 0  ;;  %v56_v35 = vld [vmem:[%s12024_s0 + $0x74] sm:$0xf] }
  0x2f   :  { %8749 = vmatpush3.bf16.msra.mxu1 %v9762_v38  ;;  %8779 = vmatpush3.bf16.msra.mxu0 %v9763_v40  ;;  %v44_v38 = vld [vmem:[%s12024_s0 + $0x44] sm:$0xf]  ;;  %v47_v40 = vld [vmem:[%s12024_s0 + $0x50] sm:$0xf] }
  0x30   :  { %8764 = vmatprep.subr.bf16.mxu1 %v10005_v0  ;;  %8794 = vmatprep.subr.bf16.mxu0 %v10005_v0 }
  0x32   :  { %8751 = vmatmul.mubr.msk.bf16.vlgmr.msra.gmra.mxu1 %vm433_vm2, %v32_v41  ;;  %8781 = vmatmul.mubr.msk.bf16.vlgmr.msra.gmra.mxu0 %vm433_vm2, %v35_v43  ;;  %v1781_v41 = vsel %vm437_vm0, %v9801_v37, 0  ;;  %v9803_v43 = vld [vmem:[%s12023_s1 + $0x1c0] sm:$0xff]  }
  0x33   :  { %8765 = vmatpush3.bf16.msra.mxu1 %v866_v42  ;;  %8795 = vmatpush3.bf16.msra.mxu0 %v1049_v44  ;;  %v9802_v42 = vld [vmem:[%s12023_s1 + $0x184] sm:$0xff]   ;;  %v9806_v44 = vld [vmem:[%s12023_s1 + $0x1b4] ss:$0 sps:$4 sm:$0x33]   ;;  %v59_v37 = vld [vmem:[%s12024_s0 + $0x80] sm:$0xf] }
  0x34   :  { %8766 = vmatprep.subr.bf16.mxu1 %v10005_v0  ;;  %8796 = vmatprep.subr.bf16.mxu0 %v10005_v0  ;;  %v1720_v49 = vsel %vm437_vm0, %v9806_v44, 0  ;;  %v9843_v44 = vld [vmem:[%s12023_s1 + $0x2e0] ss:$0 sps:$4 sm:$0x33]  }
  0x35   :  { %8770 = vmatprep.mubr.msk.bf16.mxu1 %vm10006_vm1, %v10005_v0  ;;  %8800 = vmatprep.mubr.msk.bf16.mxu0 %vm10006_vm1, %v10005_v0 }
  0x37   :  { %8767 = vmatpush3.bf16.msra.mxu1 %v9766_v45  ;;  %8797 = vmatpush3.bf16.msra.mxu0 %v9767_v46  ;;  %v9804_v45 = vld [vmem:[%s12023_s1 + $0x17c] sm:$0xff]  }
  0x38   :  { %8768 = vmatprep.subr.bf16.mxu1 %v10005_v0  ;;  %8798 = vmatprep.subr.bf16.mxu0 %v10005_v0  ;;  %v9805_v46 = vld [vmem:[%s12023_s1 + $0x1b8] sm:$0xff]  }
  0x3b   :  { %8769 = vmatpush3.bf16.msra.mxu1 %v9768_v48  ;;  %8799 = vmatpush3.bf16.msra.mxu0 %v9769_v50  ;;  %v46_v48 = vld [vmem:[%s12024_s0 + $0x4c] sm:$0xf]  ;;  %v49_v50 = vld [vmem:[%s12024_s0 + $0x58] sm:$0xf] }
  0x3c   :  { %8784 = vmatprep.subr.bf16.mxu1 %v10005_v0  ;;  %8814 = vmatprep.subr.bf16.mxu0 %v10005_v0 }
  0x3e   :  { %8771 = vmatmul.mubr.msk.bf16.vlgmr.msra.gmra.mxu1 %vm433_vm2, %v34_v51  ;;  %8801 = vmatmul.mubr.msk.bf16.vlgmr.msra.gmra.mxu0 %vm433_vm2, %v37_v53  ;;  %v1903_v51 = vsel %vm437_vm0, %v9807_v47, 0  ;;  %v9809_v53 = vld [vmem:[%s12023_s1 + $0x1e8] sm:$0xff]  }
  0x3f   :  { %8785 = vmatpush3.bf16.msra.mxu1 %v988_v52  ;;  %8815 = vmatpush3.bf16.msra.mxu0 %v1171_v54  ;;  %v9808_v52 = vld [vmem:[%s12023_s1 + $0x1ac] sm:$0xff]   ;;  %v9812_v54 = vld [vmem:[%s12023_s1 + $0x1dc] ss:$0 sps:$4 sm:$0x33]   ;;  %v61_v47 = vld [vmem:[%s12024_s0 + $0x88] sm:$0xf] }
  0x40   :  { %8786 = vmatprep.subr.bf16.mxu1 %v10005_v0  ;;  %8816 = vmatprep.subr.bf16.mxu0 %v10005_v0  ;;  %v1842_v59 = vsel %vm437_vm0, %v9812_v54, 0 }
  0x41   :  { %8790 = vmatprep.mubr.msk.bf16.mxu1 %vm10006_vm1, %v10005_v0  ;;  %8820 = vmatprep.mubr.msk.bf16.mxu0 %vm10006_vm1, %v10005_v0 }
  0x43   :  { %8787 = vmatpush3.bf16.msra.mxu1 %v9772_v55  ;;  %8817 = vmatpush3.bf16.msra.mxu0 %v9773_v56  ;;  %v9810_v55 = vld [vmem:[%s12023_s1 + $0x1a4] sm:$0xff]  }
  0x44   :  { %8788 = vmatprep.subr.bf16.mxu1 %v10005_v0  ;;  %8818 = vmatprep.subr.bf16.mxu0 %v10005_v0  ;;  %v9811_v56 = vld [vmem:[%s12023_s1 + $0x1e0] sm:$0xff]  }
  0x47   :  { %8789 = vmatpush3.bf16.msra.mxu1 %v9774_v58  ;;  %8819 = vmatpush3.bf16.msra.mxu0 %v9775_v60  ;;  %v48_v58 = vld [vmem:[%s12024_s0 + $0x54] sm:$0xf]  ;;  %v51_v60 = vld [vmem:[%s12024_s0 + $0x60] sm:$0xf] }
  0x48   :  { %8804 = vmatprep.subr.bf16.mxu1 %v10005_v0  ;;  %8834 = vmatprep.subr.bf16.mxu0 %v10005_v0 }
  0x4a   :  { %8791 = vmatmul.mubr.msk.bf16.vlgmr.msra.gmra.mxu1 %vm433_vm2, %v36_v61  ;;  %8821 = vmatmul.mubr.msk.bf16.vlgmr.msra.gmra.mxu0 %vm433_vm2, %v39_v63  ;;  %v2025_v61 = vsel %vm437_vm0, %v9813_v57, 0  ;;  %v9815_v63 = vld [vmem:[%s12023_s1 + $0x210] sm:$0xff]  }
  0x4b   :  { %8805 = vmatpush3.bf16.msra.mxu1 %v1110_v62  ;;  %8835 = vmatpush3.bf16.msra.mxu0 %v1293_v1  ;;  %v9814_v62 = vld [vmem:[%s12023_s1 + $0x1d4] sm:$0xff]   ;;  %v9818_v1 = vld [vmem:[%s12023_s1 + $0x204] ss:$0 sps:$4 sm:$0x33]  }
  0x4c   :  { %8806 = vmatprep.subr.bf16.mxu1 %v10005_v0  ;;  %8836 = vmatprep.subr.bf16.mxu0 %v10005_v0  ;;  %v1964_v6 = vsel %vm437_vm0, %v9818_v1, 0 }
  0x4d   :  { %8810 = vmatprep.mubr.msk.bf16.mxu1 %vm10006_vm1, %v10005_v0  ;;  %8840 = vmatprep.mubr.msk.bf16.mxu0 %vm10006_vm1, %v10005_v0 }
  0x4f   :  { %8807 = vmatpush3.bf16.msra.mxu1 %v9778_v2  ;;  %8837 = vmatpush3.bf16.msra.mxu0 %v9779_v3  ;;  %v9816_v2 = vld [vmem:[%s12023_s1 + $0x1cc] sm:$0xff]  }
  0x50   :  { %8808 = vmatprep.subr.bf16.mxu1 %v10005_v0  ;;  %8838 = vmatprep.subr.bf16.mxu0 %v10005_v0  ;;  %v9817_v3 = vld [vmem:[%s12023_s1 + $0x208] sm:$0xff]  }
  0x53   :  { %8809 = vmatpush3.bf16.msra.mxu1 %v9780_v5  ;;  %8839 = vmatpush3.bf16.msra.mxu0 %v9781_v7  ;;  %v50_v5 = vld [vmem:[%s12024_s0 + $0x5c] sm:$0xf]  ;;  %v53_v7 = vld [vmem:[%s12024_s0 + $0x68] sm:$0xf] }
  0x54   :  { %8824 = vmatprep.subr.bf16.mxu1 %v10005_v0  ;;  %8854 = vmatprep.subr.bf16.mxu0 %v10005_v0 }
  0x56   :  { %8811 = vmatmul.mubr.msk.bf16.vlgmr.msra.gmra.mxu1 %vm433_vm2, %v38_v8  ;;  %8841 = vmatmul.mubr.msk.bf16.vlgmr.msra.gmra.mxu0 %vm433_vm2, %v41_v10  ;;  %v2147_v8 = vsel %vm437_vm0, %v9819_v4, 0  ;;  %v9821_v10 = vld [vmem:[%s12023_s1 + $0x238] sm:$0xff]  }
  0x57   :  { %8825 = vmatpush3.bf16.msra.mxu1 %v1232_v9  ;;  %8855 = vmatpush3.bf16.msra.mxu0 %v1415_v11  ;;  %v9820_v9 = vld [vmem:[%s12023_s1 + $0x1fc] sm:$0xff]   ;;  %v9824_v11 = vld [vmem:[%s12023_s1 + $0x22c] ss:$0 sps:$4 sm:$0x33]  }
  0x58   :  { %8826 = vmatprep.subr.bf16.mxu1 %v10005_v0  ;;  %8856 = vmatprep.subr.bf16.mxu0 %v10005_v0  ;;  %v2086_v16 = vsel %vm437_vm0, %v9824_v11, 0  ;;  %v9852_v11 = vld [vmem:[%s12023_s1 + $0x2bc] sm:$0xff]  }
  0x59   :  { %8830 = vmatprep.mubr.msk.bf16.mxu1 %vm10006_vm1, %v10005_v0  ;;  %8860 = vmatprep.mubr.msk.bf16.mxu0 %vm10006_vm1, %v10005_v0 }
  0x5b   :  { %8827 = vmatpush3.bf16.msra.mxu1 %v9784_v12  ;;  %8857 = vmatpush3.bf16.msra.mxu0 %v9785_v13  ;;  %v9822_v12 = vld [vmem:[%s12023_s1 + $0x1f4] sm:$0xff]  }
  0x5c   :  { %8828 = vmatprep.subr.bf16.mxu1 %v10005_v0  ;;  %8858 = vmatprep.subr.bf16.mxu0 %v10005_v0  ;;  %v9823_v13 = vld [vmem:[%s12023_s1 + $0x230] sm:$0xff]  }
  0x5f   :  { %8829 = vmatpush3.bf16.msra.mxu1 %v9786_v15  ;;  %8859 = vmatpush3.bf16.msra.mxu0 %v9787_v17  ;;  %v52_v15 = vld [vmem:[%s12024_s0 + $0x64] sm:$0xf]  ;;  %v55_v17 = vld [vmem:[%s12024_s0 + $0x70] sm:$0xf] }
  0x60   :  { %8844 = vmatprep.subr.bf16.mxu1 %v10005_v0  ;;  %8874 = vmatprep.subr.bf16.mxu0 %v10005_v0 }
  0x62   :  { %8831 = vmatmul.mubr.msk.bf16.vlgmr.msra.gmra.mxu1 %vm433_vm2, %v40_v18  ;;  %8861 = vmatmul.mubr.msk.bf16.vlgmr.msra.gmra.mxu0 %vm433_vm2, %v43_v20  ;;  %v2269_v18 = vsel %vm437_vm0, %v9825_v14, 0  ;;  %v9827_v20 = vld [vmem:[%s12023_s1 + $0x260] sm:$0xff]   ;;  %v9853_v14 = vld [vmem:[%s12023_s1 + $0x2f8] sm:$0xff]  }
  0x63   :  { %8845 = vmatpush3.bf16.msra.mxu1 %v1354_v19  ;;  %8875 = vmatpush3.bf16.msra.mxu0 %v1537_v21  ;;  %v9826_v19 = vld [vmem:[%s12023_s1 + $0x224] sm:$0xff]   ;;  %v9828_v21 = vld [vmem:[%s12023_s1 + $0x21c] sm:$0xff]  }
  0x64   :  { %8846 = vmatprep.subr.bf16.mxu1 %v10005_v0  ;;  %8876 = vmatprep.subr.bf16.mxu0 %v10005_v0 }
  0x65   :  { %8850 = vmatprep.mubr.msk.bf16.mxu1 %vm10006_vm1, %v10005_v0  ;;  %8880 = vmatprep.mubr.msk.bf16.mxu0 %vm10006_vm1, %v10005_v0 }
  0x67   :  { %8847 = vmatpush3.bf16.msra.mxu1 %v9790_v22  ;;  %8877 = vmatpush3.bf16.msra.mxu0 %v9791_v23  ;;  %v9830_v22 = vld [vmem:[%s12023_s1 + $0x254] ss:$0 sps:$4 sm:$0x33]   ;;  %v9829_v23 = vld [vmem:[%s12023_s1 + $0x258] sm:$0xff]  }
  0x68   :  { %8848 = vmatprep.subr.bf16.mxu1 %v10005_v0  ;;  %8878 = vmatprep.subr.bf16.mxu0 %v10005_v0 }
  0x6b   :  { %8849 = vmatpush3.bf16.msra.mxu1 %v9792_v25  ;;  %8879 = vmatpush3.bf16.msra.mxu0 %v9793_v26  ;;  %v54_v25 = vld [vmem:[%s12024_s0 + $0x6c] sm:$0xf]  ;;  %v2208_v26 = vsel %vm437_vm0, %v9830_v22, 0 }
  0x6c   :  { %8864 = vmatprep.subr.bf16.mxu1 %v10005_v0  ;;  %8894 = vmatprep.subr.bf16.mxu0 %v10005_v0 }
  0x6e   :  { %8851 = vmatmul.mubr.msk.bf16.vlgmr.msra.gmra.mxu1 %vm433_vm2, %v42_v28  ;;  %8881 = vmatmul.mubr.msk.bf16.vlgmr.msra.gmra.mxu0 %vm433_vm2, %v45_v30  ;;  %v2391_v28 = vsel %vm437_vm0, %v9831_v24, 0  ;;  %v9833_v30 = vld [vmem:[%s12023_s1 + $0x288] sm:$0xff]  }
  0x6f   :  { %8865 = vmatpush3.bf16.msra.mxu1 %v1476_v29  ;;  %8895 = vmatpush3.bf16.msra.mxu0 %v1659_v31  ;;  %v9832_v29 = vld [vmem:[%s12023_s1 + $0x24c] sm:$0xff]   ;;  %v9834_v31 = vld [vmem:[%s12023_s1 + $0x244] sm:$0xff]  }
  0x70   :  { %8866 = vmatprep.subr.bf16.mxu1 %v10005_v0  ;;  %8896 = vmatprep.subr.bf16.mxu0 %v10005_v0 }
  0x71   :  { %8870 = vmatprep.mubr.msk.bf16.mxu1 %vm10006_vm1, %v10005_v0  ;;  %8900 = vmatprep.mubr.msk.bf16.mxu0 %vm10006_vm1, %v10005_v0 }
  0x73   :  { %8867 = vmatpush3.bf16.msra.mxu1 %v9796_v32  ;;  %8897 = vmatpush3.bf16.msra.mxu0 %v9797_v33  ;;  %v9835_v32 = vld [vmem:[%s12023_s1 + $0x280] sm:$0xff]   ;;  %v9836_v33 = vld [vmem:[%s12023_s1 + $0x27c] ss:$0 sps:$4 sm:$0x33]  }
  0x74   :  { %8868 = vmatprep.subr.bf16.mxu1 %v10005_v0  ;;  %8898 = vmatprep.subr.bf16.mxu0 %v10005_v0 }
  0x77   :  { %8869 = vmatpush3.bf16.msra.mxu1 %v9798_v34  ;;  %8899 = vmatpush3.bf16.msra.mxu0 %v9799_v36  ;;  %v9837_v34 = vld [vmem:[%s12023_s1 + $0x2b8] ss:$0 sps:$4 sm:$0x33]   ;;  %v2330_v36 = vsel %vm437_vm0, %v9836_v33, 0 }
  0x78   :  { %8884 = vmatprep.subr.bf16.mxu1 %v10005_v0  ;;  %8914 = vmatprep.subr.bf16.mxu0 %v10005_v0  ;;  %v9860_v33 = vld [vmem:[%s12023_s1 + $0x31c] ss:$0 sps:$4 sm:$0x33]  }
  0x7a   :  { %8871 = vmatmul.mubr.msk.bf16.vlgmr.msra.gmra.mxu1 %vm433_vm2, %v44_v38  ;;  %8901 = vmatmul.mubr.msk.bf16.vlgmr.msra.gmra.mxu0 %vm433_vm2, %v47_v40  ;;  %v2513_v38 = vsel %vm437_vm0, %v9837_v34, 0  ;;  %v9839_v40 = vld [vmem:[%s12023_s1 + $0x2b0] sm:$0xff]   ;;  %v9861_v34 = vld [vmem:[%s12023_s1 + $0x358] ss:$0 sps:$4 sm:$0x33]  }
  0x7b   :  { %8885 = vmatpush3.bf16.msra.mxu1 %v1598_v39  ;;  %8915 = vmatpush3.bf16.msra.mxu0 %v1781_v41  ;;  %v9838_v39 = vld [vmem:[%s12023_s1 + $0x274] sm:$0xff]   ;;  %v9840_v41 = vld [vmem:[%s12023_s1 + $0x26c] sm:$0xff]  }
  0x7c   :  { %8886 = vmatprep.subr.bf16.mxu1 %v10005_v0  ;;  %8916 = vmatprep.subr.bf16.mxu0 %v10005_v0 }
  0x7d   :  { %8890 = vmatprep.mubr.msk.bf16.mxu1 %vm10006_vm1, %v10005_v0  ;;  %8920 = vmatprep.mubr.msk.bf16.mxu0 %vm10006_vm1, %v10005_v0 }
  0x7f   :  { %8887 = vmatpush3.bf16.msra.mxu1 %v9802_v42  ;;  %8917 = vmatpush3.bf16.msra.mxu0 %v9803_v43  ;;  %v9841_v42 = vld [vmem:[%s12023_s1 + $0x2a8] sm:$0xff]   ;;  %v9842_v43 = vld [vmem:[%s12023_s1 + $0x2a4] ss:$0 sps:$4 sm:$0x33]  }
  0x80   :  { %8888 = vmatprep.subr.bf16.mxu1 %v10005_v0  ;;  %8918 = vmatprep.subr.bf16.mxu0 %v10005_v0 }
  0x83   :  { %8889 = vmatpush3.bf16.msra.mxu1 %v9804_v45  ;;  %8919 = vmatpush3.bf16.msra.mxu0 %v9805_v46  ;;  %v58_v45 = vld [vmem:[%s12024_s0 + $0x7c] sm:$0xf]  ;;  %v2452_v46 = vsel %vm437_vm0, %v9842_v43, 0 }
  0x84   :  { %8904 = vmatprep.subr.bf16.mxu1 %v10005_v0  ;;  %8934 = vmatprep.subr.bf16.mxu0 %v10005_v0 }
  0x86   :  { %8891 = vmatmul.mubr.msk.bf16.vlgmr.msra.gmra.mxu1 %vm433_vm2, %v46_v48  ;;  %8921 = vmatmul.mubr.msk.bf16.vlgmr.msra.gmra.mxu0 %vm433_vm2, %v49_v50  ;;  %v2635_v48 = vsel %vm437_vm0, %v9843_v44, 0  ;;  %v9844_v50 = vld [vmem:[%s12023_s1 + $0x29c] sm:$0xff]   ;;  %v9863_v44 = vld [vmem:[%s12023_s1 + $0x350] sm:$0xff]  }
  0x87   :  { %8905 = vmatpush3.bf16.msra.mxu1 %v1720_v49  ;;  %8935 = vmatpush3.bf16.msra.mxu0 %v1903_v51 }
  0x88   :  { %8906 = vmatprep.subr.bf16.mxu1 %v10005_v0  ;;  %8936 = vmatprep.subr.bf16.mxu0 %v10005_v0 }
  0x89   :  { %8910 = vmatprep.mubr.msk.bf16.mxu1 %vm10006_vm1, %v10005_v0  ;;  %8940 = vmatprep.mubr.msk.bf16.mxu0 %vm10006_vm1, %v10005_v0 }
  0x8b   :  { %8907 = vmatpush3.bf16.msra.mxu1 %v9808_v52  ;;  %8937 = vmatpush3.bf16.msra.mxu0 %v9809_v53  ;;  %v9845_v53 = vld [vmem:[%s12023_s1 + $0x2d8] sm:$0xff]  }
  0x8c   :  { %8908 = vmatprep.subr.bf16.mxu1 %v10005_v0  ;;  %8938 = vmatprep.subr.bf16.mxu0 %v10005_v0 }
  0x8f   :  { %8909 = vmatpush3.bf16.msra.mxu1 %v9810_v55  ;;  %8939 = vmatpush3.bf16.msra.mxu0 %v9811_v56  ;;  %v9846_v56 = vld [vmem:[%s12023_s1 + $0x294] sm:$0xff]  }
  0x90   :  { %8924 = vmatprep.subr.bf16.mxu1 %v10005_v0  ;;  %8954 = vmatprep.subr.bf16.mxu0 %v10005_v0 }
  0x92   :  { %8911 = vmatmul.mubr.msk.bf16.vlgmr.msra.gmra.mxu1 %vm433_vm2, %v48_v58  ;;  %8941 = vmatmul.mubr.msk.bf16.vlgmr.msra.gmra.mxu0 %vm433_vm2, %v51_v60  ;;  %v9848_v60 = vld [vmem:[%s12023_s1 + $0x2cc] ss:$0 sps:$4 sm:$0x33]  }
  0x93   :  { %8925 = vmatpush3.bf16.msra.mxu1 %v1842_v59  ;;  %8955 = vmatpush3.bf16.msra.mxu0 %v2025_v61  ;;  %v9847_v59 = vld [vmem:[%s12023_s1 + $0x2d0] sm:$0xff]   ;;  %v9849_v61 = vld [vmem:[%s12023_s1 + $0x308] ss:$0 sps:$4 sm:$0x33]   ;;  %v2574_v1 = vsel %vm437_vm0, %v9848_v60, 0  ;;  %v9868_v60 = vld [vmem:[%s12023_s1 + $0x33c] sm:$0xff]  }
  0x94   :  { %8926 = vmatprep.subr.bf16.mxu1 %v10005_v0  ;;  %8956 = vmatprep.subr.bf16.mxu0 %v10005_v0 }
  0x95   :  { %8930 = vmatprep.mubr.msk.bf16.mxu1 %vm10006_vm1, %v10005_v0  ;;  %8960 = vmatprep.mubr.msk.bf16.mxu0 %vm10006_vm1, %v10005_v0 }
  0x97   :  { %8927 = vmatpush3.bf16.msra.mxu1 %v9814_v62  ;;  %8957 = vmatpush3.bf16.msra.mxu0 %v9815_v63  ;;  %v60_v63 = vld [vmem:[%s12024_s0 + $0x84] sm:$0xf] }
  0x98   :  { %8928 = vmatprep.subr.bf16.mxu1 %v10005_v0  ;;  %8958 = vmatprep.subr.bf16.mxu0 %v10005_v0 }
  0x9b   :  { %8929 = vmatpush3.bf16.msra.mxu1 %v9816_v2  ;;  %8959 = vmatpush3.bf16.msra.mxu0 %v9817_v3  ;;  %v63_v2 = vld [vmem:[%s12024_s0 + $0x90] sm:$0xf]  ;;  %v2757_v3 = vsel %vm437_vm0, %v9849_v61, 0 }
  0x9c   :  { %8944 = vmatprep.subr.bf16.mxu1 %v10005_v0  ;;  %8974 = vmatprep.subr.bf16.mxu0 %v10005_v0 }
  0x9e   :  { %8931 = vmatmul.mubr.msk.bf16.vlgmr.msra.gmra.mxu1 %vm433_vm2, %v50_v5  ;;  %8961 = vmatmul.mubr.msk.bf16.vlgmr.msra.gmra.mxu0 %vm433_vm2, %v53_v7  ;;  %v9850_v5 = vld [vmem:[%s12023_s1 + $0x2c4] sm:$0xff]  }
  0x9f   :  { %8945 = vmatpush3.bf16.msra.mxu1 %v1964_v6  ;;  %8975 = vmatpush3.bf16.msra.mxu0 %v2147_v8  ;;  %v9851_v8 = vld [vmem:[%s12023_s1 + $0x300] sm:$0xff]  }
  0xa0   :  { %8946 = vmatprep.subr.bf16.mxu1 %v10005_v0  ;;  %8976 = vmatprep.subr.bf16.mxu0 %v10005_v0 }
  0xa1   :  { %8950 = vmatprep.mubr.msk.bf16.mxu1 %vm10006_vm1, %v10005_v0  ;;  %8980 = vmatprep.mubr.msk.bf16.mxu0 %vm10006_vm1, %v10005_v0 }
  0xa3   :  { %8947 = vmatpush3.bf16.msra.mxu1 %v9820_v9  ;;  %8977 = vmatpush3.bf16.msra.mxu0 %v9821_v10 }
  0xa4   :  { %8948 = vmatprep.subr.bf16.mxu1 %v10005_v0  ;;  %8978 = vmatprep.subr.bf16.mxu0 %v10005_v0 }
  0xa7   :  { %8949 = vmatpush3.bf16.msra.mxu1 %v9822_v12  ;;  %8979 = vmatpush3.bf16.msra.mxu0 %v9823_v13 }
  0xa8   :  { %8964 = vmatprep.subr.bf16.mxu1 %v10005_v0  ;;  %8994 = vmatprep.subr.bf16.mxu0 %v10005_v0 }
  0xaa   :  { %8951 = vmatmul.mubr.msk.bf16.vlgmr.msra.gmra.mxu1 %vm433_vm2, %v52_v15  ;;  %8981 = vmatmul.mubr.msk.bf16.vlgmr.msra.gmra.mxu0 %vm433_vm2, %v55_v17  ;;  %v9854_v15 = vld [vmem:[%s12023_s1 + $0x2f4] ss:$0 sps:$4 sm:$0x33]  }
  0xab   :  { %8965 = vmatpush3.bf16.msra.mxu1 %v2086_v16  ;;  %8995 = vmatpush3.bf16.msra.mxu0 %v2269_v18  ;;  %v9855_v16 = vld [vmem:[%s12023_s1 + $0x330] ss:$0 sps:$4 sm:$0x33]   ;;  %v62_v18 = vld [vmem:[%s12024_s0 + $0x8c] sm:$0xf] }
  0xac   :  { %8966 = vmatprep.subr.bf16.mxu1 %v10005_v0  ;;  %8996 = vmatprep.subr.bf16.mxu0 %v10005_v0 }
  0xad   :  { %8970 = vmatprep.mubr.msk.bf16.mxu1 %vm10006_vm1, %v10005_v0  ;;  %9000 = vmatprep.mubr.msk.bf16.mxu0 %vm10006_vm1, %v10005_v0 }
  0xaf   :  { %8967 = vmatpush3.bf16.msra.mxu1 %v9826_v19  ;;  %8997 = vmatpush3.bf16.msra.mxu0 %v9827_v20  ;;  %v2696_v19 = vsel %vm437_vm0, %v9854_v15, 0  ;;  %v65_v20 = vld [vmem:[%s12024_s0 + $0x98] sm:$0xf] }
  0xb0   :  { %8968 = vmatprep.subr.bf16.mxu1 %v10005_v0  ;;  %8998 = vmatprep.subr.bf16.mxu0 %v10005_v0 }
  0xb3   :  { %8969 = vmatpush3.bf16.msra.mxu1 %v9828_v21  ;;  %8999 = vmatpush3.bf16.msra.mxu0 %v9829_v23  ;;  %v2879_v21 = vsel %vm437_vm0, %v9855_v16, 0  ;;  %v9856_v23 = vld [vmem:[%s12023_s1 + $0x2ec] sm:$0xff]  }
  0xb4   :  { %8984 = vmatprep.subr.bf16.mxu1 %v10005_v0  ;;  %9014 = vmatprep.subr.bf16.mxu0 %v10005_v0 }
  0xb6   :  { %8971 = vmatmul.mubr.msk.bf16.vlgmr.msra.gmra.mxu1 %vm433_vm2, %v54_v25  ;;  %9001 = vmatmul.mubr.msk.bf16.vlgmr.msra.gmra.mxu0 %vm433_vm2, %v57_v27 }
  0xb7   :  { %8985 = vmatpush3.bf16.msra.mxu1 %v2208_v26  ;;  %9015 = vmatpush3.bf16.msra.mxu0 %v2391_v28  ;;  %v9857_v26 = vld [vmem:[%s12023_s1 + $0x328] sm:$0xff]  }
  0xb8   :  { %8986 = vmatprep.subr.bf16.mxu1 %v10005_v0  ;;  %9016 = vmatprep.subr.bf16.mxu0 %v10005_v0 }
  0xb9   :  { %8990 = vmatprep.mubr.msk.bf16.mxu1 %vm10006_vm1, %v10005_v0  ;;  %9020 = vmatprep.mubr.msk.bf16.mxu0 %vm10006_vm1, %v10005_v0 }
  0xbb   :  { %8987 = vmatpush3.bf16.msra.mxu1 %v9832_v29  ;;  %9017 = vmatpush3.bf16.msra.mxu0 %v9833_v30  ;;  %v9858_v29 = vld [vmem:[%s12023_s1 + $0x2e4] sm:$0xff]  }
  0xbc   :  { %8988 = vmatprep.subr.bf16.mxu1 %v10005_v0  ;;  %9018 = vmatprep.subr.bf16.mxu0 %v10005_v0 }
  0xbf   :  { %8989 = vmatpush3.bf16.msra.mxu1 %v9834_v31  ;;  %9019 = vmatpush3.bf16.msra.mxu0 %v9835_v32  ;;  %v9859_v32 = vld [vmem:[%s12023_s1 + $0x320] sm:$0xff]  }
  0xc0   :  { %9004 = vmatprep.subr.bf16.mxu1 %v10005_v0  ;;  %9034 = vmatprep.subr.bf16.mxu0 %v10005_v0 }
  0xc2   :  { %8991 = vmatmul.mubr.msk.bf16.vlgmr.msra.gmra.mxu1 %vm433_vm2, %v56_v35  ;;  %9021 = vmatmul.mubr.msk.bf16.vlgmr.msra.gmra.mxu0 %vm433_vm2, %v59_v37  ;;  %v2818_v37 = vsel %vm437_vm0, %v9860_v33, 0 }
  0xc3   :  { %9005 = vmatpush3.bf16.msra.mxu1 %v2330_v36  ;;  %9035 = vmatpush3.bf16.msra.mxu0 %v2513_v38  ;;  %v64_v36 = vld [vmem:[%s12024_s0 + $0x94] sm:$0xf]  ;;  %v67_v38 = vld [vmem:[%s12024_s0 + $0xa0] sm:$0xf] }
  0xc4   :  { %9006 = vmatprep.subr.bf16.mxu1 %v10005_v0  ;;  %9036 = vmatprep.subr.bf16.mxu0 %v10005_v0 }
  0xc5   :  { %9010 = vmatprep.mubr.msk.bf16.mxu1 %vm10006_vm1, %v10005_v0  ;;  %9040 = vmatprep.mubr.msk.bf16.mxu0 %vm10006_vm1, %v10005_v0 }
  0xc7   :  { %9007 = vmatpush3.bf16.msra.mxu1 %v9838_v39  ;;  %9037 = vmatpush3.bf16.msra.mxu0 %v9839_v40  ;;  %v3001_v39 = vsel %vm437_vm0, %v9861_v34, 0 }
  0xc8   :  { %9008 = vmatprep.subr.bf16.mxu1 %v10005_v0  ;;  %9038 = vmatprep.subr.bf16.mxu0 %v10005_v0 }
  0xcb   :  { %9009 = vmatpush3.bf16.msra.mxu1 %v9840_v41  ;;  %9039 = vmatpush3.bf16.msra.mxu0 %v9841_v42  ;;  %v9862_v41 = vld [vmem:[%s12023_s1 + $0x314] sm:$0xff]  }
  0xcc   :  { %9024 = vmatprep.subr.bf16.mxu1 %v10005_v0  ;;  %9054 = vmatprep.subr.bf16.mxu0 %v10005_v0 }
  0xce   :  { %v10701_v49 = vpop.f32.mrf.mxu1  ;;  %9011 = vmatmul.mubr.msk.bf16.vlgmr.msra.gmra.mxu1 %vm433_vm2, %v58_v45  ;;  %9041 = vmatmul.mubr.msk.bf16.vlgmr.msra.gmra.mxu0 %vm433_vm2, %v61_v47  ;;  %v10708_v51 = vpop.f32.mrf.mxu0  ;;  %v9864_v47 = vld [vmem:[%s12023_s1 + $0x30c] sm:$0xff]  }
  0xcf   :  { %9025 = vmatpush3.bf16.msra.mxu1 %v2452_v46  ;;  %9055 = vmatpush3.bf16.msra.mxu0 %v2635_v48  ;;  %v9865_v48 = vld [vmem:[%s12023_s1 + $0x348] sm:$0xff]  }
  0xd0   :  { %v8702_v52 = vpop.f32.mrf.mxu1  ;;  %9026 = vmatprep.subr.bf16.mxu1 %v10005_v0  ;;  %9056 = vmatprep.subr.bf16.mxu0 %v10005_v0  ;;  %v8722_v54 = vpop.f32.mrf.mxu0 }
  0xd1   :  { %9030 = vmatprep.mubr.msk.bf16.mxu1 %vm10006_vm1, %v10005_v0  ;;  %9060 = vmatprep.mubr.msk.bf16.mxu0 %vm10006_vm1, %v10005_v0  ;;  %v9867_v54 = vld [vmem:[%s12023_s1 + $0x380] ss:$0 sps:$4 sm:$0x33]  }
  0xd2   :  { %v478_v55 = vpop.f32.mrf.mxu1  ;;  %v600_v57 = vpop.f32.mrf.mxu0 }
  0xd3   :  { %9027 = vmatpush3.bf16.msra.mxu1 %v9844_v50  ;;  %9057 = vmatpush3.bf16.msra.mxu0 %v9845_v53  ;;  %v9866_v53 = vld [vmem:[%s12023_s1 + $0x344] ss:$0 sps:$4 sm:$0x33]   ;;  %v69_v57 = vld [vmem:[%s12024_s0 + $0xa8] sm:$0xf] }
  0xd4   :  { %v8703_v58 = vpop.f32.mrf.mxu1  ;;  %9028 = vmatprep.subr.bf16.mxu1 %v10005_v0  ;;  %9058 = vmatprep.subr.bf16.mxu0 %v10005_v0  ;;  %v8723_v62 = vpop.f32.mrf.mxu0 }
  0xd5   :  { %v2940_v58 = vsel %vm437_vm0, %v9866_v53, 0  ;;  %v9869_v62 = vld [vmem:[%s12023_s1 + $0x378] sm:$0xff]  }
  0xd7   :  { %9029 = vmatpush3.bf16.msra.mxu1 %v9846_v56  ;;  %9059 = vmatpush3.bf16.msra.mxu0 %v9847_v59  ;;  %v66_v56 = vld [vmem:[%s12024_s0 + $0x9c] sm:$0xf]  ;;  %v3123_v59 = vsel %vm437_vm0, %v9867_v54, 0  ;;  %v72_v54 = vld [vmem:[%s12024_s0 + $0xb4] sm:$0xf] }
  0xd8   :  { %9044 = vmatprep.subr.bf16.mxu1 %v10005_v0  ;;  %9074 = vmatprep.subr.bf16.mxu0 %v10005_v0 }
  0xda   :  { %v10743_v4 = vpop.f32.mrf.mxu1  ;;  %9031 = vmatmul.mubr.msk.bf16.vlgmr.msra.gmra.mxu1 %vm433_vm2, %v60_v63  ;;  %9061 = vmatmul.mubr.msk.bf16.vlgmr.msra.gmra.mxu0 %vm433_vm2, %v63_v2  ;;  %v10750_v6 = vpop.f32.mrf.mxu0 }
  0xdb   :  { %9045 = vmatpush3.bf16.msra.mxu1 %v2574_v1  ;;  %9075 = vmatpush3.bf16.msra.mxu0 %v2757_v3 }
  0xdc   :  { %v8712_v7 = vpop.f32.mrf.mxu1  ;;  %9046 = vmatprep.subr.bf16.mxu1 %v10005_v0  ;;  %9076 = vmatprep.subr.bf16.mxu0 %v10005_v0  ;;  %v8742_v9 = vpop.f32.mrf.mxu0 }
  0xdd   :  { %9050 = vmatprep.mubr.msk.bf16.mxu1 %vm10006_vm1, %v10005_v0  ;;  %9080 = vmatprep.mubr.msk.bf16.mxu0 %vm10006_vm1, %v10005_v0  ;;  %v9872_v7 = vld [vmem:[%s12023_s1 + $0x36c] ss:$0 sps:$4 sm:$0x33]   ;;  %v9871_v9 = vld [vmem:[%s12023_s1 + $0x370] sm:$0xff]  }
  0xde   :  { %v539_v10 = vpop.f32.mrf.mxu1  ;;  %v722_v12 = vpop.f32.mrf.mxu0  ;;  %v3062_v15 = vsel %vm437_vm0, %v9872_v7, 0 }
  0xdf   :  { %9047 = vmatpush3.bf16.msra.mxu1 %v9850_v5  ;;  %9077 = vmatpush3.bf16.msra.mxu0 %v9851_v8  ;;  %v9870_v5 = vld [vmem:[%s12023_s1 + $0x334] sm:$0xff]   ;;  %v9873_v8 = vld [vmem:[%s12023_s1 + $0x3a8] ss:$0 sps:$4 sm:$0x33]   ;;  %v68_v12 = vld [vmem:[%s12024_s0 + $0xa4] sm:$0xf] }
  0xe0   :  { %v8713_v13 = vpop.f32.mrf.mxu1  ;;  %9048 = vmatprep.subr.bf16.mxu1 %v10005_v0  ;;  %9078 = vmatprep.subr.bf16.mxu0 %v10005_v0  ;;  %v8743_v17 = vpop.f32.mrf.mxu0  ;;  %v3245_v16 = vsel %vm437_vm0, %v9873_v8, 0 }
  0xe1   :  { %v9874_v17 = vld [vmem:[%s12023_s1 + $0x364] sm:$0xff]  }
  0xe3   :  { %9049 = vmatpush3.bf16.msra.mxu1 %v9852_v11  ;;  %9079 = vmatpush3.bf16.msra.mxu0 %v9853_v14  ;;  %v71_v14 = vld [vmem:[%s12024_s0 + $0xb0] sm:$0xf] }
  0xe4   :  { %9064 = vmatprep.subr.bf16.mxu1 %v10005_v0  ;;  %9094 = vmatprep.subr.bf16.mxu0 %v10005_v0 }
  0xe6   :  { %v10785_v22 = vpop.f32.mrf.mxu1  ;;  %9051 = vmatmul.mubr.msk.bf16.vlgmr.msra.gmra.mxu1 %vm433_vm2, %v62_v18  ;;  %9081 = vmatmul.mubr.msk.bf16.vlgmr.msra.gmra.mxu0 %vm433_vm2, %v65_v20  ;;  %v10792_v24 = vpop.f32.mrf.mxu0 }
  0xe7   :  { %9065 = vmatpush3.bf16.msra.mxu1 %v2696_v19  ;;  %9095 = vmatpush3.bf16.msra.mxu0 %v2879_v21  ;;  %v9875_v19 = vld [vmem:[%s12023_s1 + $0x3a0] sm:$0xff]  }
  0xe8   :  { %v8732_v25 = vpop.f32.mrf.mxu1  ;;  %9066 = vmatprep.subr.bf16.mxu1 %v10005_v0  ;;  %9096 = vmatprep.subr.bf16.mxu0 %v10005_v0  ;;  %v8762_v27 = vpop.f32.mrf.mxu0 }
  0xe9   :  { %9070 = vmatprep.mubr.msk.bf16.mxu1 %vm10006_vm1, %v10005_v0  ;;  %9100 = vmatprep.mubr.msk.bf16.mxu0 %vm10006_vm1, %v10005_v0  ;;  %v9876_v25 = vld [vmem:[%s12023_s1 + $0x35c] sm:$0xff]  }
  0xea   :  { %v661_v28 = vpop.f32.mrf.mxu1  ;;  %v844_v30 = vpop.f32.mrf.mxu0 }
  0xeb   :  { %9067 = vmatpush3.bf16.msra.mxu1 %v9856_v23  ;;  %9097 = vmatpush3.bf16.msra.mxu0 %v9857_v26  ;;  %v9878_v23 = vld [vmem:[%s12023_s1 + $0x394] ss:$0 sps:$4 sm:$0x33]   ;;  %v9877_v28 = vld [vmem:[%s12023_s1 + $0x398] sm:$0xff]  }
  0xec   :  { %v8733_v31 = vpop.f32.mrf.mxu1  ;;  %9068 = vmatprep.subr.bf16.mxu1 %v10005_v0  ;;  %9098 = vmatprep.subr.bf16.mxu0 %v10005_v0  ;;  %v8763_v35 = vpop.f32.mrf.mxu0  ;;  %v3184_v34 = vsel %vm437_vm0, %v9878_v23, 0 }
  0xed   :  { %v73_v35 = vld [vmem:[%s12024_s0 + $0xb8] sm:$0xf] }
  0xef   :  { %9069 = vmatpush3.bf16.msra.mxu1 %v9858_v29  ;;  %9099 = vmatpush3.bf16.msra.mxu0 %v9859_v32  ;;  %v9879_v29 = vld [vmem:[%s12023_s1 + $0x3d0] ss:$0 sps:$4 sm:$0x33]   ;;  %v70_v32 = vld [vmem:[%s12024_s0 + $0xac] sm:$0xf] }
  0xf0   :  { %9084 = vmatprep.subr.bf16.mxu1 %v10005_v0  ;;  %9114 = vmatprep.subr.bf16.mxu0 %v10005_v0 }
  0xf2   :  { %v10827_v40 = vpop.f32.mrf.mxu1  ;;  %9071 = vmatmul.mubr.msk.bf16.vlgmr.msra.gmra.mxu1 %vm433_vm2, %v64_v36  ;;  %9101 = vmatmul.mubr.msk.bf16.vlgmr.msra.gmra.mxu0 %vm433_vm2, %v67_v38  ;;  %v10834_v42 = vpop.f32.mrf.mxu0  ;;  %v3367_v36 = vsel %vm437_vm0, %v9879_v29, 0  ;;  %v9894_v29 = vld [vmem:[%s12023_s1 + $0x3d4] sm:$0xff]  }
  0xf3   :  { %9085 = vmatpush3.bf16.msra.mxu1 %v2818_v37  ;;  %9115 = vmatpush3.bf16.msra.mxu0 %v3001_v39  ;;  %v9880_v37 = vld [vmem:[%s12023_s1 + $0x38c] sm:$0xff]  }
  0xf4   :  { %v8752_v43 = vpop.f32.mrf.mxu1  ;;  %9086 = vmatprep.subr.bf16.mxu1 %v10005_v0  ;;  %9116 = vmatprep.subr.bf16.mxu0 %v10005_v0  ;;  %v8782_v45 = vpop.f32.mrf.mxu0  ;;  %v9881_v39 = vld [vmem:[%s12023_s1 + $0x3c8] sm:$0xff]  }
  0xf5   :  { %9090 = vmatprep.mubr.msk.bf16.mxu1 %vm10006_vm1, %v10005_v0  ;;  %9120 = vmatprep.mubr.msk.bf16.mxu0 %vm10006_vm1, %v10005_v0 }
  0xf6   :  { %v783_v46 = vpop.f32.mrf.mxu1  ;;  %v966_v50 = vpop.f32.mrf.mxu0 }
  0xf7   :  { %9087 = vmatpush3.bf16.msra.mxu1 %v9862_v41  ;;  %9117 = vmatpush3.bf16.msra.mxu0 %v9863_v44  ;;  %v9882_v44 = vld [vmem:[%s12023_s1 + $0x384] sm:$0xff]   ;;  %v9885_v50 = vld [vmem:[%s12023_s1 + $0x3f8] ss:$0 sps:$4 sm:$0x33]  }
  0xf8   :  { %v8753_v52 = vpop.f32.mrf.mxu1  ;;  %9088 = vmatprep.subr.bf16.mxu1 %v10005_v0  ;;  %9118 = vmatprep.subr.bf16.mxu0 %v10005_v0  ;;  %v8783_v55 = vpop.f32.mrf.mxu0 }
  0xfb   :  { %9089 = vmatpush3.bf16.msra.mxu1 %v9864_v47  ;;  %9119 = vmatpush3.bf16.msra.mxu0 %v9865_v48  ;;  %v9883_v47 = vld [vmem:[%s12023_s1 + $0x3c0] sm:$0xff]   ;;  %v9884_v48 = vld [vmem:[%s12023_s1 + $0x3bc] ss:$0 sps:$4 sm:$0x33]  }
  0xfc   :  { %9104 = vmatprep.subr.bf16.mxu1 %v10005_v0  ;;  %9134 = vmatprep.subr.bf16.mxu0 %v10005_v0 }
  0xfe   :  { %v10872_v61 = vpop.f32.mrf.mxu1  ;;  %9091 = vmatmul.mubr.msk.bf16.vlgmr.msra.gmra.mxu1 %vm433_vm2, %v66_v56  ;;  %9121 = vmatmul.mubr.msk.bf16.vlgmr.msra.gmra.mxu0 %vm433_vm2, %v69_v57  ;;  %v10879_v63 = vpop.f32.mrf.mxu0  ;;  %v75_v56 = vld [vmem:[%s12024_s0 + $0xc0] sm:$0xf]  ;;  %v3306_v57 = vsel %vm437_vm0, %v9884_v48, 0 }
  0xff   :  { %9105 = vmatpush3.bf16.msra.mxu1 %v2940_v58  ;;  %9135 = vmatpush3.bf16.msra.mxu0 %v3123_v59  ;;  %v3489_v58 = vsel %vm437_vm0, %v9885_v50, 0  ;;  %v9886_v59 = vld [vmem:[%s12023_s1 + $0x3b4] sm:$0xff]   ;;  %v9899_v48 = vld [vmem:[%s12023_s1 + $0x440] sm:$0xff]  }
 0x100   :  { %v8772_v1 = vpop.f32.mrf.mxu1  ;;  %9106 = vmatprep.subr.bf16.mxu1 %v10005_v0  ;;  %9136 = vmatprep.subr.bf16.mxu0 %v10005_v0  ;;  %v8802_v2 = vpop.f32.mrf.mxu0 }
 0x101   :  { %9110 = vmatprep.mubr.msk.bf16.mxu1 %vm10006_vm1, %v10005_v0  ;;  %9140 = vmatprep.mubr.msk.bf16.mxu0 %vm10006_vm1, %v10005_v0 }
 0x102   :  { %v905_v3 = vpop.f32.mrf.mxu1  ;;  %v1088_v10 = vpop.f32.mrf.mxu0 }
 0x103   :  { %9107 = vmatpush3.bf16.msra.mxu1 %v9868_v60  ;;  %9137 = vmatpush3.bf16.msra.mxu0 %v9869_v62  ;;  %v9887_v62 = vld [vmem:[%s12023_s1 + $0x3f0] sm:$0xff]   ;;  %v9890_v3 = vld [vmem:[%s12023_s1 + $0x3e4] ss:$0 sps:$4 sm:$0x33]  }
 0x104   :  { %v8773_v11 = vpop.f32.mrf.mxu1  ;;  %9108 = vmatprep.subr.bf16.mxu1 %v10005_v0  ;;  %9138 = vmatprep.subr.bf16.mxu0 %v10005_v0  ;;  %v8803_v13 = vpop.f32.mrf.mxu0  ;;  %v9891_v10 = vld [vmem:[%s12023_s1 + $0x420] ss:$0 sps:$4 sm:$0x33]  }
 0x105   :  { %v74_v13 = vld [vmem:[%s12024_s0 + $0xbc] sm:$0xf] }
 0x107   :  { %9109 = vmatpush3.bf16.msra.mxu1 %v9870_v5  ;;  %9139 = vmatpush3.bf16.msra.mxu0 %v9871_v9  ;;  %v9888_v5 = vld [vmem:[%s12023_s1 + $0x3ac] sm:$0xff]  }
 0x108   :  { %9124 = vmatprep.subr.bf16.mxu1 %v10005_v0  ;;  %9154 = vmatprep.subr.bf16.mxu0 %v10005_v0  ;;  %v9889_v9 = vld [vmem:[%s12023_s1 + $0x3e8] sm:$0xff]  }
 0x10a   :  { %v10914_v18 = vpop.f32.mrf.mxu1  ;;  %9111 = vmatmul.mubr.msk.bf16.vlgmr.msra.gmra.mxu1 %vm433_vm2, %v68_v12  ;;  %9141 = vmatmul.mubr.msk.bf16.vlgmr.msra.gmra.mxu0 %vm433_vm2, %v71_v14  ;;  %v10921_v20 = vpop.f32.mrf.mxu0 }
 0x10b   :  { %9125 = vmatpush3.bf16.msra.mxu1 %v3062_v15  ;;  %9155 = vmatpush3.bf16.msra.mxu0 %v3245_v16  ;;  %v3428_v15 = vsel %vm437_vm0, %v9890_v3, 0  ;;  %v77_v16 = vld [vmem:[%s12024_s0 + $0xc8] sm:$0xf]  ;;  %v81_v3 = vld [vmem:[%s12024_s0 + $0xd8] sm:$0xf] }
 0x10c   :  { %v8792_v21 = vpop.f32.mrf.mxu1  ;;  %9126 = vmatprep.subr.bf16.mxu1 %v10005_v0  ;;  %9156 = vmatprep.subr.bf16.mxu0 %v10005_v0  ;;  %v8822_v26 = vpop.f32.mrf.mxu0 }
 0x10d   :  { %9130 = vmatprep.mubr.msk.bf16.mxu1 %vm10006_vm1, %v10005_v0  ;;  %9160 = vmatprep.mubr.msk.bf16.mxu0 %vm10006_vm1, %v10005_v0  ;;  %v9892_v21 = vld [vmem:[%s12023_s1 + $0x3dc] sm:$0xff]  }
 0x10e   :  { %v1027_v27 = vpop.f32.mrf.mxu1  ;;  %v1210_v30 = vpop.f32.mrf.mxu0  ;;  %v9893_v26 = vld [vmem:[%s12023_s1 + $0x418] sm:$0xff]  }
 0x10f   :  { %9127 = vmatpush3.bf16.msra.mxu1 %v9874_v17  ;;  %9157 = vmatpush3.bf16.msra.mxu0 %v9875_v19  ;;  %v3611_v17 = vsel %vm437_vm0, %v9891_v10, 0 }
 0x110   :  { %v8793_v31 = vpop.f32.mrf.mxu1  ;;  %9128 = vmatprep.subr.bf16.mxu1 %v10005_v0  ;;  %9158 = vmatprep.subr.bf16.mxu0 %v10005_v0  ;;  %v8823_v33 = vpop.f32.mrf.mxu0 }
 0x111   :  { %v9896_v33 = vld [vmem:[%s12023_s1 + $0x40c] ss:$0 sps:$4 sm:$0x33]  }
 0x113   :  { %9129 = vmatpush3.bf16.msra.mxu1 %v9876_v25  ;;  %9159 = vmatpush3.bf16.msra.mxu0 %v9877_v28 }
 0x114   :  { %9144 = vmatprep.subr.bf16.mxu1 %v10005_v0  ;;  %9174 = vmatprep.subr.bf16.mxu0 %v10005_v0 }
 0x116   :  { %v10956_v38 = vpop.f32.mrf.mxu1  ;;  %9131 = vmatmul.mubr.msk.bf16.vlgmr.msra.gmra.mxu1 %vm433_vm2, %v70_v32  ;;  %9161 = vmatmul.mubr.msk.bf16.vlgmr.msra.gmra.mxu0 %vm433_vm2, %v73_v35  ;;  %v10963_v41 = vpop.f32.mrf.mxu0  ;;  %v9895_v32 = vld [vmem:[%s12023_s1 + $0x410] sm:$0xff]  }
 0x117   :  { %9145 = vmatpush3.bf16.msra.mxu1 %v3184_v34  ;;  %9175 = vmatpush3.bf16.msra.mxu0 %v3367_v36  ;;  %v9897_v34 = vld [vmem:[%s12023_s1 + $0x448] ss:$0 sps:$4 sm:$0x33]   ;;  %v76_v36 = vld [vmem:[%s12024_s0 + $0xc4] sm:$0xf] }
 0x118   :  { %v8812_v43 = vpop.f32.mrf.mxu1  ;;  %9146 = vmatprep.subr.bf16.mxu1 %v10005_v0  ;;  %9176 = vmatprep.subr.bf16.mxu0 %v10005_v0  ;;  %v8842_v45 = vpop.f32.mrf.mxu0 }
 0x119   :  { %9150 = vmatprep.mubr.msk.bf16.mxu1 %vm10006_vm1, %v10005_v0  ;;  %9180 = vmatprep.mubr.msk.bf16.mxu0 %vm10006_vm1, %v10005_v0  ;;  %v3733_v43 = vsel %vm437_vm0, %v9897_v34, 0  ;;  %v9898_v45 = vld [vmem:[%s12023_s1 + $0x404] sm:$0xff]  }
 0x11a   :  { %v1149_v46 = vpop.f32.mrf.mxu1  ;;  %v1332_v52 = vpop.f32.mrf.mxu0 }
 0x11b   :  { %9147 = vmatpush3.bf16.msra.mxu1 %v9880_v37  ;;  %9177 = vmatpush3.bf16.msra.mxu0 %v9881_v39  ;;  %v3550_v37 = vsel %vm437_vm0, %v9896_v33, 0  ;;  %v79_v39 = vld [vmem:[%s12024_s0 + $0xd0] sm:$0xf] }
 0x11c   :  { %v8813_v53 = vpop.f32.mrf.mxu1  ;;  %9148 = vmatprep.subr.bf16.mxu1 %v10005_v0  ;;  %9178 = vmatprep.subr.bf16.mxu0 %v10005_v0  ;;  %v8843_v55 = vpop.f32.mrf.mxu0 }
 0x11d   :  { %v9900_v53 = vld [vmem:[%s12023_s1 + $0x3fc] sm:$0xff]  }
 0x11f   :  { %9149 = vmatpush3.bf16.msra.mxu1 %v9882_v44  ;;  %9179 = vmatpush3.bf16.msra.mxu0 %v9883_v47 }
 0x120   :  { %9164 = vmatprep.subr.bf16.mxu1 %v10005_v0  ;;  %9194 = vmatprep.subr.bf16.mxu0 %v10005_v0 }
 0x122   :  { %v10998_v60 = vpop.f32.mrf.mxu1  ;;  %9151 = vmatmul.mubr.msk.bf16.vlgmr.msra.gmra.mxu1 %vm433_vm2, %v72_v54  ;;  %9181 = vmatmul.mubr.msk.bf16.vlgmr.msra.gmra.mxu0 %vm433_vm2, %v75_v56  ;;  %v11005_v1 = vpop.f32.mrf.mxu0  ;;  %v9901_v56 = vld [vmem:[%s12023_s1 + $0x438] sm:$0xff]  }
 0x123   :  { %9165 = vmatpush3.bf16.msra.mxu1 %v3306_v57  ;;  %9195 = vmatpush3.bf16.msra.mxu0 %v3489_v58  ;;  %v9902_v57 = vld [vmem:[%s12023_s1 + $0x434] ss:$0 sps:$4 sm:$0x33]   ;;  %v9903_v58 = vld [vmem:[%s12023_s1 + $0x470] ss:$0 sps:$4 sm:$0x33]  }
 0x124   :  { %v8832_v2 = vpop.f32.mrf.mxu1  ;;  %9166 = vmatprep.subr.bf16.mxu1 %v10005_v0  ;;  %9196 = vmatprep.subr.bf16.mxu0 %v10005_v0  ;;  %v8862_v7 = vpop.f32.mrf.mxu0 }
 0x125   :  { %9170 = vmatprep.mubr.msk.bf16.mxu1 %vm10006_vm1, %v10005_v0  ;;  %9200 = vmatprep.mubr.msk.bf16.mxu0 %vm10006_vm1, %v10005_v0  ;;  %v3672_v2 = vsel %vm437_vm0, %v9902_v57, 0 }
 0x126   :  { %v1271_v8 = vpop.f32.mrf.mxu1  ;;  %v1454_v11 = vpop.f32.mrf.mxu0 }
 0x127   :  { %9167 = vmatpush3.bf16.msra.mxu1 %v9886_v59  ;;  %9197 = vmatpush3.bf16.msra.mxu0 %v9887_v62  ;;  %v78_v62 = vld [vmem:[%s12024_s0 + $0xcc] sm:$0xf] }
 0x128   :  { %v8833_v12 = vpop.f32.mrf.mxu1  ;;  %9168 = vmatprep.subr.bf16.mxu1 %v10005_v0  ;;  %9198 = vmatprep.subr.bf16.mxu0 %v10005_v0  ;;  %v8863_v14 = vpop.f32.mrf.mxu0  ;;  %v9904_v8 = vld [vmem:[%s12023_s1 + $0x42c] sm:$0xff]  }
 0x129   :  { %v9905_v11 = vld [vmem:[%s12023_s1 + $0x468] sm:$0xff]  }
 0x12a   :  { %v9906_v14 = vld [vmem:[%s12023_s1 + $0x424] sm:$0xff]  }
 0x12b   :  { %9169 = vmatpush3.bf16.msra.mxu1 %v9888_v5  ;;  %9199 = vmatpush3.bf16.msra.mxu0 %v9889_v9  ;;  %v3855_v5 = vsel %vm437_vm0, %v9903_v58, 0  ;;  %v9916_v58 = vld [vmem:[%s12023_s1 + $0x47c] sm:$0xff]  }
 0x12c   :  { %9184 = vmatprep.subr.bf16.mxu1 %v10005_v0  ;;  %9214 = vmatprep.subr.bf16.mxu0 %v10005_v0 }
 0x12e   :  { %v11037_v19 = vpop.f32.mrf.mxu1  ;;  %9171 = vmatmul.mubr.msk.bf16.vlgmr.msra.gmra.mxu1 %vm433_vm2, %v74_v13  ;;  %9201 = vmatmul.mubr.msk.bf16.vlgmr.msra.gmra.mxu0 %vm433_vm2, %v77_v16  ;;  %v11044_v23 = vpop.f32.mrf.mxu0 }
 0x12f   :  { %9185 = vmatpush3.bf16.msra.mxu1 %v3428_v15  ;;  %9215 = vmatpush3.bf16.msra.mxu0 %v3611_v17  ;;  %v9907_v17 = vld [vmem:[%s12023_s1 + $0x460] sm:$0xff]  }
 0x130   :  { %v8852_v25 = vpop.f32.mrf.mxu1  ;;  %9186 = vmatprep.subr.bf16.mxu1 %v10005_v0  ;;  %9216 = vmatprep.subr.bf16.mxu0 %v10005_v0  ;;  %v8882_v27 = vpop.f32.mrf.mxu0 }
 0x131   :  { %9190 = vmatprep.mubr.msk.bf16.mxu1 %vm10006_vm1, %v10005_v0  ;;  %9220 = vmatprep.mubr.msk.bf16.mxu0 %vm10006_vm1, %v10005_v0  ;;  %v9909_v25 = vld [vmem:[%s12023_s1 + $0x498] ss:$0 sps:$4 sm:$0x33]   ;;  %v80_v27 = vld [vmem:[%s12024_s0 + $0xd4] sm:$0xf] }
 0x132   :  { %v1393_v28 = vpop.f32.mrf.mxu1  ;;  %v1576_v30 = vpop.f32.mrf.mxu0 }
 0x133   :  { %9187 = vmatpush3.bf16.msra.mxu1 %v9892_v21  ;;  %9217 = vmatpush3.bf16.msra.mxu0 %v9893_v26  ;;  %v9908_v21 = vld [vmem:[%s12023_s1 + $0x45c] ss:$0 sps:$4 sm:$0x33]   ;;  %v3977_v30 = vsel %vm437_vm0, %v9909_v25, 0 }
 0x134   :  { %v8853_v31 = vpop.f32.mrf.mxu1  ;;  %9188 = vmatprep.subr.bf16.mxu1 %v10005_v0  ;;  %9218 = vmatprep.subr.bf16.mxu0 %v10005_v0  ;;  %v8883_v35 = vpop.f32.mrf.mxu0  ;;  %v3794_v28 = vsel %vm437_vm0, %v9908_v21, 0  ;;  %v87_v21 = vld [vmem:[%s12024_s0 + $0xf0] sm:$0xf] }
 0x135   :  { %v9911_v35 = vld [vmem:[%s12023_s1 + $0x490] sm:$0xff]  }
 0x137   :  { %9189 = vmatpush3.bf16.msra.mxu1 %v9894_v29  ;;  %9219 = vmatpush3.bf16.msra.mxu0 %v9895_v32  ;;  %v83_v29 = vld [vmem:[%s12024_s0 + $0xe0] sm:$0xf]  ;;  %v9910_v32 = vld [vmem:[%s12023_s1 + $0x454] sm:$0xff]  }
 0x138   :  { %9204 = vmatprep.subr.bf16.mxu1 %v10005_v0  ;;  %9234 = vmatprep.subr.bf16.mxu0 %v10005_v0 }
 0x13a   :  { %v11079_v44 = vpop.f32.mrf.mxu1  ;;  %9191 = vmatmul.mubr.msk.bf16.vlgmr.msra.gmra.mxu1 %vm433_vm2, %v76_v36  ;;  %9221 = vmatmul.mubr.msk.bf16.vlgmr.msra.gmra.mxu0 %vm433_vm2, %v79_v39  ;;  %v11086_v46 = vpop.f32.mrf.mxu0  ;;  %v9912_v39 = vld [vmem:[%s12023_s1 + $0x44c] sm:$0xff]  }
 0x13b   :  { %9205 = vmatpush3.bf16.msra.mxu1 %v3550_v37  ;;  %9235 = vmatpush3.bf16.msra.mxu0 %v3733_v43 }
 0x13c   :  { %v8872_v47 = vpop.f32.mrf.mxu1  ;;  %9206 = vmatprep.subr.bf16.mxu1 %v10005_v0  ;;  %9236 = vmatprep.subr.bf16.mxu0 %v10005_v0  ;;  %v8902_v50 = vpop.f32.mrf.mxu0 }
 0x13d   :  { %9210 = vmatprep.mubr.msk.bf16.mxu1 %vm10006_vm1, %v10005_v0  ;;  %9240 = vmatprep.mubr.msk.bf16.mxu0 %vm10006_vm1, %v10005_v0  ;;  %v9913_v47 = vld [vmem:[%s12023_s1 + $0x488] sm:$0xff]   ;;  %v9915_v50 = vld [vmem:[%s12023_s1 + $0x4c0] ss:$0 sps:$4 sm:$0x33]  }
 0x13e   :  { %v1515_v52 = vpop.f32.mrf.mxu1  ;;  %v1698_v54 = vpop.f32.mrf.mxu0 }
 0x13f   :  { %9207 = vmatpush3.bf16.msra.mxu1 %v9898_v45  ;;  %9237 = vmatpush3.bf16.msra.mxu0 %v9899_v48  ;;  %v9914_v48 = vld [vmem:[%s12023_s1 + $0x484] ss:$0 sps:$4 sm:$0x33]  }
 0x140   :  { %v8873_v55 = vpop.f32.mrf.mxu1  ;;  %9208 = vmatprep.subr.bf16.mxu1 %v10005_v0  ;;  %9238 = vmatprep.subr.bf16.mxu0 %v10005_v0  ;;  %v8903_v59 = vpop.f32.mrf.mxu0  ;;  %v3916_v54 = vsel %vm437_vm0, %v9914_v48, 0  ;;  %v86_v48 = vld [vmem:[%s12024_s0 + $0xec] sm:$0xf] }
 0x141   :  { %v85_v55 = vld [vmem:[%s12024_s0 + $0xe8] sm:$0xf] }
 0x143   :  { %9209 = vmatpush3.bf16.msra.mxu1 %v9900_v53  ;;  %9239 = vmatpush3.bf16.msra.mxu0 %v9901_v56  ;;  %v82_v53 = vld [vmem:[%s12024_s0 + $0xdc] sm:$0xf]  ;;  %v4099_v56 = vsel %vm437_vm0, %v9915_v50, 0  ;;  %v89_v50 = vld [vmem:[%s12024_s0 + $0xf8] sm:$0xf] }
 0x144   :  { %9224 = vmatprep.subr.bf16.mxu1 %v10005_v0  ;;  %9254 = vmatprep.subr.bf16.mxu0 %v10005_v0 }
 0x146   :  { %v11121_v7 = vpop.f32.mrf.mxu1  ;;  %9211 = vmatmul.mubr.msk.bf16.vlgmr.msra.gmra.mxu1 %vm433_vm2, %v78_v62  ;;  %9241 = vmatmul.mubr.msk.bf16.vlgmr.msra.gmra.mxu0 %vm433_vm2, %v81_v3  ;;  %v11128_v9 = vpop.f32.mrf.mxu0 }
 0x147   :  { %9225 = vmatpush3.bf16.msra.mxu1 %v3672_v2  ;;  %9255 = vmatpush3.bf16.msra.mxu0 %v3855_v5  ;;  %v9917_v2 = vld [vmem:[%s12023_s1 + $0x4b8] sm:$0xff]  }
 0x148   :  { %v8892_v10 = vpop.f32.mrf.mxu1  ;;  %9226 = vmatprep.subr.bf16.mxu1 %v10005_v0  ;;  %9256 = vmatprep.subr.bf16.mxu0 %v10005_v0  ;;  %v8922_v12 = vpop.f32.mrf.mxu0 }
 0x149   :  { %9230 = vmatprep.mubr.msk.bf16.mxu1 %vm10006_vm1, %v10005_v0  ;;  %9260 = vmatprep.mubr.msk.bf16.mxu0 %vm10006_vm1, %v10005_v0  ;;  %v9919_v12 = vld [vmem:[%s12023_s1 + $0x4b0] sm:$0xff]  }
 0x14a   :  { %v1637_v13 = vpop.f32.mrf.mxu1  ;;  %v1820_v15 = vpop.f32.mrf.mxu0 }
 0x14b   :  { %9227 = vmatpush3.bf16.msra.mxu1 %v9904_v8  ;;  %9257 = vmatpush3.bf16.msra.mxu0 %v9905_v11  ;;  %v9918_v8 = vld [vmem:[%s12023_s1 + $0x474] sm:$0xff]   ;;  %v9920_v13 = vld [vmem:[%s12023_s1 + $0x4ac] ss:$0 sps:$4 sm:$0x33]  }
 0x14c   :  { %v8893_v16 = vpop.f32.mrf.mxu1  ;;  %9228 = vmatprep.subr.bf16.mxu1 %v10005_v0  ;;  %9258 = vmatprep.subr.bf16.mxu0 %v10005_v0  ;;  %v8923_v26 = vpop.f32.mrf.mxu0 }
 0x14d   :  { %v84_v16 = vld [vmem:[%s12024_s0 + $0xe4] sm:$0xf] }
 0x14f   :  { %9229 = vmatpush3.bf16.msra.mxu1 %v9906_v14  ;;  %9259 = vmatpush3.bf16.msra.mxu0 %v9907_v17  ;;  %v9921_v14 = vld [vmem:[%s12023_s1 + $0x4e8] ss:$0 sps:$4 sm:$0x33]   ;;  %v4038_v17 = vsel %vm437_vm0, %v9920_v13, 0 }
 0x150   :  { %9244 = vmatprep.subr.bf16.mxu1 %v10005_v0  ;;  %9274 = vmatprep.subr.bf16.mxu0 %v10005_v0  ;;  %v4221_v25 = vsel %vm437_vm0, %v9921_v14, 0 }
 0x152   :  { %v11163_v31 = vpop.f32.mrf.mxu1  ;;  %9231 = vmatmul.mubr.msk.bf16.vlgmr.msra.gmra.mxu1 %vm433_vm2, %v80_v27  ;;  %9261 = vmatmul.mubr.msk.bf16.vlgmr.msra.gmra.mxu0 %vm433_vm2, %v83_v29  ;;  %v11170_v33 = vpop.f32.mrf.mxu0  ;;  %v9922_v27 = vld [vmem:[%s12023_s1 + $0x4a4] sm:$0xff]  }
 0x153   :  { %9245 = vmatpush3.bf16.msra.mxu1 %v3794_v28  ;;  %9275 = vmatpush3.bf16.msra.mxu0 %v3977_v30  ;;  %v9923_v30 = vld [vmem:[%s12023_s1 + $0x4e0] sm:$0xff]  }
 0x154   :  { %v8912_v34 = vpop.f32.mrf.mxu1  ;;  %9246 = vmatprep.subr.bf16.mxu1 %v10005_v0  ;;  %9276 = vmatprep.subr.bf16.mxu0 %v10005_v0  ;;  %v8942_v36 = vpop.f32.mrf.mxu0 }
 0x155   :  { %9250 = vmatprep.mubr.msk.bf16.mxu1 %vm10006_vm1, %v10005_v0  ;;  %9280 = vmatprep.mubr.msk.bf16.mxu0 %vm10006_vm1, %v10005_v0 }
 0x156   :  { %v1759_v37 = vpop.f32.mrf.mxu1  ;;  %v1942_v43 = vpop.f32.mrf.mxu0 }
 0x157   :  { %9247 = vmatpush3.bf16.msra.mxu1 %v9910_v32  ;;  %9277 = vmatpush3.bf16.msra.mxu0 %v9911_v35  ;;  %v9924_v35 = vld [vmem:[%s12023_s1 + $0x49c] sm:$0xff]   ;;  %v9926_v43 = vld [vmem:[%s12023_s1 + $0x4d4] ss:$0 sps:$4 sm:$0x33]  }
 0x158   :  { %v8913_v45 = vpop.f32.mrf.mxu1  ;;  %9248 = vmatprep.subr.bf16.mxu1 %v10005_v0  ;;  %9278 = vmatprep.subr.bf16.mxu0 %v10005_v0  ;;  %v8943_v52 = vpop.f32.mrf.mxu0 }
 0x159   :  { %v4160_v52 = vsel %vm437_vm0, %v9926_v43, 0 }
 0x15b   :  { %9249 = vmatpush3.bf16.msra.mxu1 %v9912_v39  ;;  %9279 = vmatpush3.bf16.msra.mxu0 %v9913_v47  ;;  %v9925_v39 = vld [vmem:[%s12023_s1 + $0x4d8] sm:$0xff]   ;;  %v11279_v47 = vld [vmem:[%s12026_s2] ss:$0 sm:$0xff] }
 0x15c   :  { %9264 = vmatprep.subr.bf16.mxu1 %v10005_v0  ;;  %9294 = vmatprep.subr.bf16.mxu0 %v10005_v0  ;;  %v598_v14 = vadd.f32 %v11279_v47, %v10708_v51 }
 0x15e   :  { %v11205_v57 = vpop.f32.mrf.mxu1  ;;  %9251 = vmatmul.mubr.msk.bf16.vlgmr.msra.gmra.mxu1 %vm433_vm2, %v82_v53  ;;  %9281 = vmatmul.mubr.msk.bf16.vlgmr.msra.gmra.mxu0 %vm433_vm2, %v85_v55  ;;  %v11212_v59 = vpop.f32.mrf.mxu0  ;;  %v9928_v53 = vld [vmem:[%s12025_s3] sm:$0xff]  }
 0x15f   :  { %9265 = vmatpush3.bf16.msra.mxu1 %v3916_v54  ;;  %9295 = vmatpush3.bf16.msra.mxu0 %v4099_v56  ;;  %v476_v54 = vadd.f32 %v11279_v47, %v10701_v49  ;;  %v9927_v56 = vld [vmem:[%s12023_s1 + $0x4cc] sm:$0xff]  }
 0x160   :  { %v8932_v62 = vpop.f32.mrf.mxu1  ;;  %9266 = vmatprep.subr.bf16.mxu1 %v10005_v0  ;;  %9296 = vmatprep.subr.bf16.mxu0 %v10005_v0  ;;  %v8962_v3 = vpop.f32.mrf.mxu0 }
 0x161   :  { %9270 = vmatprep.mubr.msk.bf16.mxu1 %vm10006_vm1, %v10005_v0  ;;  %9300 = vmatprep.mubr.msk.bf16.mxu0 %vm10006_vm1, %v10005_v0  ;;  %v4324_v49 = vmax.f32 %v476_v54, 0.0 }
 0x162   :  { %v1881_v5 = vpop.f32.mrf.mxu1  ;;  %v2064_v10 = vpop.f32.mrf.mxu0 }
 0x163   :  { %9267 = vmatpush3.bf16.msra.mxu1 %v9916_v58  ;;  %9297 = vmatpush3.bf16.msra.mxu0 %v9917_v2  ;;  %v9929_v5 = vld [vmem:[%s12023_s1 + $0x4c4] sm:$0xff]   ;;  %v4388_v13 = vpack.c.bf16 %v4324_v49, %v4324_v49 }
 0x164   :  { %v8933_v11 = vpop.f32.mrf.mxu1  ;;  %9268 = vmatprep.subr.bf16.mxu1 %v10005_v0  ;;  %9298 = vmatprep.subr.bf16.mxu0 %v10005_v0  ;;  %v8963_v15 = vpop.f32.mrf.mxu0 }
 0x165   :  { %v9930_v11 = vld [vmem:[%s12023_s1 + $0x4fc] ss:$0 sps:$4 sm:$0x33]  }
 0x167   :  { %9269 = vmatpush3.bf16.msra.mxu1 %v9918_v8  ;;  %9299 = vmatpush3.bf16.msra.mxu0 %v9919_v12  ;;  %v9931_v12 = vld [vmem:[%s12025_s3 + $0x10] sm:$0xff]  }
 0x168   :  { %9284 = vmatprep.subr.bf16.mxu1 %v10005_v0  ;;  %9314 = vmatprep.subr.bf16.mxu0 %v10005_v0 }
 0x16a   :  { %v11247_v26 = vpop.f32.mrf.mxu1  ;;  %9271 = vmatmul.mubr.msk.bf16.vlgmr.msra.gmra.mxu1 %vm433_vm2, %v84_v16  ;;  %9301 = vmatmul.mubr.msk.bf16.vlgmr.msra.gmra.mxu0 %vm433_vm2, %v87_v21  ;;  %v11254_v28 = vpop.f32.mrf.mxu0  ;;  %v88_v16 = vld [vmem:[%s12024_s0 + $0xf4] sm:$0xf]  ;;  %v4326_v21 = vmax.f32 %v598_v14, 0.0  ;;  %v9938_v14 = vld [vmem:[%s12025_s3 + $0x40] sm:$0xff]  }
 0x16b   :  { %9285 = vmatpush3.bf16.msra.mxu1 %v4038_v17  ;;  %9315 = vmatpush3.bf16.msra.mxu0 %v4221_v25  ;;  %v4282_v17 = vsel %vm437_vm0, %v9930_v11, 0  ;;  %v9932_v25 = vld [vmem:[%s12023_s1 + $0x4f4] sm:$0xff]  }
 0x16c   :  { %v8952_v29 = vpop.f32.mrf.mxu1  ;;  %9286 = vmatprep.subr.bf16.mxu1 %v10005_v0  ;;  %9316 = vmatprep.subr.bf16.mxu0 %v10005_v0  ;;  %v8982_v32 = vpop.f32.mrf.mxu0 }
 0x16d   :  { %9290 = vmatprep.mubr.msk.bf16.mxu1 %vm10006_vm1, %v10005_v0  ;;  %9320 = vmatprep.mubr.msk.bf16.mxu0 %vm10006_vm1, %v10005_v0  ;;  %v4390_v32 = vpack.c.bf16 %v4326_v21, %v4326_v21 }
 0x16e   :  { %v2003_v34 = vpop.f32.mrf.mxu1  ;;  %v2186_v36 = vpop.f32.mrf.mxu0 }
 0x16f   :  { %9287 = vmatpush3.bf16.msra.mxu1 %v9922_v27  ;;  %9317 = vmatpush3.bf16.msra.mxu0 %v9923_v30  ;;  %v9934_v30 = vld [vmem:[%s12025_s3 + $0x20] sm:$0xff]   ;;  %v720_v34 = vadd.f32 %v11279_v47, %v10750_v6 }
 0x170   :  { %v8953_v37 = vpop.f32.mrf.mxu1  ;;  %9288 = vmatprep.subr.bf16.mxu1 %v10005_v0  ;;  %9318 = vmatprep.subr.bf16.mxu0 %v10005_v0  ;;  %v8983_v45 = vpop.f32.mrf.mxu0 }
 0x171   :  { %v9933_v37 = vld [vmem:[%s12023_s1 + $0x4ec] sm:$0xff]   ;;  %v4328_v45 = vmax.f32 %v720_v34, 0.0 }
 0x173   :  { %9289 = vmatpush3.bf16.msra.mxu1 %v9924_v35  ;;  %9319 = vmatpush3.bf16.msra.mxu0 %v9925_v39  ;;  %v4392_v54 = vpack.c.bf16 %v4328_v45, %v4328_v45 }
 0x174   :  { %9304 = vmatprep.subr.bf16.mxu1 %v10005_v0  ;;  %9334 = vmatprep.subr.bf16.mxu0 %v10005_v0 }
 0x176   :  { %v11295_v55 = vpop.f32.mrf.mxu1  ;;  %9291 = vmatmul.mubr.msk.bf16.vlgmr.msra.gmra.mxu1 %vm433_vm2, %v86_v48  ;;  %9321 = vmatmul.mubr.msk.bf16.vlgmr.msra.gmra.mxu0 %vm433_vm2, %v89_v50  ;;  %v11302_v58 = vpop.f32.mrf.mxu0  ;;  %v90_v48 = vld [vmem:[%s12024_s0 + $0xfc] sm:$0xf]  ;;  %v9935_v50 = vld [vmem:[%s12025_s3 + $0x8] sm:$0xff]  }
 0x177   :  { %9305 = vmatpush3.bf16.msra.mxu1 %v4160_v52  ;;  %9335 = vmatpush3.bf16.msra.mxu0 %v9928_v53  ;;  %v537_v52 = vadd.f32 %v11279_v47, %v10743_v4  ;;  %v9936_v53 = vld [vmem:[%s12025_s3 + $0x30] sm:$0xff]  }
 0x178   :  { %v8972_v62 = vpop.f32.mrf.mxu1  ;;  %9306 = vmatprep.subr.bf16.mxu1 %v10005_v0  ;;  %9336 = vmatprep.mubr.msk.bf16.mxu0 %vm10006_vm1, %v10005_v0  ;;  %v9002_v2 = vpop.f32.mrf.mxu0 }
 0x179   :  { %9310 = vmatprep.mubr.msk.bf16.mxu1 %vm10006_vm1, %v10005_v0  ;;  %9346 = vmatprep.subr.bf16.mxu0 %v10005_v0  ;;  %v4325_v4 = vmax.f32 %v537_v52, 0.0 }
 0x17a   :  { %v2125_v3 = vpop.f32.mrf.mxu1  ;;  %v2308_v8 = vpop.f32.mrf.mxu0 }
 0x17b   :  { %9307 = vmatpush3.bf16.msra.mxu1 %v9927_v56  ;;  %v842_v56 = vadd.f32 %v11279_v47, %v10792_v24  ;;  %v9937_v8 = vld [vmem:[%s12025_s3 + $0x18] sm:$0xff]   ;;  %v4389_v11 = vpack.c.bf16 %v4325_v4, %v4325_v4  ;;  %v1208_v4 = vadd.f32 %v11279_v47, %v10921_v20 }
 0x17c   :  { %v8973_v10 = vpop.f32.mrf.mxu1  ;;  %9308 = vmatprep.subr.bf16.mxu1 %v10005_v0  ;;  %v9003_v15 = vpop.f32.mrf.mxu0 }
 0x17d   :  { %v4330_v3 = vmax.f32 %v842_v56, 0.0 }
 0x17e   :  { %9337 = vmatmul.mubr.msk.bf16.vlgmr.msra.gmra.mxu0 %vm4586_vm3, %v4388_v13 }
 0x17f   :  { %9309 = vmatpush3.bf16.msra.mxu1 %v9929_v5  ;;  %9347 = vmatpush3.bf16.msra.mxu0 %v9931_v12  ;;  %v659_v12 = vadd.f32 %v11279_v47, %v10785_v22  ;;  %v4394_v15 = vpack.c.bf16 %v4330_v3, %v4330_v3 }
 0x180   :  { %9324 = vmatprep.subr.bf16.mxu1 %v10005_v0  ;;  %9348 = vmatprep.mubr.msk.bf16.mxu0 %vm10006_vm1, %v10005_v0 }
 0x181   :  { %9358 = vmatprep.subr.bf16.mxu0 %v10005_v0  ;;  %v4327_v21 = vmax.f32 %v659_v12, 0.0 }
 0x182   :  { %v11331_v51 = vpop.f32.mrf.mxu1  ;;  %9311 = vmatmul.mubr.msk.bf16.vlgmr.msra.gmra.mxu1 %vm433_vm2, %v88_v16  ;;  %v11339_v27 = vpop.f32.mrf.mxu0  ;;  %v964_v16 = vadd.f32 %v11279_v47, %v10834_v42  ;;  %v9939_v42 = vld [vmem:[%s12025_s3 + $0x28] sm:$0xff]  }
 0x183   :  { %9325 = vmatpush3.bf16.msra.mxu1 %v4282_v17  ;;  %9330 = vmatprep.mubr.msk.bf16.mxu1 %vm10006_vm1, %v10005_v0 }
 0x184   :  { %v8992_v29 = vpop.f32.mrf.mxu1  ;;  %9326 = vmatprep.subr.bf16.mxu1 %v10005_v0  ;;  %v9022_v35 = vpop.f32.mrf.mxu0  ;;  %v4332_v22 = vmax.f32 %v964_v16, 0.0 }
 0x185   :  { %v9940_v35 = vld [vmem:[%s12025_s3 + $0x50] sm:$0xff]  }
 0x186   :  { %v2247_v36 = vpop.f32.mrf.mxu1  ;;  %9349 = vmatmul.mubr.msk.bf16.vlgmr.msra.gmra.mxu0 %vm4586_vm3, %v4390_v32  ;;  %v2430_v39 = vpop.f32.mrf.mxu0  ;;  %v781_v32 = vadd.f32 %v11279_v47, %v10827_v40 }
 0x187   :  { %9327 = vmatpush3.bf16.msra.mxu1 %v9932_v25  ;;  %9359 = vmatpush3.bf16.msra.mxu0 %v9934_v30  ;;  %v4391_v30 = vpack.c.bf16 %v4327_v21, %v4327_v21  ;;  %v4396_v36 = vpack.c.bf16 %v4332_v22, %v4332_v22 }
 0x188   :  { %v8993_v43 = vpop.f32.mrf.mxu1  ;;  %9328 = vmatprep.subr.bf16.mxu1 %v10005_v0  ;;  %9360 = vmatprep.mubr.msk.bf16.mxu0 %vm10006_vm1, %v10005_v0  ;;  %v9023_v6 = vpop.f32.mrf.mxu0 }
 0x189   :  { %9370 = vmatprep.subr.bf16.mxu0 %v10005_v0  ;;  %v4329_v6 = vmax.f32 %v781_v32, 0.0 }
 0x18b   :  { %9329 = vmatpush3.bf16.msra.mxu1 %v9933_v37  ;;  %v1086_v37 = vadd.f32 %v11279_v47, %v10879_v63  ;;  %v4393_v52 = vpack.c.bf16 %v4329_v6, %v4329_v6 }
 0x18c   :  { %9340 = vmatprep.subr.bf16.mxu1 %v10005_v0 }
 0x18d   :  { %v4334_v40 = vmax.f32 %v1086_v37, 0.0 }
 0x18e   :  { %v11369_v62 = vpop.f32.mrf.mxu1  ;;  %9331 = vmatmul.mubr.msk.bf16.vlgmr.msra.gmra.mxu1 %vm433_vm2, %v90_v48  ;;  %9361 = vmatmul.mubr.msk.bf16.vlgmr.msra.gmra.mxu0 %vm4586_vm3, %v4392_v54  ;;  %v11373_v49 = vpop.f32.mrf.mxu0  ;;  %v9942_v54 = vld [vmem:[%s12025_s3 + $0x60] sm:$0xff]  }
 0x18f   :  { %9341 = vmatpush3.bf16.msra.mxu1 %v9935_v50  ;;  %9371 = vmatpush3.bf16.msra.mxu0 %v9936_v53  ;;  %v9941_v50 = vld [vmem:[%s12025_s3 + $0x38] sm:$0xff]   ;;  %v903_v53 = vadd.f32 %v11279_v47, %v10872_v61  ;;  %v4398_v56 = vpack.c.bf16 %v4334_v40, %v4334_v40  ;;  %v4336_v61 = vmax.f32 %v1208_v4, 0.0 }
 0x190   :  { %v9012_v2 = vpop.f32.mrf.mxu1  ;;  %9342 = vmatprep.mubr.msk.bf16.mxu1 %vm10006_vm1, %v10005_v0  ;;  %9372 = vmatprep.mubr.msk.bf16.mxu0 %vm10006_vm1, %v10005_v0  ;;  %v9042_v24 = vpop.f32.mrf.mxu0 }
 0x191   :  { %9352 = vmatprep.subr.bf16.mxu1 %v10005_v0  ;;  %9382 = vmatprep.subr.bf16.mxu0 %v10005_v0  ;;  %v4331_v24 = vmax.f32 %v903_v53, 0.0  ;;  %v4400_v16 = vpack.c.bf16 %v4336_v61, %v4336_v61  ;;  %v9948_v53 = vld [vmem:[%s12025_s3 + $0x90] sm:$0xff]  }
 0x192   :  { %v2369_v5 = vpop.f32.mrf.mxu1  ;;  %v2552_v10 = vpop.f32.mrf.mxu0 }
 0x193   :  { %v9943_v10 = vld [vmem:[%s12025_s3 + $0x48] sm:$0xff]   ;;  %v4395_v12 = vpack.c.bf16 %v4331_v24, %v4331_v24 }
 0x194   :  { %v9013_v13 = vpop.f32.mrf.mxu1  ;;  %v9043_v17 = vpop.f32.mrf.mxu0 }
 0x195   :  { %v1025_v13 = vadd.f32 %v11279_v47, %v10914_v18  ;;  %v1330_v17 = vadd.f32 %v11279_v47, %v10963_v41  ;;  %v9945_v41 = vld [vmem:[%s12025_s3 + $0x58] sm:$0xff]  }
 0x196   :  { %9343 = vmatmul.mubr.msk.bf16.vlgmr.msra.gmra.mxu1 %vm4586_vm3, %v4389_v11  ;;  %9373 = vmatmul.mubr.msk.bf16.vlgmr.msra.gmra.mxu0 %vm4586_vm3, %v4394_v15  ;;  %v9944_v15 = vld [vmem:[%s12025_s3 + $0x70] sm:$0xff]  }
 0x197   :  { %9353 = vmatpush3.bf16.msra.mxu1 %v9937_v8  ;;  %9383 = vmatpush3.bf16.msra.mxu0 %v9938_v14  ;;  %v4333_v22 = vmax.f32 %v1025_v13, 0.0  ;;  %v4338_v18 = vmax.f32 %v1330_v17, 0.0 }
 0x198   :  { %9354 = vmatprep.mubr.msk.bf16.mxu1 %vm10006_vm1, %v10005_v0  ;;  %9384 = vmatprep.mubr.msk.bf16.mxu0 %vm10006_vm1, %v10005_v0 }
 0x199   :  { %9364 = vmatprep.subr.bf16.mxu1 %v10005_v0  ;;  %9394 = vmatprep.subr.bf16.mxu0 %v10005_v0  ;;  %v4397_v32 = vpack.c.bf16 %v4333_v22, %v4333_v22  ;;  %v4402_v37 = vpack.c.bf16 %v4338_v18, %v4338_v18 }
 0x19a   :  { %v11398_v25 = vpop.f32.mrf.mxu1  ;;  %v11404_v29 = vpop.f32.mrf.mxu0 }
 0x19c   :  { %v9032_v34 = vpop.f32.mrf.mxu1  ;;  %v9062_v39 = vpop.f32.mrf.mxu0 }
 0x19d   :  { %v1147_v34 = vadd.f32 %v11279_v47, %v10956_v38  ;;  %v1452_v39 = vadd.f32 %v11279_v47, %v11005_v1 }
 0x19e   :  { %v2491_v43 = vpop.f32.mrf.mxu1  ;;  %9355 = vmatmul.mubr.msk.bf16.vlgmr.msra.gmra.mxu1 %vm4586_vm3, %v4391_v30  ;;  %9385 = vmatmul.mubr.msk.bf16.vlgmr.msra.gmra.mxu0 %vm4586_vm3, %v4396_v36  ;;  %v2674_v45 = vpop.f32.mrf.mxu0  ;;  %v9946_v36 = vld [vmem:[%s12025_s3 + $0x80] sm:$0xff]  }
 0x19f   :  { %9365 = vmatpush3.bf16.msra.mxu1 %v9939_v42  ;;  %9395 = vmatpush3.bf16.msra.mxu0 %v9940_v35  ;;  %v4340_v38 = vmax.f32 %v1452_v39, 0.0 }
 0x1a0   :  { %v9033_v48 = vpop.f32.mrf.mxu1  ;;  %9366 = vmatprep.mubr.msk.bf16.mxu1 %vm10006_vm1, %v10005_v0  ;;  %9396 = vmatprep.mubr.msk.bf16.mxu0 %vm10006_vm1, %v10005_v0  ;;  %v9063_v63 = vpop.f32.mrf.mxu0 }
 0x1a1   :  { %9376 = vmatprep.subr.bf16.mxu1 %v10005_v0  ;;  %9406 = vmatprep.subr.bf16.mxu0 %v10005_v0  ;;  %v4335_v48 = vmax.f32 %v1147_v34, 0.0  ;;  %v9947_v63 = vld [vmem:[%s12025_s3 + $0x68] sm:$0xff]  }
 0x1a6   :  { %v11431_v2 = vpop.f32.mrf.mxu1  ;;  %9367 = vmatmul.mubr.msk.bf16.vlgmr.msra.gmra.mxu1 %vm4586_vm3, %v4393_v52  ;;  %9397 = vmatmul.mubr.msk.bf16.vlgmr.msra.gmra.mxu0 %vm4586_vm3, %v4398_v56  ;;  %v11435_v3 = vpop.f32.mrf.mxu0  ;;  %v1269_v52 = vadd.f32 %v11279_v47, %v10998_v60  ;;  %v1574_v56 = vadd.f32 %v11279_v47, %v11044_v23 }
 0x1a7   :  { %9377 = vmatpush3.bf16.msra.mxu1 %v9941_v50  ;;  %9407 = vmatpush3.bf16.msra.mxu0 %v9942_v54  ;;  %v4399_v50 = vpack.c.bf16 %v4335_v48, %v4335_v48  ;;  %v4404_v54 = vpack.c.bf16 %v4340_v38, %v4340_v38 }
 0x1a8   :  { %v9052_v5 = vpop.f32.mrf.mxu1  ;;  %9378 = vmatprep.mubr.msk.bf16.mxu1 %vm10006_vm1, %v10005_v0  ;;  %9408 = vmatprep.mubr.msk.bf16.mxu0 %vm10006_vm1, %v10005_v0  ;;  %v9082_v20 = vpop.f32.mrf.mxu0  ;;  %v4342_v60 = vmax.f32 %v1574_v56, 0.0 }
 0x1a9   :  { %9388 = vmatprep.subr.bf16.mxu1 %v10005_v0  ;;  %9418 = vmatprep.subr.bf16.mxu0 %v10005_v0  ;;  %v4337_v5 = vmax.f32 %v1269_v52, 0.0  ;;  %v1940_v52 = vadd.f32 %v11279_v47, %v11170_v33 }
 0x1aa   :  { %v2613_v8 = vpop.f32.mrf.mxu1  ;;  %v2796_v11 = vpop.f32.mrf.mxu0 }
 0x1ab   :  { %v9949_v8 = vld [vmem:[%s12025_s3 + $0x78] sm:$0xff]   ;;  %v4401_v11 = vpack.c.bf16 %v4337_v5, %v4337_v5 }
 0x1ac   :  { %v9053_v14 = vpop.f32.mrf.mxu1  ;;  %v9083_v21 = vpop.f32.mrf.mxu0 }
 0x1ad   :  { %v9950_v14 = vld [vmem:[%s12025_s3 + $0xa0] sm:$0xff]  }
 0x1ae   :  { %9379 = vmatmul.mubr.msk.bf16.vlgmr.msra.gmra.mxu1 %vm4586_vm3, %v4395_v12  ;;  %9409 = vmatmul.mubr.msk.bf16.vlgmr.msra.gmra.mxu0 %vm4586_vm3, %v4400_v16  ;;  %v1391_v12 = vadd.f32 %v11279_v47, %v11037_v19  ;;  %v1696_v16 = vadd.f32 %v11279_v47, %v11086_v46  ;;  %v9951_v46 = vld [vmem:[%s12025_s3 + $0x88] sm:$0xff]  }
 0x1af   :  { %9389 = vmatpush3.bf16.msra.mxu1 %v9943_v10  ;;  %9419 = vmatpush3.bf16.msra.mxu0 %v9944_v15  ;;  %v4406_v15 = vpack.c.bf16 %v4342_v60, %v4342_v60  ;;  %v9955_v60 = vld [vmem:[%s12025_s3 + $0xa8] sm:$0xff]  }
 0x1b0   :  { %9390 = vmatprep.mubr.msk.bf16.mxu1 %vm10006_vm1, %v10005_v0  ;;  %9420 = vmatprep.mubr.msk.bf16.mxu0 %vm10006_vm1, %v10005_v0  ;;  %v4339_v21 = vmax.f32 %v1391_v12, 0.0  ;;  %v4344_v19 = vmax.f32 %v1696_v16, 0.0 }
 0x1b1   :  { %9400 = vmatprep.subr.bf16.mxu1 %v10005_v0  ;;  %9430 = vmatprep.subr.bf16.mxu0 %v10005_v0 }
 0x1b2   :  { %v11460_v42 = vpop.f32.mrf.mxu1  ;;  %v11466_v30 = vpop.f32.mrf.mxu0 }
 0x1b4   :  { %v9072_v35 = vpop.f32.mrf.mxu1  ;;  %v9102_v43 = vpop.f32.mrf.mxu0 }
 0x1b5   :  { %v9952_v35 = vld [vmem:[%s12025_s3 + $0xb0] sm:$0xff]  }
 0x1b6   :  { %v2735_v45 = vpop.f32.mrf.mxu1  ;;  %9391 = vmatmul.mubr.msk.bf16.vlgmr.msra.gmra.mxu1 %vm4586_vm3, %v4397_v32  ;;  %9421 = vmatmul.mubr.msk.bf16.vlgmr.msra.gmra.mxu0 %vm4586_vm3, %v4402_v37  ;;  %v2918_v6 = vpop.f32.mrf.mxu0  ;;  %v1513_v32 = vadd.f32 %v11279_v47, %v11079_v44  ;;  %v1818_v37 = vadd.f32 %v11279_v47, %v11128_v9 }
 0x1b7   :  { %9401 = vmatpush3.bf16.msra.mxu1 %v9945_v41  ;;  %9431 = vmatpush3.bf16.msra.mxu0 %v9946_v36  ;;  %v4403_v41 = vpack.c.bf16 %v4339_v21, %v4339_v21  ;;  %v4408_v36 = vpack.c.bf16 %v4344_v19, %v4344_v19  ;;  %v1879_v19 = vadd.f32 %v11279_v47, %v11205_v57 }
 0x1b8   :  { %v9073_v40 = vpop.f32.mrf.mxu1  ;;  %9402 = vmatprep.mubr.msk.bf16.mxu1 %vm10006_vm1, %v10005_v0  ;;  %9432 = vmatprep.mubr.msk.bf16.mxu0 %vm10006_vm1, %v10005_v0  ;;  %v9103_v1 = vpop.f32.mrf.mxu0  ;;  %v4341_v6 = vmax.f32 %v1513_v32, 0.0  ;;  %v4346_v44 = vmax.f32 %v1818_v37, 0.0 }
 0x1b9   :  { %9412 = vmatprep.subr.bf16.mxu1 %v10005_v0  ;;  %9442 = vmatprep.subr.bf16.mxu0 %v10005_v0  ;;  %v9953_v40 = vld [vmem:[%s12025_s3 + $0x98] sm:$0xff]   ;;  %v1635_v1 = vadd.f32 %v11279_v47, %v11121_v7  ;;  %v4348_v7 = vmax.f32 %v1940_v52, 0.0 }
 0x1ba   :  { %v4405_v38 = vpack.c.bf16 %v4341_v6, %v4341_v6 }
 0x1bb   :  { %v4343_v56 = vmax.f32 %v1635_v1, 0.0  ;;  %v4412_v12 = vpack.c.bf16 %v4348_v7, %v4348_v7 }
 0x1be   :  { %v11493_v4 = vpop.f32.mrf.mxu1  ;;  %9403 = vmatmul.mubr.msk.bf16.vlgmr.msra.gmra.mxu1 %vm4586_vm3, %v4399_v50  ;;  %9433 = vmatmul.mubr.msk.bf16.vlgmr.msra.gmra.mxu0 %vm4586_vm3, %v4404_v54  ;;  %v11497_v24 = vpop.f32.mrf.mxu0  ;;  %v4410_v50 = vpack.c.bf16 %v4346_v44, %v4346_v44  ;;  %v9960_v44 = vld [vmem:[%s12025_s3 + $0xf0] sm:$0xff]  }
 0x1bf   :  { %9413 = vmatpush3.bf16.msra.mxu1 %v9947_v63  ;;  %9443 = vmatpush3.bf16.msra.mxu0 %v9948_v53  ;;  %v9954_v63 = vld [vmem:[%s12025_s3 + $0xc0] sm:$0xff]  }
 0x1c0   :  { %v9092_v61 = vpop.f32.mrf.mxu1  ;;  %9414 = vmatprep.mubr.msk.bf16.mxu1 %vm10006_vm1, %v10005_v0  ;;  %9444 = vmatprep.mubr.msk.bf16.mxu0 %vm10006_vm1, %v10005_v0  ;;  %v9122_v23 = vpop.f32.mrf.mxu0 }
 0x1c1   :  { %9424 = vmatprep.subr.bf16.mxu1 %v10005_v0  ;;  %9454 = vmatprep.subr.bf16.mxu0 %v10005_v0 }
 0x1c2   :  { %v2857_v20 = vpop.f32.mrf.mxu1  ;;  %v3040_v10 = vpop.f32.mrf.mxu0 }
 0x1c3   :  { %v4407_v20 = vpack.c.bf16 %v4343_v56, %v4343_v56  ;;  %v9961_v56 = vld [vmem:[%s12025_s3 + $0xd8] sm:$0xff]  }
 0x1c4   :  { %v9093_v13 = vpop.f32.mrf.mxu1  ;;  %v9123_v17 = vpop.f32.mrf.mxu0 }
 0x1c5   :  { %v2062_v13 = vadd.f32 %v11279_v47, %v11212_v59  ;;  %v9957_v59 = vld [vmem:[%s12025_s3 + $0xb8] sm:$0xff]  }
 0x1c6   :  { %9415 = vmatmul.mubr.msk.bf16.vlgmr.msra.gmra.mxu1 %vm4586_vm3, %v4401_v11  ;;  %9445 = vmatmul.mubr.msk.bf16.vlgmr.msra.gmra.mxu0 %vm4586_vm3, %v4406_v15  ;;  %v9956_v11 = vld [vmem:[%s12025_s3 + $0xd0] sm:$0xff]  }
 0x1c7   :  { %9425 = vmatpush3.bf16.msra.mxu1 %v9949_v8  ;;  %9455 = vmatpush3.bf16.msra.mxu0 %v9950_v14  ;;  %v1757_v8 = vadd.f32 %v11279_v47, %v11163_v31  ;;  %v4350_v31 = vmax.f32 %v2062_v13, 0.0 }
 0x1c8   :  { %9426 = vmatprep.mubr.msk.bf16.mxu1 %vm10006_vm1, %v10005_v0  ;;  %9456 = vmatprep.mubr.msk.bf16.mxu0 %vm10006_vm1, %v10005_v0 }
 0x1c9   :  { %9436 = vmatprep.subr.bf16.mxu1 %v10005_v0  ;;  %9466 = vmatprep.subr.bf16.mxu0 %v10005_v0  ;;  %v4345_v15 = vmax.f32 %v1757_v8, 0.0  ;;  %v4414_v32 = vpack.c.bf16 %v4350_v31, %v4350_v31  ;;  %v9964_v31 = vld [vmem:[%s12025_s3 + $0x110] sm:$0xff]  }
 0x1ca   :  { %v11522_v22 = vpop.f32.mrf.mxu1  ;;  %v11528_v18 = vpop.f32.mrf.mxu0 }
 0x1cb   :  { %v4409_v21 = vpack.c.bf16 %v4345_v15, %v4345_v15 }
 0x1cc   :  { %v9112_v34 = vpop.f32.mrf.mxu1  ;;  %v9142_v39 = vpop.f32.mrf.mxu0 }
 0x1cd   :  { %v2184_v34 = vadd.f32 %v11279_v47, %v11254_v28  ;;  %v4347_v39 = vmax.f32 %v1879_v19, 0.0 }
 0x1ce   :  { %v2979_v43 = vpop.f32.mrf.mxu1  ;;  %9427 = vmatmul.mubr.msk.bf16.vlgmr.msra.gmra.mxu1 %vm4586_vm3, %v4403_v41  ;;  %9457 = vmatmul.mubr.msk.bf16.vlgmr.msra.gmra.mxu0 %vm4586_vm3, %v4408_v36  ;;  %v3162_v45 = vpop.f32.mrf.mxu0  ;;  %v9958_v41 = vld [vmem:[%s12025_s3 + $0xe0] sm:$0xff]  }
 0x1cf   :  { %9437 = vmatpush3.bf16.msra.mxu1 %v9951_v46  ;;  %9467 = vmatpush3.bf16.msra.mxu0 %v9952_v35  ;;  %v4352_v57 = vmax.f32 %v2184_v34, 0.0  ;;  %v9959_v45 = vld [vmem:[%s12025_s3 + $0xc8] sm:$0xff]   ;;  %v4411_v6 = vpack.c.bf16 %v4347_v39, %v4347_v39  ;;  %v9966_v39 = vld [vmem:[%s12025_s3 + $0x120] sm:$0xff]  }
 0x1d0   :  { %v9113_v48 = vpop.f32.mrf.mxu1  ;;  %9438 = vmatprep.mubr.msk.bf16.mxu1 %vm10006_vm1, %v10005_v0  ;;  %9468 = vmatprep.mubr.msk.bf16.mxu0 %vm10006_vm1, %v10005_v0  ;;  %v9143_v9 = vpop.f32.mrf.mxu0 }
 0x1d1   :  { %9448 = vmatprep.subr.bf16.mxu1 %v10005_v0  ;;  %9478 = vmatprep.subr.bf16.mxu0 %v10005_v0  ;;  %v2001_v48 = vadd.f32 %v11279_v47, %v11247_v26  ;;  %v4416_v9 = vpack.c.bf16 %v4352_v57, %v4352_v57  ;;  %v2672_v57 = vadd.f32 %v11279_v47, %v11404_v29 }
 0x1d6   :  { %v11555_v53 = vpop.f32.mrf.mxu1  ;;  %9439 = vmatmul.mubr.msk.bf16.vlgmr.msra.gmra.mxu1 %vm4586_vm3, %v4405_v38  ;;  %9469 = vmatmul.mubr.msk.bf16.vlgmr.msra.gmra.mxu0 %vm4586_vm3, %v4410_v50  ;;  %v11559_v54 = vpop.f32.mrf.mxu0 }
 0x1d7   :  { %9449 = vmatpush3.bf16.msra.mxu1 %v9953_v40  ;;  %9479 = vmatpush3.bf16.msra.mxu0 %v9954_v63  ;;  %v2306_v40 = vadd.f32 %v11279_v47, %v11302_v58  ;;  %v4349_v63 = vmax.f32 %v2001_v48, 0.0 }
 0x1d8   :  { %v9132_v5 = vpop.f32.mrf.mxu1  ;;  %9450 = vmatprep.mubr.msk.bf16.mxu1 %vm10006_vm1, %v10005_v0  ;;  %9480 = vmatprep.mubr.msk.bf16.mxu0 %vm10006_vm1, %v10005_v0  ;;  %v9162_v33 = vpop.f32.mrf.mxu0 }
 0x1d9   :  { %9460 = vmatprep.subr.bf16.mxu1 %v10005_v0  ;;  %9490 = vmatprep.subr.bf16.mxu0 %v10005_v0  ;;  %v4354_v26 = vmax.f32 %v2306_v40, 0.0  ;;  %v4413_v7 = vpack.c.bf16 %v4349_v63, %v4349_v63  ;;  %v2123_v33 = vadd.f32 %v11279_v47, %v11295_v55 }
 0x1da   :  { %v3101_v61 = vpop.f32.mrf.mxu1  ;;  %v3284_v23 = vpop.f32.mrf.mxu0 }
 0x1db   :  { %v4418_v23 = vpack.c.bf16 %v4354_v26, %v4354_v26 }
 0x1dc   :  { %v9133_v10 = vpop.f32.mrf.mxu1  ;;  %v9163_v14 = vpop.f32.mrf.mxu0 }
 0x1dd   :  { %v4351_v10 = vmax.f32 %v2123_v33, 0.0  ;;  %v2245_v14 = vadd.f32 %v11279_v47, %v11331_v51 }
 0x1de   :  { %9451 = vmatmul.mubr.msk.bf16.vlgmr.msra.gmra.mxu1 %vm4586_vm3, %v4407_v20  ;;  %9481 = vmatmul.mubr.msk.bf16.vlgmr.msra.gmra.mxu0 %vm4586_vm3, %v4412_v12  ;;  %v2428_v20 = vadd.f32 %v11279_v47, %v11339_v27  ;;  %v9963_v27 = vld [vmem:[%s12025_s3 + $0xe8] sm:$0xff]  }
 0x1df   :  { %9461 = vmatpush3.bf16.msra.mxu1 %v9955_v60  ;;  %9491 = vmatpush3.bf16.msra.mxu0 %v9956_v11  ;;  %v9962_v60 = vld [vmem:[%s12025_s3 + $0x100] sm:$0xff]   ;;  %v4415_v13 = vpack.c.bf16 %v4351_v10, %v4351_v10 }
 0x1e0   :  { %9462 = vmatprep.mubr.msk.bf16.mxu1 %vm10006_vm1, %v10005_v0  ;;  %9492 = vmatprep.mubr.msk.bf16.mxu0 %vm10006_vm1, %v10005_v0  ;;  %v4356_v55 = vmax.f32 %v2428_v20, 0.0 }
 0x1e1   :  { %9472 = vmatprep.subr.bf16.mxu1 %v10005_v0  ;;  %9502 = vmatprep.subr.bf16.mxu0 %v10005_v0 }
 0x1e2   :  { %v11584_v16 = vpop.f32.mrf.mxu1  ;;  %v11590_v17 = vpop.f32.mrf.mxu0 }
 0x1e4   :  { %v9152_v46 = vpop.f32.mrf.mxu1  ;;  %v9182_v35 = vpop.f32.mrf.mxu0 }
 0x1e5   :  { %v9965_v35 = vld [vmem:[%s12025_s3 + $0xf8] sm:$0xff]  }
 0x1e6   :  { %v3223_v36 = vpop.f32.mrf.mxu1  ;;  %9463 = vmatmul.mubr.msk.bf16.vlgmr.msra.gmra.mxu1 %vm4586_vm3, %v4409_v21  ;;  %9493 = vmatmul.mubr.msk.bf16.vlgmr.msra.gmra.mxu0 %vm4586_vm3, %v4414_v32  ;;  %v3406_v37 = vpop.f32.mrf.mxu0  ;;  %v2550_v21 = vadd.f32 %v11279_v47, %v11373_v49  ;;  %v4353_v32 = vmax.f32 %v2245_v14, 0.0 }
 0x1e7   :  { %9473 = vmatpush3.bf16.msra.mxu1 %v9957_v59  ;;  %9503 = vmatpush3.bf16.msra.mxu0 %v9958_v41  ;;  %v4420_v59 = vpack.c.bf16 %v4356_v55, %v4356_v55  ;;  %v2367_v37 = vadd.f32 %v11279_v47, %v11369_v62  ;;  %v4360_v62 = vmax.f32 %v2672_v57, 0.0  ;;  %v2916_v55 = vadd.f32 %v11279_v47, %v11466_v30 }
 0x1e8   :  { %v9153_v43 = vpop.f32.mrf.mxu1  ;;  %9474 = vmatprep.mubr.msk.bf16.mxu1 %vm10006_vm1, %v10005_v0  ;;  %9504 = vmatprep.mubr.msk.bf16.mxu0 %vm10006_vm1, %v10005_v0  ;;  %v9183_v28 = vpop.f32.mrf.mxu0  ;;  %v4358_v51 = vmax.f32 %v2550_v21, 0.0  ;;  %v4417_v36 = vpack.c.bf16 %v4353_v32, %v4353_v32  ;;  %v3038_v32 = vadd.f32 %v11279_v47, %v11497_v24  ;;  %v2855_v57 = vadd.f32 %v11279_v47, %v11493_v4 }
 0x1e9   :  { %9484 = vmatprep.subr.bf16.mxu1 %v10005_v0  ;;  %9514 = vmatprep.subr.bf16.mxu0 %v10005_v0 }
 0x1ea   :  { %v4422_v43 = vpack.c.bf16 %v4358_v51, %v4358_v51 }
 0x1ee   :  { %v11617_v38 = vpop.f32.mrf.mxu1  ;;  %9475 = vmatmul.mubr.msk.bf16.vlgmr.msra.gmra.mxu1 %vm4586_vm3, %v4411_v6  ;;  %9505 = vmatmul.mubr.msk.bf16.vlgmr.msra.gmra.mxu0 %vm4586_vm3, %v4416_v9  ;;  %v11621_v1 = vpop.f32.mrf.mxu0  ;;  %v4355_v6 = vmax.f32 %v2367_v37, 0.0  ;;  %v9967_v9 = vld [vmem:[%s12025_s3 + $0x108] sm:$0xff]   ;;  %v9973_v37 = vld [vmem:[%s12025_s3 + $0x138] sm:$0xff]  }
 0x1ef   :  { %9485 = vmatpush3.bf16.msra.mxu1 %v9959_v45  ;;  %9515 = vmatpush3.bf16.msra.mxu0 %v9960_v44 }
 0x1f0   :  { %v9172_v50 = vpop.f32.mrf.mxu1  ;;  %9486 = vmatprep.mubr.msk.bf16.mxu1 %vm10006_vm1, %v10005_v0  ;;  %9516 = vmatprep.mubr.msk.bf16.mxu0 %vm10006_vm1, %v10005_v0  ;;  %v9202_v58 = vpop.f32.mrf.mxu0  ;;  %v4419_v63 = vpack.c.bf16 %v4355_v6, %v4355_v6 }
 0x1f1   :  { %9496 = vmatprep.subr.bf16.mxu1 %v10005_v0  ;;  %9526 = vmatprep.subr.bf16.mxu0 %v10005_v0  ;;  %v2489_v50 = vadd.f32 %v11279_v47, %v11398_v25  ;;  %v9968_v58 = vld [vmem:[%s12025_s3 + $0x130] sm:$0xff]  }
 0x1f2   :  { %v3345_v52 = vpop.f32.mrf.mxu1  ;;  %v3528_v5 = vpop.f32.mrf.mxu0 }
 0x1f3   :  { %v4424_v52 = vpack.c.bf16 %v4360_v62, %v4360_v62 }
 0x1f4   :  { %v9173_v61 = vpop.f32.mrf.mxu1  ;;  %v9203_v8 = vpop.f32.mrf.mxu0 }
 0x1f5   :  { %v9970_v8 = vld [vmem:[%s12025_s3 + $0x140] sm:$0xff]  }
 0x1f6   :  { %9487 = vmatmul.mubr.msk.bf16.vlgmr.msra.gmra.mxu1 %vm4586_vm3, %v4413_v7  ;;  %9517 = vmatmul.mubr.msk.bf16.vlgmr.msra.gmra.mxu0 %vm4586_vm3, %v4418_v23  ;;  %v4357_v7 = vmax.f32 %v2489_v50, 0.0  ;;  %v2611_v23 = vadd.f32 %v11279_v47, %v11431_v2  ;;  %v4364_v2 = vmax.f32 %v2916_v55, 0.0  ;;  %v9978_v55 = vld [vmem:[%s12025_s3 + $0x180] sm:$0xff]  }
 0x1f7   :  { %9497 = vmatpush3.bf16.msra.mxu1 %v9961_v56  ;;  %9527 = vmatpush3.bf16.msra.mxu0 %v9962_v60  ;;  %v2794_v56 = vadd.f32 %v11279_v47, %v11435_v3  ;;  %v9969_v3 = vld [vmem:[%s12025_s3 + $0x118] sm:$0xff]  }
 0x1f8   :  { %9498 = vmatprep.mubr.msk.bf16.mxu1 %vm10006_vm1, %v10005_v0  ;;  %9528 = vmatprep.mubr.msk.bf16.mxu0 %vm10006_vm1, %v10005_v0  ;;  %v4421_v60 = vpack.c.bf16 %v4357_v7, %v4357_v7 }
 0x1f9   :  { %9508 = vmatprep.subr.bf16.mxu1 %v10005_v0  ;;  %9538 = vmatprep.subr.bf16.mxu0 %v10005_v0  ;;  %v4362_v25 = vmax.f32 %v2794_v56, 0.0 }
 0x1fa   :  { %v11646_v11 = vpop.f32.mrf.mxu1  ;;  %v11652_v12 = vpop.f32.mrf.mxu0 }
 0x1fb   :  { %v4426_v10 = vpack.c.bf16 %v4362_v25, %v4362_v25 }
 0x1fc   :  { %v9192_v15 = vpop.f32.mrf.mxu1  ;;  %v9222_v19 = vpop.f32.mrf.mxu0 }
 0x1fd   :  { %v4359_v15 = vmax.f32 %v2611_v23, 0.0  ;;  %v2733_v19 = vadd.f32 %v11279_v47, %v11460_v42  ;;  %v4366_v42 = vmax.f32 %v3038_v32, 0.0  ;;  %v9980_v32 = vld [vmem:[%s12025_s3 + $0x190] sm:$0xff]  }
 0x1fe   :  { %v3467_v46 = vpop.f32.mrf.mxu1  ;;  %9499 = vmatmul.mubr.msk.bf16.vlgmr.msra.gmra.mxu1 %vm4586_vm3, %v4415_v13  ;;  %9529 = vmatmul.mubr.msk.bf16.vlgmr.msra.gmra.mxu0 %vm4586_vm3, %v4420_v59  ;;  %v3650_v41 = vpop.f32.mrf.mxu0  ;;  %v9971_v59 = vld [vmem:[%s12025_s3 + $0x128] sm:$0xff]  }
 0x1ff   :  { %9509 = vmatpush3.bf16.msra.mxu1 %v9963_v27  ;;  %9539 = vmatpush3.bf16.msra.mxu0 %v9964_v31  ;;  %v4423_v21 = vpack.c.bf16 %v4359_v15, %v4359_v15  ;;  %v9972_v46 = vld [vmem:[%s12025_s3 + $0x150] sm:$0xff]   ;;  %v4428_v41 = vpack.c.bf16 %v4364_v2, %v4364_v2  ;;  %v4430_v62 = vpack.c.bf16 %v4366_v42, %v4366_v42 }
 0x200   :  { %v9193_v34 = vpop.f32.mrf.mxu1  ;;  %9510 = vmatprep.mubr.msk.bf16.mxu1 %vm10006_vm1, %v10005_v0  ;;  %9540 = vmatprep.mubr.msk.bf16.mxu0 %vm10006_vm1, %v10005_v0  ;;  %v9223_v49 = vpop.f32.mrf.mxu0 }
 0x201   :  { %9520 = vmatprep.subr.bf16.mxu1 %v10005_v0  ;;  %9550 = vmatprep.subr.bf16.mxu0 %v10005_v0  ;;  %v4361_v49 = vmax.f32 %v2733_v19, 0.0 }
 0x206   :  { %v11679_v28 = vpop.f32.mrf.mxu1  ;;  %9511 = vmatmul.mubr.msk.bf16.vlgmr.msra.gmra.mxu1 %vm4586_vm3, %v4417_v36  ;;  %9541 = vmatmul.mubr.msk.bf16.vlgmr.msra.gmra.mxu0 %vm4586_vm3, %v4422_v43  ;;  %v11683_v45 = vpop.f32.mrf.mxu0  ;;  %v4425_v43 = vpack.c.bf16 %v4361_v49, %v4361_v49 }
 0x207   :  { %9521 = vmatpush3.bf16.msra.mxu1 %v9965_v35  ;;  %9551 = vmatpush3.bf16.msra.mxu0 %v9966_v39 }
 0x208   :  { %v9212_v48 = vpop.f32.mrf.mxu1  ;;  %9522 = vmatprep.mubr.msk.bf16.mxu1 %vm10006_vm1, %v10005_v0  ;;  %9552 = vmatprep.mubr.msk.bf16.mxu0 %vm10006_vm1, %v10005_v0  ;;  %v9242_v29 = vpop.f32.mrf.mxu0 }
 0x209   :  { %9532 = vmatprep.subr.bf16.mxu1 %v10005_v0  ;;  %9562 = vmatprep.subr.bf16.mxu0 %v10005_v0  ;;  %v9974_v48 = vld [vmem:[%s12025_s3 + $0x160] sm:$0xff]   ;;  %v3160_v29 = vadd.f32 %v11279_v47, %v11528_v18 }
 0x20a   :  { %v3589_v44 = vpop.f32.mrf.mxu1  ;;  %v3772_v40 = vpop.f32.mrf.mxu0 }
 0x20b   :  { %v4368_v4 = vmax.f32 %v3160_v29, 0.0 }
 0x20c   :  { %v9213_v26 = vpop.f32.mrf.mxu1  ;;  %v9243_v5 = vpop.f32.mrf.mxu0 }
 0x20d   :  { %v2977_v26 = vadd.f32 %v11279_v47, %v11522_v22  ;;  %v4432_v56 = vpack.c.bf16 %v4368_v4, %v4368_v4  ;;  %v3282_v5 = vadd.f32 %v11279_v47, %v11559_v54  ;;  %v9977_v47 = vld [vmem:[%s12025_s3 + $0x158] sm:$0xff]  }
 0x20e   :  { %9523 = vmatmul.mubr.msk.bf16.vlgmr.msra.gmra.mxu1 %vm4586_vm3, %v4419_v63  ;;  %9553 = vmatmul.mubr.msk.bf16.vlgmr.msra.gmra.mxu0 %vm4586_vm3, %v4424_v52  ;;  %v9975_v63 = vld [vmem:[%s12025_s3 + $0x148] sm:$0xff]   ;;  %v9976_v52 = vld [vmem:[%s12025_s3 + $0x170] sm:$0xff]  }
 0x20f   :  { %9533 = vmatpush3.bf16.msra.mxu1 %v9967_v9  ;;  %9563 = vmatpush3.bf16.msra.mxu0 %v9968_v58  ;;  %v4363_v9 = vmax.f32 %v2855_v57, 0.0  ;;  %v4370_v22 = vmax.f32 %v3282_v5, 0.0 }
 0x210   :  { %9534 = vmatprep.mubr.msk.bf16.mxu1 %vm10006_vm1, %v10005_v0  ;;  %9564 = vmatprep.mubr.msk.bf16.mxu0 %vm10006_vm1, %v10005_v0 }
 0x211   :  { %9544 = vmatprep.subr.bf16.mxu1 %v10005_v0  ;;  %9574 = vmatprep.subr.bf16.mxu0 %v10005_v0  ;;  %v4427_v50 = vpack.c.bf16 %v4363_v9, %v4363_v9 }
 0x212   :  { %v11708_v33 = vpop.f32.mrf.mxu1  ;;  %v11714_v61 = vpop.f32.mrf.mxu0 }
 0x214   :  { %v9232_v20 = vpop.f32.mrf.mxu1  ;;  %v9262_v27 = vpop.f32.mrf.mxu0 }
 0x215   :  { %v4434_v27 = vpack.c.bf16 %v4370_v22, %v4370_v22 }
 0x216   :  { %v3711_v13 = vpop.f32.mrf.mxu1  ;;  %9535 = vmatmul.mubr.msk.bf16.vlgmr.msra.gmra.mxu1 %vm4586_vm3, %v4421_v60  ;;  %9565 = vmatmul.mubr.msk.bf16.vlgmr.msra.gmra.mxu0 %vm4586_vm3, %v4426_v10  ;;  %v3894_v14 = vpop.f32.mrf.mxu0  ;;  %v4365_v60 = vmax.f32 %v2977_v26, 0.0 }
 0x217   :  { %9545 = vmatpush3.bf16.msra.mxu1 %v9969_v3  ;;  %9575 = vmatpush3.bf16.msra.mxu0 %v9970_v8  ;;  %v11799_v8 = vld [vmem:[%s12026_s2] ss:$0 sm:$0xff] }
 0x218   :  { %v9233_v31 = vpop.f32.mrf.mxu1  ;;  %9546 = vmatprep.mubr.msk.bf16.mxu1 %vm10006_vm1, %v10005_v0  ;;  %9576 = vmatprep.mubr.msk.bf16.mxu0 %vm10006_vm1, %v10005_v0  ;;  %v9263_v30 = vpop.f32.mrf.mxu0  ;;  %v4429_v54 = vpack.c.bf16 %v4365_v60, %v4365_v60  ;;  %v3099_v10 = vadd.f32 %v11799_v8, %v11555_v53  ;;  %v3404_v13 = vadd.f32 %v11799_v8, %v11590_v17 }
 0x219   :  { %9556 = vmatprep.subr.bf16.mxu1 %v10005_v0  ;;  %9586 = vmatprep.subr.bf16.mxu0 %v10005_v0  ;;  %v3465_v5 = vadd.f32 %v11799_v8, %v11646_v11 }
 0x21a   :  { %v4367_v31 = vmax.f32 %v3099_v10, 0.0  ;;  %v4372_v53 = vmax.f32 %v3404_v13, 0.0  ;;  %v3587_v13 = vadd.f32 %v11799_v8, %v11679_v28 }
 0x21c   :  { %v4431_v19 = vpack.c.bf16 %v4367_v31, %v4367_v31  ;;  %v4436_v49 = vpack.c.bf16 %v4372_v53, %v4372_v53  ;;  %v4375_v28 = vmax.f32 %v3587_v13, 0.0 }
 0x21e   :  { %v11741_v34 = vpop.f32.mrf.mxu1  ;;  %9547 = vmatmul.mubr.msk.bf16.vlgmr.msra.gmra.mxu1 %vm4586_vm3, %v4423_v21  ;;  %9577 = vmatmul.mubr.msk.bf16.vlgmr.msra.gmra.mxu0 %vm4586_vm3, %v4428_v41  ;;  %v11745_v51 = vpop.f32.mrf.mxu0  ;;  %v9979_v21 = vld [vmem:[%s12025_s3 + $0x168] sm:$0xff]  }
 0x21f   :  { %9557 = vmatpush3.bf16.msra.mxu1 %v9971_v59  ;;  %9587 = vmatpush3.bf16.msra.mxu0 %v9972_v46  ;;  %v3221_v46 = vadd.f32 %v11799_v8, %v11584_v16 }
 0x220   :  { %v9252_v35 = vpop.f32.mrf.mxu1  ;;  %9558 = vmatprep.mubr.msk.bf16.mxu1 %vm10006_vm1, %v10005_v0  ;;  %9588 = vmatprep.mubr.msk.bf16.mxu0 %vm10006_vm1, %v10005_v0  ;;  %v9282_v24 = vpop.f32.mrf.mxu0 }
 0x221   :  { %9568 = vmatprep.subr.bf16.mxu1 %v10005_v0  ;;  %9598 = vmatprep.subr.bf16.mxu0 %v10005_v0  ;;  %v3526_v35 = vadd.f32 %v11799_v8, %v11621_v1 }
 0x222   :  { %v3833_v36 = vpop.f32.mrf.mxu1  ;;  %v4016_v39 = vpop.f32.mrf.mxu0 }
 0x223   :  { %v4369_v36 = vmax.f32 %v3221_v46, 0.0  ;;  %v4374_v16 = vmax.f32 %v3526_v35, 0.0 }
 0x224   :  { %v9253_v6 = vpop.f32.mrf.mxu1  ;;  %v9283_v44 = vpop.f32.mrf.mxu0 }
 0x225   :  { %v4433_v57 = vpack.c.bf16 %v4369_v36, %v4369_v36  ;;  %v3343_v6 = vadd.f32 %v11799_v8, %v11617_v38  ;;  %v4438_v29 = vpack.c.bf16 %v4374_v16, %v4374_v16  ;;  %v3648_v44 = vadd.f32 %v11799_v8, %v11652_v12 }
 0x226   :  { %9559 = vmatmul.mubr.msk.bf16.vlgmr.msra.gmra.mxu1 %vm4586_vm3, %v4425_v43  ;;  %9589 = vmatmul.mubr.msk.bf16.vlgmr.msra.gmra.mxu0 %vm4586_vm3, %v4430_v62  ;;  %v9981_v43 = vld [vmem:[%s12025_s3 + $0x178] sm:$0xff]   ;;  %v9982_v62 = vld [vmem:[%s12025_s3 + $0x1a0] sm:$0xff]   ;;  %v3709_v36 = vadd.f32 %v11799_v8, %v11708_v33 }
 0x227   :  { %9569 = vmatpush3.bf16.msra.mxu1 %v9973_v37  ;;  %9599 = vmatpush3.bf16.msra.mxu0 %v9974_v48  ;;  %v4376_v38 = vmax.f32 %v3648_v44, 0.0 }
 0x228   :  { %9570 = vmatprep.mubr.msk.bf16.mxu1 %vm10006_vm1, %v10005_v0  ;;  %9600 = vmatprep.mubr.msk.bf16.mxu0 %vm10006_vm1, %v10005_v0 }
 0x229   :  { %9580 = vmatprep.subr.bf16.mxu1 %v10005_v0  ;;  %9610 = vmatprep.subr.bf16.mxu0 %v10005_v0 }
 0x22a   :  { %v11770_v40 = vpop.f32.mrf.mxu1  ;;  %v11773_v18 = vpop.f32.mrf.mxu0 }
 0x22c   :  { %v9272_v58 = vpop.f32.mrf.mxu1  ;;  %v9302_v7 = vpop.f32.mrf.mxu0 }
 0x22d   :  { %v9984_v7 = vld [vmem:[%s12025_s3 + $0x1b0] sm:$0xff]  }
 0x22e   :  { %v3955_v25 = vpop.f32.mrf.mxu1  ;;  %9571 = vmatmul.mubr.msk.bf16.vlgmr.msra.gmra.mxu1 %vm4586_vm3, %v4427_v50  ;;  %9601 = vmatmul.mubr.msk.bf16.vlgmr.msra.gmra.mxu0 %vm4586_vm3, %v4432_v56  ;;  %v4138_v3 = vpop.f32.mrf.mxu0  ;;  %v4371_v50 = vmax.f32 %v3343_v6, 0.0 }
 0x22f   :  { %9581 = vmatpush3.bf16.msra.mxu1 %v9975_v63  ;;  %9611 = vmatpush3.bf16.msra.mxu0 %v9976_v52  ;;  %v9983_v52 = vld [vmem:[%s12025_s3 + $0x188] sm:$0xff]   ;;  %v4440_v25 = vpack.c.bf16 %v4376_v38, %v4376_v38  ;;  %v3770_v3 = vadd.f32 %v11799_v8, %v11683_v45  ;;  %v3831_v38 = vadd.f32 %v11799_v8, %v11741_v34 }
 0x230   :  { %v9273_v23 = vpop.f32.mrf.mxu1  ;;  %9582 = vmatprep.mubr.msk.bf16.mxu1 %vm10006_vm1, %v10005_v0  ;;  %v9303_v20 = vpop.f32.mrf.mxu0  ;;  %9612 = vmatprep.mubr.msk.bf16.mxu0 %vm10006_vm1, %v10005_v0  ;;  %v4435_v56 = vpack.c.bf16 %v4371_v50, %v4371_v50  ;;  %v9989_v50 = vld [vmem:[%s12025_s3 + $0x1b8] sm:$0xff]  }
 0x231   :  { %9592 = vmatprep.subr.bf16.mxu1 %v10005_v0  ;;  %9622 = vmatprep.subr.bf16.mxu0 %v10005_v0  ;;  %v4373_v20 = vmax.f32 %v3465_v5, 0.0  ;;  %v4378_v11 = vmax.f32 %v3770_v3, 0.0 }
 0x233   :  { %v4442_v53 = vpack.c.bf16 %v4378_v11, %v4378_v11 }
 0x236   :  { %v11808_v14 = vpop.f32.mrf.mxu1  ;;  %9583 = vmatmul.mubr.msk.bf16.vlgmr.msra.gmra.mxu1 %vm4586_vm3, %v4429_v54  ;;  %v11811_v15 = vpop.f32.mrf.mxu0  ;;  %9613 = vmatmul.mubr.msk.bf16.vlgmr.msra.gmra.mxu0 %vm4586_vm3, %v4434_v27  ;;  %v4437_v27 = vpack.c.bf16 %v4373_v20, %v4373_v20 }
 0x237   :  { %9593 = vmatpush3.bf16.msra.mxu1 %v9977_v47  ;;  %9623 = vmatpush3.bf16.msra.mxu0 %v9978_v55  ;;  %v9985_v55 = vld [vmem:[%s12025_s3 + $0x198] sm:$0xff]  }
 0x238   :  { %v9292_v2 = vpop.f32.mrf.mxu1  ;;  %9594 = vmatprep.mubr.msk.bf16.mxu1 %vm10006_vm1, %v10005_v0  ;;  %v9322_v30 = vpop.f32.mrf.mxu0  ;;  %9624 = vmatprep.mubr.msk.bf16.mxu0 %vm10006_vm1, %v10005_v0 }
 0x239   :  { %9604 = vmatprep.subr.bf16.mxu1 %v10005_v0  ;;  %9634 = vmatprep.subr.bf16.mxu0 %v10005_v0  ;;  %v9986_v2 = vld [vmem:[%s12025_s3 + $0x1c0] sm:$0xff]   ;;  %v3892_v30 = vadd.f32 %v11799_v8, %v11714_v61 }
 0x23a   :  { %v4077_v17 = vpop.f32.mrf.mxu1  ;;  %v4260_v59 = vpop.f32.mrf.mxu0 }
 0x23c   :  { %v9293_v41 = vpop.f32.mrf.mxu1  ;;  %v9323_v42 = vpop.f32.mrf.mxu0 }
 0x23d   :  { %v4380_v41 = vmax.f32 %v3892_v30, 0.0  ;;  %v9987_v42 = vld [vmem:[%s12025_s3 + $0x1a8] sm:$0xff]  }
 0x23e   :  { %9595 = vmatmul.mubr.msk.bf16.vlgmr.msra.gmra.mxu1 %vm4586_vm3, %v4431_v19  ;;  %v11831_v24 = vpop.f32.mrf.mxu0  ;;  %9625 = vmatmul.mubr.msk.bf16.vlgmr.msra.gmra.mxu0 %vm4586_vm3, %v4436_v49 }
 0x23f   :  { %9605 = vmatpush3.bf16.msra.mxu1 %v9979_v21  ;;  %9635 = vmatpush3.bf16.msra.mxu0 %v9980_v32 }
 0x240   :  { %9606 = vmatprep.mubr.msk.bf16.mxu1 %vm10006_vm1, %v10005_v0  ;;  %v9338_v37 = vpop.f32.mrf.mxu0  ;;  %9636 = vmatprep.mubr.msk.bf16.mxu0 %vm10006_vm1, %v10005_v0 }
 0x241   :  { %9616 = vmatprep.subr.bf16.mxu1 %v10005_v0  ;;  %9646 = vmatprep.subr.bf16.mxu0 %v10005_v0  ;;  %v9988_v37 = vld [vmem:[%s12025_s3 + $0x1d0] sm:$0xff]  }
 0x242   :  { %v11839_v1 = vpop.f32.mrf.mxu1  ;;  %v4627_v39 = vpop.f32.mrf.mxu0 }
 0x243   :  { %v4444_v39 = vpack.c.bf16 %v4380_v41, %v4380_v41  ;;  %v9993_v41 = vld [vmem:[%s12025_s3 + $0x1d8] sm:$0xff]  }
 0x244   :  { %v9312_v48 = vpop.f32.mrf.mxu1  ;;  %v9339_v9 = vpop.f32.mrf.mxu0 }
 0x246   :  { %v4199_v4 = vpop.f32.mrf.mxu1  ;;  %9607 = vmatmul.mubr.msk.bf16.vlgmr.msra.gmra.mxu1 %vm4586_vm3, %v4433_v57  ;;  %v4722_v63 = vpop.f32.mrf.mxu0  ;;  %9637 = vmatmul.mubr.msk.bf16.vlgmr.msra.gmra.mxu0 %vm4586_vm3, %v4438_v29  ;;  %v4377_v29 = vmax.f32 %v3709_v36, 0.0 }
 0x247   :  { %9617 = vmatpush3.bf16.msra.mxu1 %v9981_v43  ;;  %9647 = vmatpush3.bf16.msra.mxu0 %v9982_v62  ;;  %v4014_v43 = vadd.f32 %v11799_v8, %v11745_v51 }
 0x248   :  { %v9313_v26 = vpop.f32.mrf.mxu1  ;;  %9618 = vmatprep.mubr.msk.bf16.mxu1 %vm10006_vm1, %v10005_v0  ;;  %v9350_v58 = vpop.f32.mrf.mxu0  ;;  %9648 = vmatprep.mubr.msk.bf16.mxu0 %vm10006_vm1, %v10005_v0 }
 0x249   :  { %9628 = vmatprep.subr.bf16.mxu1 %v10005_v0  ;;  %9658 = vmatprep.subr.bf16.mxu0 %v10005_v0  ;;  %v4382_v44 = vmax.f32 %v4014_v43, 0.0  ;;  %v4441_v26 = vpack.c.bf16 %v4377_v29, %v4377_v29  ;;  %v4197_v29 = vadd.f32 %v11799_v8, %v11839_v1  ;;  %v9995_v1 = vld [vmem:[%s12025_s3 + $0x1f8] sm:$0xff]  }
 0x24a   :  { %v4725_v12 = vpop.f32.mrf.mxu0 }
 0x24b   :  { %v9990_v12 = vld [vmem:[%s12025_s3 + $0x1e0] sm:$0xff]  }
 0x24c   :  { %v9351_v60 = vpop.f32.mrf.mxu0 }
 0x24d   :  { %v4379_v60 = vmax.f32 %v3831_v38, 0.0 }
 0x24e   :  { %v11870_v23 = vpop.f32.mrf.mxu1  ;;  %9619 = vmatmul.mubr.msk.bf16.vlgmr.msra.gmra.mxu1 %vm4586_vm3, %v4435_v56  ;;  %v4820_v22 = vpop.f32.mrf.mxu0  ;;  %9649 = vmatmul.mubr.msk.bf16.vlgmr.msra.gmra.mxu0 %vm4586_vm3, %v4440_v25  ;;  %v4136_v56 = vadd.f32 %v11799_v8, %v11773_v18 }
 0x24f   :  { %9629 = vmatpush3.bf16.msra.mxu1 %v9983_v52  ;;  %9659 = vmatpush3.bf16.msra.mxu0 %v9984_v7  ;;  %v4446_v52 = vpack.c.bf16 %v4382_v44, %v4382_v44 }
 0x250   :  { %v9332_v47 = vpop.f32.mrf.mxu1  ;;  %9630 = vmatprep.mubr.msk.bf16.mxu1 %vm10006_vm1, %v10005_v0  ;;  %v9362_v54 = vpop.f32.mrf.mxu0  ;;  %9660 = vmatprep.mubr.msk.bf16.mxu0 %vm10006_vm1, %v10005_v0 }
 0x251   :  { %9640 = vmatprep.subr.bf16.mxu1 %v10005_v0  ;;  %9670 = vmatprep.subr.bf16.mxu0 %v10005_v0  ;;  %v9991_v54 = vld [vmem:[%s12025_s3 + $0x1c8] sm:$0xff]  }
 0x252   :  { %v4321_v45 = vpop.f32.mrf.mxu1  ;;  %v4823_v10 = vpop.f32.mrf.mxu0 }
 0x253   :  { %v4443_v45 = vpack.c.bf16 %v4379_v60, %v4379_v60  ;;  %v3953_v10 = vadd.f32 %v11799_v8, %v11770_v40 }
 0x254   :  { %v9333_v31 = vpop.f32.mrf.mxu1  ;;  %v9363_v17 = vpop.f32.mrf.mxu0 }
 0x255   :  { %v4258_v31 = vadd.f32 %v11799_v8, %v11811_v15 }
 0x256   :  { %v4673_v59 = vpop.f32.mrf.mxu1  ;;  %9631 = vmatmul.mubr.msk.bf16.vlgmr.msra.gmra.mxu1 %vm4586_vm3, %v4437_v27  ;;  %v4918_v19 = vpop.f32.mrf.mxu0  ;;  %9661 = vmatmul.mubr.msk.bf16.vlgmr.msra.gmra.mxu0 %vm4586_vm3, %v4442_v53  ;;  %v9992_v27 = vld [vmem:[%s12025_s3 + $0x1f0] sm:$0xff]  }
 0x257   :  { %v7717_v21 = vadd.f32 %v4673_v59, %v11831_v24  ;;  %9641 = vmatpush3.bf16.msra.mxu1 %v9985_v55  ;;  %9671 = vmatpush3.bf16.msra.mxu0 %v9986_v2  ;;  %v4439_v24 = vpack.c.bf16 %v4375_v28, %v4375_v28  ;;  %v4381_v59 = vmax.f32 %v3953_v10, 0.0 }
 0x258   :  { %v9344_v46 = vpop.f32.mrf.mxu1  ;;  %9642 = vmatprep.mubr.msk.bf16.mxu1 %vm10006_vm1, %v10005_v0  ;;  %v9374_v49 = vpop.f32.mrf.mxu0  ;;  %9672 = vmatprep.mubr.msk.bf16.mxu0 %vm10006_vm1, %v10005_v0 }
 0x259   :  { %v7718_v32 = vadd.f32 %v7717_v21, %v4722_v63  ;;  %9652 = vmatprep.subr.bf16.mxu1 %v10005_v0  ;;  %9682 = vmatprep.subr.bf16.mxu0 %v10005_v0  ;;  %v4386_v21 = vmax.f32 %v4258_v31, 0.0  ;;  %v4075_v49 = vadd.f32 %v11799_v8, %v11808_v14 }
 0x25a   :  { %v4676_v61 = vpop.f32.mrf.mxu1  ;;  %v4921_v35 = vpop.f32.mrf.mxu0 }
 0x25b   :  { %v4450_v35 = vpack.c.bf16 %v4386_v21, %v4386_v21 }
 0x25c   :  { %v9345_v16 = vpop.f32.mrf.mxu1  ;;  %v9375_v57 = vpop.f32.mrf.mxu0 }
 0x25e   :  { %v4771_v6 = vpop.f32.mrf.mxu1  ;;  %9643 = vmatmul.mubr.msk.bf16.vlgmr.msra.gmra.mxu1 %vm4586_vm3, %v4439_v24  ;;  %v5016_v62 = vpop.f32.mrf.mxu0  ;;  %9673 = vmatmul.mubr.msk.bf16.vlgmr.msra.gmra.mxu0 %vm4586_vm3, %v4444_v39 }
 0x25f   :  { %v7719_v48 = vadd.f32 %v7718_v32, %v4771_v6  ;;  %9653 = vmatpush3.bf16.msra.mxu1 %v9987_v42  ;;  %9683 = vmatpush3.bf16.msra.mxu0 %v9988_v37  ;;  %v4445_v32 = vpack.c.bf16 %v4381_v59, %v4381_v59  ;;  %v4383_v37 = vmax.f32 %v4075_v49, 0.0 }
 0x260   :  { %v9356_v33 = vpop.f32.mrf.mxu1  ;;  %9654 = vmatprep.mubr.msk.bf16.mxu1 %vm10006_vm1, %v10005_v0  ;;  %v9386_v4 = vpop.f32.mrf.mxu0  ;;  %9684 = vmatprep.mubr.msk.bf16.mxu0 %vm10006_vm1, %v10005_v0 }
 0x261   :  { %v7720_v9 = vadd.f32 %v7719_v48, %v4820_v22  ;;  %9664 = vmatprep.subr.bf16.mxu1 %v10005_v0  ;;  %9694 = vmatprep.subr.bf16.mxu0 %v10005_v0  ;;  %v4384_v22 = vmax.f32 %v4136_v56, 0.0  ;;  %v9994_v48 = vld [vmem:[%s12025_s3 + $0x1e8] sm:$0xff]   ;;  %v4319_v56 = vadd.f32 %v11799_v8, %v11870_v23 }
 0x262   :  { %v4774_v51 = vpop.f32.mrf.mxu1  ;;  %v5019_v63 = vpop.f32.mrf.mxu0 }
 0x263   :  { %v4448_v13 = vpack.c.bf16 %v4384_v22, %v4384_v22  ;;  %v4385_v63 = vmax.f32 %v4197_v29, 0.0 }
 0x264   :  { %v9357_v58 = vpop.f32.mrf.mxu1  ;;  %v9387_v5 = vpop.f32.mrf.mxu0 }
 0x266   :  { %v4869_v7 = vpop.f32.mrf.mxu1  ;;  %9655 = vmatmul.mubr.msk.bf16.vlgmr.msra.gmra.mxu1 %vm4586_vm3, %v4441_v26  ;;  %v5114_v3 = vpop.f32.mrf.mxu0  ;;  %9685 = vmatmul.mubr.msk.bf16.vlgmr.msra.gmra.mxu0 %vm4586_vm3, %v4446_v52  ;;  %v4449_v52 = vpack.c.bf16 %v4385_v63, %v4385_v63 }
 0x267   :  { %v7721_v25 = vadd.f32 %v7720_v9, %v4869_v7  ;;  %9665 = vmatpush3.bf16.msra.mxu1 %v9989_v50  ;;  %9695 = vmatpush3.bf16.msra.mxu0 %v9990_v12 }
 0x268   :  { %v9368_v34 = vpop.f32.mrf.mxu1  ;;  %9666 = vmatprep.mubr.msk.bf16.mxu1 %vm10006_vm1, %v10005_v0  ;;  %v9398_v20 = vpop.f32.mrf.mxu0  ;;  %9696 = vmatprep.mubr.msk.bf16.mxu0 %vm10006_vm1, %v10005_v0 }
 0x269   :  { %v7722_v18 = vadd.f32 %v7721_v25, %v4918_v19  ;;  %9676 = vmatprep.subr.bf16.mxu1 %v10005_v0  ;;  %9706 = vmatprep.subr.bf16.mxu0 %v10005_v0  ;;  %v4387_v34 = vmax.f32 %v4319_v56, 0.0 }
 0x26a   :  { %v4872_v47 = vpop.f32.mrf.mxu1  ;;  %v5117_v11 = vpop.f32.mrf.mxu0 }
 0x26c   :  { %v9369_v55 = vpop.f32.mrf.mxu1  ;;  %v9399_v2 = vpop.f32.mrf.mxu0 }
 0x26e   :  { %v4967_v53 = vpop.f32.mrf.mxu1  ;;  %9667 = vmatmul.mubr.msk.bf16.vlgmr.msra.gmra.mxu1 %vm4586_vm3, %v4443_v45  ;;  %v5212_v17 = vpop.f32.mrf.mxu0  ;;  %9697 = vmatmul.mubr.msk.bf16.vlgmr.msra.gmra.mxu0 %vm4586_vm3, %v4448_v13 }
 0x26f   :  { %v7723_v30 = vadd.f32 %v7722_v18, %v4967_v53  ;;  %9677 = vmatpush3.bf16.msra.mxu1 %v9991_v54  ;;  %9707 = vmatpush3.bf16.msra.mxu0 %v9992_v27  ;;  %v4451_v54 = vpack.c.bf16 %v4387_v34, %v4387_v34 }
 0x270   :  { %v9380_v40 = vpop.f32.mrf.mxu1  ;;  %9678 = vmatprep.mubr.msk.bf16.mxu1 %vm10006_vm1, %v10005_v0  ;;  %v9410_v19 = vpop.f32.mrf.mxu0  ;;  %9708 = vmatprep.mubr.msk.bf16.mxu0 %vm10006_vm1, %v10005_v0 }
 0x271   :  { %v7724_v15 = vadd.f32 %v7723_v30, %v5016_v62  ;;  %9688 = vmatprep.subr.bf16.mxu1 %v10005_v0  ;;  %9718 = vmatprep.subr.bf16.mxu0 %v10005_v0  ;;  %v4447_v62 = vpack.c.bf16 %v4383_v37, %v4383_v37 }
 0x272   :  { %v4970_v28 = vpop.f32.mrf.mxu1  ;;  %v5215_v46 = vpop.f32.mrf.mxu0 }
 0x274   :  { %v9381_v61 = vpop.f32.mrf.mxu1  ;;  %v9411_v42 = vpop.f32.mrf.mxu0 }
 0x276   :  { %v5065_v24 = vpop.f32.mrf.mxu1  ;;  %9679 = vmatmul.mubr.msk.bf16.vlgmr.msra.gmra.mxu1 %vm4586_vm3, %v4445_v32  ;;  %v5310_v16 = vpop.f32.mrf.mxu0  ;;  %9709 = vmatmul.mubr.msk.bf16.vlgmr.msra.gmra.mxu0 %vm4586_vm3, %v4450_v35 }
 0x277   :  { %v7725_v36 = vadd.f32 %v7724_v15, %v5065_v24  ;;  %9689 = vmatpush3.bf16.msra.mxu1 %v9993_v41  ;;  %9690 = vmatprep.mubr.msk.bf16.mxu1 %vm10006_vm1, %v10005_v0 }
 0x278   :  { %v9392_v39 = vpop.f32.mrf.mxu1  ;;  %9700 = vmatprep.subr.bf16.mxu1 %v10005_v0  ;;  %v9422_v43 = vpop.f32.mrf.mxu0  ;;  %9734 = vmatprep.mubr.msk.bf16.mxu0 %vm10006_vm1, %v10005_v0 }
 0x279   :  { %v7726_v14 = vadd.f32 %v7725_v36, %v5114_v3 }
 0x27a   :  { %v5068_v57 = vpop.f32.mrf.mxu1  ;;  %v5313_v6 = vpop.f32.mrf.mxu0 }
 0x27c   :  { %v9393_v33 = vpop.f32.mrf.mxu1  ;;  %v9423_v44 = vpop.f32.mrf.mxu0 }
 0x27e   :  { %v5163_v9 = vpop.f32.mrf.mxu1  ;;  %9691 = vmatmul.mubr.msk.bf16.vlgmr.msra.gmra.mxu1 %vm4586_vm3, %v4447_v62  ;;  %v5408_v51 = vpop.f32.mrf.mxu0 }
 0x27f   :  { %v7727_v4 = vadd.f32 %v7726_v14, %v5163_v9  ;;  %9701 = vmatpush3.bf16.msra.mxu1 %v9994_v48  ;;  %9702 = vmatprep.mubr.msk.bf16.mxu1 %vm10006_vm1, %v10005_v0 }
 0x280   :  { %v9404_v50 = vpop.f32.mrf.mxu1  ;;  %9712 = vmatprep.subr.bf16.mxu1 %v10005_v0  ;;  %v9434_v26 = vpop.f32.mrf.mxu0 }
 0x281   :  { %v7728_v38 = vadd.f32 %v7727_v4, %v5212_v17 }
 0x282   :  { %v5166_v58 = vpop.f32.mrf.mxu1  ;;  %v5411_v12 = vpop.f32.mrf.mxu0 }
 0x284   :  { %v9405_v5 = vpop.f32.mrf.mxu1  ;;  %v9435_v7 = vpop.f32.mrf.mxu0 }
 0x286   :  { %v5261_v25 = vpop.f32.mrf.mxu1  ;;  %9703 = vmatmul.mubr.msk.bf16.vlgmr.msra.gmra.mxu1 %vm4586_vm3, %v4449_v52  ;;  %v5506_v60 = vpop.f32.mrf.mxu0 }
 0x287   :  { %v7729_v3 = vadd.f32 %v7728_v38, %v5261_v25  ;;  %9713 = vmatpush3.bf16.msra.mxu1 %v9995_v1  ;;  %9714 = vmatprep.mubr.msk.bf16.mxu1 %vm10006_vm1, %v10005_v0 }
 0x288   :  { %v9416_v22 = vpop.f32.mrf.mxu1  ;;  %v9446_v20 = vpop.f32.mrf.mxu0 }
 0x289   :  { %v7730_v18 = vadd.f32 %v7729_v3, %v5310_v16 }
 0x28a   :  { %v5264_v47 = vpop.f32.mrf.mxu1  ;;  %v5509_v11 = vpop.f32.mrf.mxu0 }
 0x28b   :  { %v9997_v11 = vld [vmem:[%s12027_s5 + $0x30] sm:$0xff]  }
 0x28c   :  { %v9417_v45 = vpop.f32.mrf.mxu1  ;;  %v9447_v8 = vpop.f32.mrf.mxu0 }
 0x28e   :  { %v5359_v23 = vpop.f32.mrf.mxu1  ;;  %9715 = vmatmul.mubr.msk.bf16.vlgmr.msra.gmra.mxu1 %vm4586_vm3, %v4451_v54  ;;  %v5604_v55 = vpop.f32.mrf.mxu0 }
 0x28f   :  { %v7731_v10 = vadd.f32 %v7730_v18, %v5359_v23 }
 0x290   :  { %v9428_v27 = vpop.f32.mrf.mxu1  ;;  %v9458_v13 = vpop.f32.mrf.mxu0 }
 0x291   :  { %v7732_v31 = vadd.f32 %v7731_v10, %v5408_v51 }
 0x292   :  { %v5362_v2 = vpop.f32.mrf.mxu1  ;;  %v5607_v53 = vpop.f32.mrf.mxu0 }
 0x294   :  { %v9429_v30 = vpop.f32.mrf.mxu1  ;;  %v9459_v17 = vpop.f32.mrf.mxu0 }
 0x295   :  { %v9999_v30 = vld [vmem:[%s12027_s5 + $0x20] sm:$0xff]  }
 0x296   :  { %v5457_v59 = vpop.f32.mrf.mxu1  ;;  %v5702_v21 = vpop.f32.mrf.mxu0 }
 0x297   :  { %v7733_v40 = vadd.f32 %v7732_v31, %v5457_v59 }
 0x298   :  { %v9440_v19 = vpop.f32.mrf.mxu1  ;;  %v9470_v15 = vpop.f32.mrf.mxu0 }
 0x299   :  { %v7734_v28 = vadd.f32 %v7733_v40, %v5506_v60  ;;  %v9996_v60 = vld [vmem:[%s12027_s5 + $0x38] sm:$0xff]  }
 0x29a   :  { %v5460_v46 = vpop.f32.mrf.mxu1  ;;  %v5705_v41 = vpop.f32.mrf.mxu0  ;;  %9719 = vmatpush3.bf16.msra.mxu0 %v9996_v60  ;;  %v10000_v15 = vld [vmem:[%s12027_s5 + $0x18] sm:$0xff]  }
 0x29b   :  { %9720 = vmatprep.subr.bf16.mxu0 %v10005_v0 }
 0x29c   :  { %v9441_v32 = vpop.f32.mrf.mxu1  ;;  %v9471_v49 = vpop.f32.mrf.mxu0 }
 0x29e   :  { %v5555_v61 = vpop.f32.mrf.mxu1  ;;  %v5800_v42 = vpop.f32.mrf.mxu0  ;;  %9721 = vmatpush3.bf16.msra.mxu0 %v9997_v11 }
 0x29f   :  { %v7735_v35 = vadd.f32 %v7734_v28, %v5555_v61  ;;  %9722 = vmatprep.subr.bf16.mxu0 %v10005_v0  ;;  %v10001_v61 = vld [vmem:[%s12027_s5 + $0x10] sm:$0xff]  }
 0x2a0   :  { %v9452_v24 = vpop.f32.mrf.mxu1  ;;  %v9482_v36 = vpop.f32.mrf.mxu0 }
 0x2a1   :  { %v7736_v16 = vadd.f32 %v7735_v35, %v5604_v55  ;;  %v9998_v55 = vld [vmem:[%s12027_s5 + $0x28] sm:$0xff]  }
 0x2a2   :  { %v5558_v37 = vpop.f32.mrf.mxu1  ;;  %v5803_v39 = vpop.f32.mrf.mxu0  ;;  %9723 = vmatpush3.bf16.msra.mxu0 %v9998_v55 }
 0x2a3   :  { %9724 = vmatprep.subr.bf16.mxu0 %v10005_v0  ;;  %v10002_v37 = vld [vmem:[%s12027_s5 + $0x8] sm:$0xff]  }
 0x2a4   :  { %v9453_v43 = vpop.f32.mrf.mxu1  ;;  %v9483_v14 = vpop.f32.mrf.mxu0 }
 0x2a6   :  { %v5653_v57 = vpop.f32.mrf.mxu1  ;;  %v5898_v48 = vpop.f32.mrf.mxu0  ;;  %9725 = vmatpush3.bf16.msra.mxu0 %v9999_v30 }
 0x2a7   :  { %v7737_v6 = vadd.f32 %v7736_v16, %v5653_v57  ;;  %9726 = vmatprep.subr.bf16.mxu0 %v10005_v0 }
 0x2a8   :  { %v9464_v62 = vpop.f32.mrf.mxu1  ;;  %v9494_v29 = vpop.f32.mrf.mxu0 }
 0x2a9   :  { %v7738_v33 = vadd.f32 %v7737_v6, %v5702_v21 }
 0x2aa   :  { %v5656_v44 = vpop.f32.mrf.mxu1  ;;  %v5901_v9 = vpop.f32.mrf.mxu0  ;;  %9727 = vmatpush3.bf16.msra.mxu0 %v10000_v15 }
 0x2ab   :  { %9728 = vmatprep.subr.bf16.mxu0 %v10005_v0 }
 0x2ac   :  { %v9465_v4 = vpop.f32.mrf.mxu1  ;;  %v9495_v51 = vpop.f32.mrf.mxu0 }
 0x2ae   :  { %v5751_v63 = vpop.f32.mrf.mxu1  ;;  %v5996_v26 = vpop.f32.mrf.mxu0  ;;  %9729 = vmatpush3.bf16.msra.mxu0 %v10001_v61 }
 0x2af   :  { %v7739_v50 = vadd.f32 %v7738_v33, %v5751_v63  ;;  %9730 = vmatprep.subr.bf16.mxu0 %v10005_v0 }
 0x2b0   :  { %v9476_v38 = vpop.f32.mrf.mxu1  ;;  %v9506_v58 = vpop.f32.mrf.mxu0 }
 0x2b1   :  { %v7740_v12 = vadd.f32 %v7739_v50, %v5800_v42 }
 0x2b2   :  { %v5754_v1 = vpop.f32.mrf.mxu1  ;;  %v5999_v52 = vpop.f32.mrf.mxu0  ;;  %9731 = vmatpush3.bf16.msra.mxu0 %v10002_v37 }
 0x2b3   :  { %9732 = vmatprep.subr.bf16.mxu0 %v10005_v0 }
 0x2b4   :  { %v9477_v56 = vpop.f32.mrf.mxu1  ;;  %v9507_v5 = vpop.f32.mrf.mxu0 }
 0x2b6   :  { %v5849_v7 = vpop.f32.mrf.mxu1  ;;  %v6094_v3 = vpop.f32.mrf.mxu0 }
 0x2b7   :  { %v7741_v25 = vadd.f32 %v7740_v12, %v5849_v7 }
 0x2b8   :  { %v9488_v34 = vpop.f32.mrf.mxu1  ;;  %v9518_v22 = vpop.f32.mrf.mxu0 }
 0x2b9   :  { %v7742_v20 = vadd.f32 %v7741_v25, %v5898_v48  ;;  %v10003_v48 = vld [vmem:[%s12027_s5] sm:$0xff]  }
 0x2ba   :  { %v5852_v18 = vpop.f32.mrf.mxu1  ;;  %v6097_v47 = vpop.f32.mrf.mxu0  ;;  %9733 = vmatpush3.bf16.msra.mxu0 %v10003_v48 }
 0x2bc   :  { %v9489_v54 = vpop.f32.mrf.mxu1  ;;  %v9519_v45 = vpop.f32.mrf.mxu0 }
 0x2be   :  { %v5947_v8 = vpop.f32.mrf.mxu1  ;;  %v6192_v10 = vpop.f32.mrf.mxu0 }
 0x2bf   :  { %v7743_v23 = vadd.f32 %v7742_v20, %v5947_v8 }
 0x2c0   :  { %v9500_v27 = vpop.f32.mrf.mxu1  ;;  %v9530_v13 = vpop.f32.mrf.mxu0 }
 0x2c1   :  { %v7744_v31 = vadd.f32 %v7743_v23, %v5996_v26 }
 0x2c2   :  { %v5950_v2 = vpop.f32.mrf.mxu1  ;;  %v6195_v53 = vpop.f32.mrf.mxu0 }
 0x2c4   :  { %v9501_v17 = vpop.f32.mrf.mxu1  ;;  %v9531_v59 = vpop.f32.mrf.mxu0 }
 0x2c6   :  { %v6045_v40 = vpop.f32.mrf.mxu1  ;;  %v6290_v19 = vpop.f32.mrf.mxu0 }
 0x2c7   :  { %v7745_v21 = vadd.f32 %v7744_v31, %v6045_v40 }
 0x2c8   :  { %v9512_v28 = vpop.f32.mrf.mxu1  ;;  %v9542_v46 = vpop.f32.mrf.mxu0 }
 0x2c9   :  { %v7746_v41 = vadd.f32 %v7745_v21, %v6094_v3 }
 0x2ca   :  { %v6048_v32 = vpop.f32.mrf.mxu1  ;;  %v6293_v49 = vpop.f32.mrf.mxu0 }
 0x2cc   :  { %v9513_v35 = vpop.f32.mrf.mxu1  ;;  %v9543_v42 = vpop.f32.mrf.mxu0 }
 0x2ce   :  { %v6143_v24 = vpop.f32.mrf.mxu1  ;;  %v6388_v16 = vpop.f32.mrf.mxu0 }
 0x2cf   :  { %v7747_v36 = vadd.f32 %v7746_v41, %v6143_v24 }
 0x2d0   :  { %v9524_v39 = vpop.f32.mrf.mxu1  ;;  %v9554_v43 = vpop.f32.mrf.mxu0 }
 0x2d1   :  { %v7748_v14 = vadd.f32 %v7747_v36, %v6192_v10 }
 0x2d2   :  { %v6146_v57 = vpop.f32.mrf.mxu1  ;;  %v6391_v6 = vpop.f32.mrf.mxu0 }
 0x2d4   :  { %v9525_v62 = vpop.f32.mrf.mxu1  ;;  %v9555_v29 = vpop.f32.mrf.mxu0 }
 0x2d6   :  { %v6241_v33 = vpop.f32.mrf.mxu1  ;;  %v6486_v9 = vpop.f32.mrf.mxu0 }
 0x2d7   :  { %v7749_v44 = vadd.f32 %v7748_v14, %v6241_v33 }
 0x2d8   :  { %v9536_v4 = vpop.f32.mrf.mxu1  ;;  %v9566_v51 = vpop.f32.mrf.mxu0 }
 0x2d9   :  { %v7750_v63 = vadd.f32 %v7749_v44, %v6290_v19 }
 0x2da   :  { %v6244_v50 = vpop.f32.mrf.mxu1  ;;  %v6489_v26 = vpop.f32.mrf.mxu0 }
 0x2dc   :  { %v9537_v38 = vpop.f32.mrf.mxu1  ;;  %v9567_v58 = vpop.f32.mrf.mxu0 }
 0x2de   :  { %v6339_v12 = vpop.f32.mrf.mxu1  ;;  %v6584_v1 = vpop.f32.mrf.mxu0 }
 0x2df   :  { %v7751_v0 = vadd.f32 %v7750_v63, %v6339_v12 }
 0x2e0   :  { %v9548_v52 = vpop.f32.mrf.mxu1  ;;  %v9578_v56 = vpop.f32.mrf.mxu0 }
 0x2e1   :  { %v7752_v5 = vadd.f32 %v7751_v0, %v6388_v16 }
 0x2e2   :  { %v6342_v7 = vpop.f32.mrf.mxu1  ;;  %v6587_v25 = vpop.f32.mrf.mxu0 }
 0x2e4   :  { %v9549_v3 = vpop.f32.mrf.mxu1  ;;  %v9579_v60 = vpop.f32.mrf.mxu0 }
 0x2e6   :  { %v6437_v34 = vpop.f32.mrf.mxu1  ;;  %v6682_v20 = vpop.f32.mrf.mxu0 }
 0x2e7   :  { %v7753_v22 = vadd.f32 %v7752_v5, %v6437_v34 }
 0x2e8   :  { %v9560_v18 = vpop.f32.mrf.mxu1  ;;  %v9590_v47 = vpop.f32.mrf.mxu0 }
 0x2e9   :  { %v7754_v11 = vadd.f32 %v7753_v22, %v6486_v9 }
 0x2ea   :  { %v6440_v54 = vpop.f32.mrf.mxu1  ;;  %v6685_v45 = vpop.f32.mrf.mxu0 }
 0x2ec   :  { %v9561_v8 = vpop.f32.mrf.mxu1  ;;  %v9591_v23 = vpop.f32.mrf.mxu0 }
 0x2ee   :  { %v6535_v10 = vpop.f32.mrf.mxu1  ;;  %v6780_v27 = vpop.f32.mrf.mxu0 }
 0x2ef   :  { %v7755_v55 = vadd.f32 %v7754_v11, %v6535_v10 }
 0x2f0   :  { %v9572_v13 = vpop.f32.mrf.mxu1  ;;  %v9602_v31 = vpop.f32.mrf.mxu0 }
 0x2f1   :  { %v7756_v2 = vadd.f32 %v7755_v55, %v6584_v1 }
 0x2f2   :  { %v6538_v53 = vpop.f32.mrf.mxu1  ;;  %v6783_v30 = vpop.f32.mrf.mxu0 }
 0x2f4   :  { %v9573_v17 = vpop.f32.mrf.mxu1  ;;  %v9603_v59 = vpop.f32.mrf.mxu0 }
 0x2f6   :  { %v6633_v40 = vpop.f32.mrf.mxu1  ;;  %v6878_v21 = vpop.f32.mrf.mxu0 }
 0x2f7   :  { %v7757_v29 = vadd.f32 %v7756_v2, %v6633_v40 }
 0x2f8   :  { %v9584_v19 = vpop.f32.mrf.mxu1  ;;  %v9614_v15 = vpop.f32.mrf.mxu0 }
 0x2f9   :  { %v7758_v51 = vadd.f32 %v7757_v29, %v6682_v20 }
 0x2fa   :  { %v6636_v28 = vpop.f32.mrf.mxu1  ;;  %v6881_v46 = vpop.f32.mrf.mxu0 }
 0x2fc   :  { %v9585_v41 = vpop.f32.mrf.mxu1  ;;  %v9615_v32 = vpop.f32.mrf.mxu0 }
 0x2fe   :  { %v6731_v49 = vpop.f32.mrf.mxu1  ;;  %v6976_v61 = vpop.f32.mrf.mxu0 }
 0x2ff   :  { %v7759_v26 = vadd.f32 %v7758_v51, %v6731_v49 }
 0x300   :  { %v9596_v35 = vpop.f32.mrf.mxu1  ;;  %v9626_v42 = vpop.f32.mrf.mxu0 }
 0x301   :  { %v7760_v1 = vadd.f32 %v7759_v26, %v6780_v27 }
 0x302   :  { %v6734_v24 = vpop.f32.mrf.mxu1  ;;  %v6979_v36 = vpop.f32.mrf.mxu0 }
 0x304   :  { %v9597_v16 = vpop.f32.mrf.mxu1  ;;  %v9627_v37 = vpop.f32.mrf.mxu0 }
 0x306   :  { %v6829_v39 = vpop.f32.mrf.mxu1  ;;  %v7074_v43 = vpop.f32.mrf.mxu0 }
 0x307   :  { %v7761_v5 = vadd.f32 %v7760_v1, %v6829_v39 }
 0x308   :  { %v9608_v14 = vpop.f32.mrf.mxu1  ;;  %v9638_v57 = vpop.f32.mrf.mxu0 }
 0x309   :  { %v7762_v34 = vadd.f32 %v7761_v5, %v6878_v21  ;;  %v8291_v5 = vld [vmem:[%s12028_s4] ss:$0 sm:$0xff] }
 0x30a   :  { %v6832_v6 = vpop.f32.mrf.mxu1  ;;  %v7077_v48 = vpop.f32.mrf.mxu0 }
 0x30c   :  { %v9609_v62 = vpop.f32.mrf.mxu1  ;;  %v9639_v33 = vpop.f32.mrf.mxu0 }
 0x30e   :  { %v6927_v44 = vpop.f32.mrf.mxu1  ;;  %v7172_v9 = vpop.f32.mrf.mxu0 }
 0x30f   :  { %v7763_v47 = vadd.f32 %v7762_v34, %v6927_v44 }
 0x310   :  { %v9620_v4 = vpop.f32.mrf.mxu1  ;;  %v9650_v63 = vpop.f32.mrf.mxu0 }
 0x311   :  { %v7764_v8 = vadd.f32 %v7763_v47, %v6976_v61  ;;  %v8292_v47 = vld [vmem:[%s12029_s6] ss:$0 sm:$0xff] }
 0x312   :  { %v6930_v50 = vpop.f32.mrf.mxu1  ;;  %v7175_v38 = vpop.f32.mrf.mxu0 }
 0x314   :  { %v9621_v58 = vpop.f32.mrf.mxu1  ;;  %v9651_v12 = vpop.f32.mrf.mxu0 }
 0x316   :  { %v7025_v0 = vpop.f32.mrf.mxu1  ;;  %v7270_v52 = vpop.f32.mrf.mxu0 }
 0x317   :  { %v7765_v55 = vadd.f32 %v7764_v8, %v7025_v0 }
 0x318   :  { %v9632_v56 = vpop.f32.mrf.mxu1  ;;  %v9662_v7 = vpop.f32.mrf.mxu0 }
 0x319   :  { %v7766_v53 = vadd.f32 %v7765_v55, %v7074_v43 }
 0x31a   :  { %v7028_v25 = vpop.f32.mrf.mxu1  ;;  %v7273_v3 = vpop.f32.mrf.mxu0 }
 0x31c   :  { %v9633_v60 = vpop.f32.mrf.mxu1  ;;  %v9663_v22 = vpop.f32.mrf.mxu0 }
 0x31e   :  { %v7123_v18 = vpop.f32.mrf.mxu1  ;;  %v7368_v20 = vpop.f32.mrf.mxu0 }
 0x31f   :  { %v7767_v59 = vadd.f32 %v7766_v53, %v7123_v18 }
 0x320   :  { %v9644_v11 = vpop.f32.mrf.mxu1  ;;  %v9674_v54 = vpop.f32.mrf.mxu0 }
 0x321   :  { %v7768_v28 = vadd.f32 %v7767_v59, %v7172_v9 }
 0x322   :  { %v7126_v45 = vpop.f32.mrf.mxu1  ;;  %v7371_v23 = vpop.f32.mrf.mxu0 }
 0x324   :  { %v9645_v10 = vpop.f32.mrf.mxu1  ;;  %v9675_v27 = vpop.f32.mrf.mxu0 }
 0x326   :  { %v7221_v13 = vpop.f32.mrf.mxu1  ;;  %v7466_v31 = vpop.f32.mrf.mxu0 }
 0x327   :  { %v7769_v32 = vadd.f32 %v7768_v28, %v7221_v13 }
 0x328   :  { %v9656_v2 = vpop.f32.mrf.mxu1  ;;  %v9686_v30 = vpop.f32.mrf.mxu0 }
 0x329   :  { %v7770_v24 = vadd.f32 %v7769_v32, %v7270_v52 }
 0x32a   :  { %v7224_v17 = vpop.f32.mrf.mxu1  ;;  %v7469_v40 = vpop.f32.mrf.mxu0 }
 0x32c   :  { %v9657_v21 = vpop.f32.mrf.mxu1  ;;  %v9687_v19 = vpop.f32.mrf.mxu0 }
 0x32e   :  { %v7319_v15 = vpop.f32.mrf.mxu1  ;;  %v7564_v46 = vpop.f32.mrf.mxu0 }
 0x32f   :  { %v7771_v37 = vadd.f32 %v7770_v24, %v7319_v15 }
 0x330   :  { %v9668_v41 = vpop.f32.mrf.mxu1  ;;  %v9698_v49 = vpop.f32.mrf.mxu0 }
 0x331   :  { %v7772_v6 = vadd.f32 %v7771_v37, %v7368_v20 }
 0x332   :  { %v7322_v61 = vpop.f32.mrf.mxu1  ;;  %v7567_v35 = vpop.f32.mrf.mxu0 }
 0x334   :  { %v9669_v42 = vpop.f32.mrf.mxu1  ;;  %v9699_v36 = vpop.f32.mrf.mxu0 }
 0x336   :  { %v7417_v16 = vpop.f32.mrf.mxu1  ;;  %v7662_v39 = vpop.f32.mrf.mxu0 }
 0x337   :  { %v7773_v29 = vadd.f32 %v7772_v6, %v7417_v16 }
 0x338   :  { %v9680_v43 = vpop.f32.mrf.mxu1  ;;  %v9710_v14 = vpop.f32.mrf.mxu0 }
 0x339   :  { %v7774_v4 = vadd.f32 %v7773_v29, %v7466_v31 }
 0x33a   :  { %v7420_v57 = vpop.f32.mrf.mxu1  ;;  %v7665_v48 = vpop.f32.mrf.mxu0 }
 0x33c   :  { %v9681_v62 = vpop.f32.mrf.mxu1  ;;  %v9711_v33 = vpop.f32.mrf.mxu0 }
 0x33e   :  { %v7515_v44 = vpop.f32.mrf.mxu1 }
 0x33f   :  { %v7775_v63 = vadd.f32 %v7774_v4, %v7515_v44 }
 0x340   :  { %v9692_v9 = vpop.f32.mrf.mxu1 }
 0x341   :  { %v7776_v38 = vadd.f32 %v7775_v63, %v7564_v46 }
 0x342   :  { %v7518_v51 = vpop.f32.mrf.mxu1 }
 0x344   :  { %v9693_v50 = vpop.f32.mrf.mxu1 }
 0x346   :  { %v7613_v26 = vpop.f32.mrf.mxu1 }
 0x347   :  { %v7777_v12 = vadd.f32 %v7776_v38, %v7613_v26 }
 0x348   :  { %v9704_v58 = vpop.f32.mrf.mxu1 }
 0x349   :  { %v7778_v52 = vadd.f32 %v7777_v12, %v7662_v39 }
 0x34a   :  { %v7616_v0 = vpop.f32.mrf.mxu1 }
 0x34c   :  { %v9705_v1 = vpop.f32.mrf.mxu1 }
 0x34e   :  { %v7711_v56 = vpop.f32.mrf.mxu1 }
 0x34f   :  { %v7779_v7 = vadd.f32 %v7778_v52, %v7711_v56 }
 0x350   :  { %v9716_v25 = vpop.f32.mrf.mxu1 }
 0x351   :  { %v7787_v3 = vadd.f32 %v8291_v5, %v7779_v7 }
 0x352   :  { %v7714_v60 = vpop.f32.mrf.mxu1 }
 0x353   :  { %v7788_v34 = vmax.f32 %v7787_v3, 0.0 }
 0x354   :  { %v9717_v22 = vpop.f32.mrf.mxu1 }
 0x355   :  { %v7789_v18 = vpack.c.bf16 %v7788_v34, %v7788_v34 }
 0x357   :  { %9735 = vmatmul.mubr.bf16.vlgmr.msra.gmra.mxu0 %v7789_v18 }
 0x417   :  { %v7895_v20 = vpop.f32.mrf.mxu0 }
 0x418   :  { %v7896_v11 = vadd.f32 %v8292_v47, %v7895_v20 }
 0x419   :  { %v9736_v54 = vpop.f32.mrf.mxu0 }
 0x41a   :  { %7901 = vst [vmem:[%s12030_s7] sm:$0xff] %v7896_v11 }
 0x41b   :  { %v7898_v45 = vpop.f32.mrf.mxu0 }
 0x41d   :  { %v9737_v8 = vpop.f32.mrf.mxu0 }

</bundles_post_ra>
